<compile_context>
chip_gen: v7x
topology: tpu7x:2x2x1
jax: 0.10.0
libtpu: 0.0.40
codegen_flags: <defaults>
</compile_context>

<pallas_src>
import functools
import math

import jax
import jax.numpy as jnp
import numpy as np
from jax import lax
from jax.experimental import pallas as pl
from jax.experimental.pallas import tpu as pltpu


# ------------------------------ Pallas kernel --------------------------------

def _down3d_kernel(x_ref, mask_ref, sel_ref, perm_ref, w1_ref, b1_ref,
                   w2_ref, b2_ref, o_ref, xp_ref, *, c_in, w_unpooled, offs):
    """Fused MaxPool3d(2) + (Conv3d(3,pad=1)+ReLU) x 2 for one batch element.

    x_ref:    (1, C*Dp, 2*H*W)  rows = c*Dp + dp ; lanes = d0*(H*W) + h*W + w
    mask_ref: (27, P)           per-tap zero-padding masks over pooled flat idx
    sel_ref:  (H*W, Hp*Wp)      one-hot lane gather (2hp*W + 2wp) -> (hp*Wp+wp)
    perm_ref: (C*Dp, C*Dp)      one-hot row permutation (c*Dp+dp) -> (dp*C+c)
    w1_ref:   (9, CMID, 3*CPAD) conv1 weights grouped by (kd,kh); K = kw-major
    b1_ref:   (CMID, 1)
    w2_ref:   (9, COUT, 3*CMID) conv2 weights grouped the same way
    b2_ref:   (COUT, 1)
    o_ref:    (1, COUT, P)      P = Dp*Hp*Wp, lane-dense
    xp_ref:   (CPAD, P)         VMEM scratch: pooled input, channel-padded to 8
    """
    hw = sel_ref.shape[0]            # unpooled H*W
    hwp = sel_ref.shape[1]           # pooled  Hp*Wp
    p = o_ref.shape[2]               # pooled  Dp*Hp*Wp
    dp_cnt = p // hwp
    cpad = xp_ref.shape[0]
    cmid = w1_ref.shape[1]
    cout = w2_ref.shape[1]

    # ---- fused 2x2x2 max-pool (no HBM round trip, no extra XLA op) ----------
    x = x_ref[0]                                              # (C*Dp, 2*H*W)
    t = jnp.maximum(x[:, :hw], x[:, hw:])                     # d-pair max
    t = jnp.maximum(t, pltpu.roll(t, shift=hw - 1, axis=1))          # w-pair
    t = jnp.maximum(t, pltpu.roll(t, shift=hw - w_unpooled, axis=1))  # h-pair
    # Exact gather of the 2x2x2-block maxima + (c,dp) row permutation, done as
    # two tiny one-hot matmuls (garbage lanes are multiplied by exact zeros).
    t = jnp.dot(t, sel_ref[...], preferred_element_type=jnp.float32)   # (C*Dp, Hp*Wp)
    t = jnp.dot(perm_ref[...], t, preferred_element_type=jnp.float32)  # rows dp*C+c

    # Stage the pooled activation lane-dense as (CPAD, P).  Channel-pad rows
    # are re-zeroed every step (cheap; keeps 0*stale-NaN out of the matmuls and
    # stays safe when the "parallel" batch axis is sharded across cores).
    if cpad > c_in:
        xp_ref[c_in:, :] = jnp.zeros((cpad - c_in, p), jnp.float32)
    for d in range(dp_cnt):
        xp_ref[:c_in, d * hwp:(d + 1) * hwp] = t[d * c_in:(d + 1) * c_in, :]
    x0 = xp_ref[...]                                          # (CPAD, P)

    # ---- double conv: 9 accumulating matmuls per conv, RHS built in-register
    def conv_relu(v_in, w_ref, b_ref, n_out):
        acc = jnp.zeros((n_out, p), jnp.float32)
        for g in range(9):                                    # (kd, kh) groups
            pieces = []
            for kw in range(3):
                k = 3 * g + kw
                s = offs[k]
                if s == 0:                                    # center tap
                    v = v_in
                else:
                    v = pltpu.roll(v_in, shift=(-s) % p, axis=1) * mask_ref[k, :]
                pieces.append(v)
            rhs = jnp.concatenate(pieces, axis=0)             # (3*rows, P), vreg-aligned
            acc = acc + jnp.dot(w_ref[g], rhs,
                                preferred_element_type=jnp.float32)
        return jnp.maximum(acc + b_ref[...], 0.0)

    h = conv_relu(x0, w1_ref, b1_ref, cmid)                   # conv1 + ReLU
    o_ref[0] = conv_relu(h, w2_ref, b2_ref, cout)             # conv2 + ReLU


# --------------------------- wrapper-side constants ---------------------------

def _conv_tap_masks(dp, hp, wp):
    dd = np.arange(dp)[:, None, None]
    hh = np.arange(hp)[None, :, None]
    ww = np.arange(wp)[None, None, :]
    rows = []
    for kd in range(3):
        for kh in range(3):
            for kw in range(3):
                m = ((dd + kd - 1 >= 0) & (dd + kd - 1 < dp) &
                     (hh + kh - 1 >= 0) & (hh + kh - 1 < hp) &
                     (ww + kw - 1 >= 0) & (ww + kw - 1 < wp))
                rows.append(m.reshape(-1))
    return np.stack(rows).astype(np.float32)                  # (27, dp*hp*wp)


def _pool_gather_matrices(c, d, h, w):
    dp, hp, wp = d // 2, h // 2, w // 2
    sel = np.zeros((h * w, hp * wp), np.float32)               # lane gather
    for i in range(hp):
        for j in range(wp):
            sel[(2 * i) * w + 2 * j, i * wp + j] = 1.0
    perm = np.zeros((c * dp, c * dp), np.float32)               # row permutation
    for i in range(dp):
        for j in range(c):
            perm[i * c + j, j * dp + i] = 1.0
    return sel, perm


def pack_down3d_params(params, in_ch):
    """One-time weight repacking (kept out of the per-call hot path)."""
    w1, b1, w2, b2 = params["w1"], params["b1"], params["w2"], params["b2"]
    cmid, cout = w1.shape[0], w2.shape[0]
    cpad = ((in_ch + 7) // 8) * 8            # pad conv1's K to full sublane groups
    w1t = jnp.transpose(w1, (2, 3, 4, 0, 1)).reshape(27, cmid, in_ch)
    if cpad > in_ch:
        w1t = jnp.concatenate(
            [w1t, jnp.zeros((27, cmid, cpad - in_ch), w1t.dtype)], axis=-1)
    w1g = w1t.reshape(9, 3, cmid, cpad).transpose(0, 2, 1, 3).reshape(
        9, cmid, 3 * cpad)
    w2t = jnp.transpose(w2, (2, 3, 4, 0, 1)).reshape(27, cout, cmid)
    w2g = w2t.reshape(9, 3, cout, cmid).transpose(0, 2, 1, 3).reshape(
        9, cout, 3 * cmid)
    return {"w1g": w1g, "b1": b1.reshape(cmid, 1),
            "w2g": w2g, "b2": b2.reshape(cout, 1)}


# ------------------------------- Down3D forward -------------------------------

def down3d_forward(x, packed):
    n, c, d, h, w = x.shape
    assert d % 2 == 0 and h % 2 == 0 and w % 2 == 0
    dp, hp, wp = d // 2, h // 2, w // 2
    p = dp * hp * wp
    w1g, b1, w2g, b2 = packed["w1g"], packed["b1"], packed["w2g"], packed["b2"]
    cmid, cout = w1g.shape[1], w2g.shape[1]
    cpad = w1g.shape[2] // 3

    # trace-time constants (baked into the executable, zero runtime ops)
    mask = jnp.asarray(_conv_tap_masks(dp, hp, wp))            # (27, P)
    sel_np, perm_np = _pool_gather_matrices(c, d, h, w)
    sel, perm = jnp.asarray(sel_np), jnp.asarray(perm_np)

    offs = tuple((kd - 1) * hp * wp + (kh - 1) * wp + (kw - 1)
                 for kd in range(3) for kh in range(3) for kw in range(3))

    rows, lanes = c * dp, 2 * h * w
    xr = x.reshape(n, rows, lanes)                             # free contiguous regroup

    kernel = functools.partial(_down3d_kernel, c_in=c, w_unpooled=w, offs=offs)
    out = pl.pallas_call(
        kernel,
        out_shape=jax.ShapeDtypeStruct((n, cout, p), jnp.float32),
        grid=(n,),
        in_specs=[
            pl.BlockSpec((1, rows, lanes), lambda i: (i, 0, 0)),
            pl.BlockSpec((27, p), lambda i: (0, 0)),
            pl.BlockSpec((h * w, hp * wp), lambda i: (0, 0)),
            pl.BlockSpec((rows, rows), lambda i: (0, 0)),
            pl.BlockSpec((9, cmid, 3 * cpad), lambda i: (0, 0, 0)),
            pl.BlockSpec((cmid, 1), lambda i: (0, 0)),
            pl.BlockSpec((9, cout, 3 * cmid), lambda i: (0, 0, 0)),
            pl.BlockSpec((cout, 1), lambda i: (0, 0)),
        ],
        out_specs=pl.BlockSpec((1, cout, p), lambda i: (i, 0, 0)),
        scratch_shapes=[pltpu.VMEM((cpad, p), jnp.float32)],
        compiler_params=pltpu.CompilerParams(
            dimension_semantics=("parallel",)),
    )(xr, mask, sel, perm, w1g, b1, w2g, b2)
    return out.reshape(n, cout, dp, hp, wp)                    # free regroup


# ------------------------------ pure-JAX reference ----------------------------

def down3d_reference(x, params):
    pooled = lax.reduce_window(x, -jnp.inf, lax.max,
                               (1, 1, 2, 2, 2), (1, 1, 2, 2, 2), "VALID")
    dn = ("NCDHW", "OIDHW", "NCDHW")
    y = lax.conv_general_dilated(
        pooled, params["w1"], (1, 1, 1), [(1, 1)] * 3,
        dimension_numbers=lax.conv_dimension_numbers(
            pooled.shape, params["w1"].shape, dn),
        precision=lax.Precision.HIGHEST)
    y = jax.nn.relu(y + params["b1"].reshape(1, -1, 1, 1, 1))
    y = lax.conv_general_dilated(
        y, params["w2"], (1, 1, 1), [(1, 1)] * 3,
        dimension_numbers=lax.conv_dimension_numbers(
            y.shape, params["w2"].shape, dn),
        precision=lax.Precision.HIGHEST)
    return jax.nn.relu(y + params["b2"].reshape(1, -1, 1, 1, 1))


# ----------------------------------- main --------------------------------------

if __name__ == "__main__":
    N, in_ch, out_ch = 2, 4, 8
    D = H = W = 16

    key = jax.random.PRNGKey(0)
    kx, k1, k2, k3, k4 = jax.random.split(key, 5)
    x = jax.random.normal(kx, (N, in_ch, D, H, W), jnp.float32)

    bound1 = 1.0 / math.sqrt(in_ch * 27)
    bound2 = 1.0 / math.sqrt(out_ch * 27)
    params = {
        "w1": jax.random.uniform(k1, (out_ch, in_ch, 3, 3, 3), jnp.float32,
                                 -bound1, bound1),
        "b1": jax.random.uniform(k2, (out_ch,), jnp.float32, -bound1, bound1),
        "w2": jax.random.uniform(k3, (out_ch, out_ch, 3, 3, 3), jnp.float32,
                                 -bound2, bound2),
        "b2": jax.random.uniform(k4, (out_ch,), jnp.float32, -bound2, bound2),
    }

    packed = pack_down3d_params(params, in_ch)        # one-time weight packing
    y = jax.jit(down3d_forward)(x, packed)
    y = jax.block_until_ready(y)
    assert y.shape == (N, out_ch, D // 2, H // 2, W // 2), y.shape

    y_ref = jax.block_until_ready(down3d_reference(x, params))
    np.testing.assert_allclose(np.asarray(y), np.asarray(y_ref),
                               rtol=1e-3, atol=1e-4)
    print("KERNEL_OK")
</pallas_src>

<mosaic_0001>
module attributes {stable_mosaic.version = 11 : i64} {
  func.func @_down3d_kernel(%arg0: i32, %arg1: memref<1x32x512xf32, #tpu.memory_space<vmem>>, %arg2: memref<27x512xf32, #tpu.memory_space<vmem>>, %arg3: memref<256x64xf32, #tpu.memory_space<vmem>>, %arg4: memref<32x32xf32, #tpu.memory_space<vmem>>, %arg5: memref<9x8x24xf32, #tpu.memory_space<vmem>>, %arg6: memref<8x1xf32, #tpu.memory_space<vmem>>, %arg7: memref<9x8x24xf32, #tpu.memory_space<vmem>>, %arg8: memref<8x1xf32, #tpu.memory_space<vmem>>, %arg9: memref<1x8x512xf32, #tpu.memory_space<vmem>>, %arg10: memref<8x512xf32, #tpu.memory_space<vmem>>) attributes {dimension_semantics = [#tpu.dimension_semantics<parallel>], iteration_bounds = array<i64: 2>, scalar_prefetch = 0 : i64, scratch_operands = 1 : i64, tpu.core_type = #tpu.core_type<tc>, window_params = [{transform_indices = @transform_0, window_bounds = array<i64: 1, 32, 512>}, {pipeline_mode = #tpu.pipeline_mode<synchronous>, transform_indices = @transform_1, window_bounds = array<i64: 27, 512>}, {pipeline_mode = #tpu.pipeline_mode<synchronous>, transform_indices = @transform_2, window_bounds = array<i64: 256, 64>}, {pipeline_mode = #tpu.pipeline_mode<synchronous>, transform_indices = @transform_3, window_bounds = array<i64: 32, 32>}, {pipeline_mode = #tpu.pipeline_mode<synchronous>, transform_indices = @transform_4, window_bounds = array<i64: 9, 8, 24>}, {pipeline_mode = #tpu.pipeline_mode<synchronous>, transform_indices = @transform_5, window_bounds = array<i64: 8, 1>}, {pipeline_mode = #tpu.pipeline_mode<synchronous>, transform_indices = @transform_6, window_bounds = array<i64: 9, 8, 24>}, {pipeline_mode = #tpu.pipeline_mode<synchronous>, transform_indices = @transform_7, window_bounds = array<i64: 8, 1>}, {transform_indices = @transform_8, window_bounds = array<i64: 1, 8, 512>}]} {
    %c0 = arith.constant 0 : index
    %c0_0 = arith.constant 0 : index
    %c0_1 = arith.constant 0 : index
    %0 = vector.load %arg1[%c0, %c0_0, %c0_1] : memref<1x32x512xf32, #tpu.memory_space<vmem>>, vector<1x32x512xf32>
    %1 = vector.shape_cast %0 : vector<1x32x512xf32> to vector<32x512xf32>
    %2 = vector.extract_strided_slice %1 {offsets = [0, 0], sizes = [32, 256], strides = [1, 1]} : vector<32x512xf32> to vector<32x256xf32>
    %3 = vector.extract_strided_slice %1 {offsets = [0, 256], sizes = [32, 256], strides = [1, 1]} : vector<32x512xf32> to vector<32x256xf32>
    %4 = arith.maximumf %2, %3 : vector<32x256xf32>
    %c255_i32 = arith.constant 255 : i32
    %5 = tpu.dynamic_rotate %4 by %c255_i32 dim 1 : vector<32x256xf32>, i32 -> vector<32x256xf32>
    %6 = arith.maximumf %4, %5 : vector<32x256xf32>
    %c240_i32 = arith.constant 240 : i32
    %7 = tpu.dynamic_rotate %6 by %c240_i32 dim 1 : vector<32x256xf32>, i32 -> vector<32x256xf32>
    %8 = arith.maximumf %6, %7 : vector<32x256xf32>
    %c0_2 = arith.constant 0 : index
    %c0_3 = arith.constant 0 : index
    %9 = vector.load %arg3[%c0_2, %c0_3] : memref<256x64xf32, #tpu.memory_space<vmem>>, vector<256x64xf32>
    %cst = arith.constant dense<0.000000e+00> : vector<32x64xf32>
    %10 = tpu.matmul %8, %9, %cst {dimension_numbers = #tpu.dot_dimension_numbers<[1], [0], [0], [1], [0, 0, 1, 1], [], []>} : vector<32x256xf32>, vector<256x64xf32>, vector<32x64xf32> -> vector<32x64xf32>
    %c0_4 = arith.constant 0 : index
    %c0_5 = arith.constant 0 : index
    %11 = vector.load %arg4[%c0_4, %c0_5] : memref<32x32xf32, #tpu.memory_space<vmem>>, vector<32x32xf32>
    %cst_6 = arith.constant dense<0.000000e+00> : vector<32x64xf32>
    %12 = tpu.matmul %11, %10, %cst_6 {dimension_numbers = #tpu.dot_dimension_numbers<[1], [0], [0], [1], [0, 0, 1, 1], [], []>} : vector<32x32xf32>, vector<32x64xf32>, vector<32x64xf32> -> vector<32x64xf32>
    %cst_7 = arith.constant 0.000000e+00 : f32
    %13 = vector.broadcast %cst_7 : f32 to vector<4x512xf32>
    %c4 = arith.constant 4 : index
    %c0_8 = arith.constant 0 : index
    %14 = vector.load %arg10[%c4, %c0_8] : memref<8x512xf32, #tpu.memory_space<vmem>>, vector<4x512xf32>
    tpu.vector_store %arg10[%c4, %c0_8], %13 {strides = array<i32>} : memref<8x512xf32, #tpu.memory_space<vmem>>, vector<4x512xf32>,
    %15 = vector.extract_strided_slice %12 {offsets = [0, 0], sizes = [4, 64], strides = [1, 1]} : vector<32x64xf32> to vector<4x64xf32>
    %c0_9 = arith.constant 0 : index
    %c0_10 = arith.constant 0 : index
    %16 = vector.load %arg10[%c0_9, %c0_10] : memref<8x512xf32, #tpu.memory_space<vmem>>, vector<4x64xf32>
    tpu.vector_store %arg10[%c0_9, %c0_10], %15 {strides = array<i32>} : memref<8x512xf32, #tpu.memory_space<vmem>>, vector<4x64xf32>,
    %17 = vector.extract_strided_slice %12 {offsets = [4, 0], sizes = [4, 64], strides = [1, 1]} : vector<32x64xf32> to vector<4x64xf32>
    %c0_11 = arith.constant 0 : index
    %c64 = arith.constant 64 : index
    %18 = vector.load %arg10[%c0_11, %c64] : memref<8x512xf32, #tpu.memory_space<vmem>>, vector<4x64xf32>
    tpu.vector_store %arg10[%c0_11, %c64], %17 {strides = array<i32>} : memref<8x512xf32, #tpu.memory_space<vmem>>, vector<4x64xf32>,
    %19 = vector.extract_strided_slice %12 {offsets = [8, 0], sizes = [4, 64], strides = [1, 1]} : vector<32x64xf32> to vector<4x64xf32>
    %c0_12 = arith.constant 0 : index
    %c128 = arith.constant 128 : index
    %20 = vector.load %arg10[%c0_12, %c128] : memref<8x512xf32, #tpu.memory_space<vmem>>, vector<4x64xf32>
    tpu.vector_store %arg10[%c0_12, %c128], %19 {strides = array<i32>} : memref<8x512xf32, #tpu.memory_space<vmem>>, vector<4x64xf32>,
    %21 = vector.extract_strided_slice %12 {offsets = [12, 0], sizes = [4, 64], strides = [1, 1]} : vector<32x64xf32> to vector<4x64xf32>
    %c0_13 = arith.constant 0 : index
    %c192 = arith.constant 192 : index
    %22 = vector.load %arg10[%c0_13, %c192] : memref<8x512xf32, #tpu.memory_space<vmem>>, vector<4x64xf32>
    tpu.vector_store %arg10[%c0_13, %c192], %21 {strides = array<i32>} : memref<8x512xf32, #tpu.memory_space<vmem>>, vector<4x64xf32>,
    %23 = vector.extract_strided_slice %12 {offsets = [16, 0], sizes = [4, 64], strides = [1, 1]} : vector<32x64xf32> to vector<4x64xf32>
    %c0_14 = arith.constant 0 : index
    %c256 = arith.constant 256 : index
    %24 = vector.load %arg10[%c0_14, %c256] : memref<8x512xf32, #tpu.memory_space<vmem>>, vector<4x64xf32>
    tpu.vector_store %arg10[%c0_14, %c256], %23 {strides = array<i32>} : memref<8x512xf32, #tpu.memory_space<vmem>>, vector<4x64xf32>,
    %25 = vector.extract_strided_slice %12 {offsets = [20, 0], sizes = [4, 64], strides = [1, 1]} : vector<32x64xf32> to vector<4x64xf32>
    %c0_15 = arith.constant 0 : index
    %c320 = arith.constant 320 : index
    %26 = vector.load %arg10[%c0_15, %c320] : memref<8x512xf32, #tpu.memory_space<vmem>>, vector<4x64xf32>
    tpu.vector_store %arg10[%c0_15, %c320], %25 {strides = array<i32>} : memref<8x512xf32, #tpu.memory_space<vmem>>, vector<4x64xf32>,
    %27 = vector.extract_strided_slice %12 {offsets = [24, 0], sizes = [4, 64], strides = [1, 1]} : vector<32x64xf32> to vector<4x64xf32>
    %c0_16 = arith.constant 0 : index
    %c384 = arith.constant 384 : index
    %28 = vector.load %arg10[%c0_16, %c384] : memref<8x512xf32, #tpu.memory_space<vmem>>, vector<4x64xf32>
    tpu.vector_store %arg10[%c0_16, %c384], %27 {strides = array<i32>} : memref<8x512xf32, #tpu.memory_space<vmem>>, vector<4x64xf32>,
    %29 = vector.extract_strided_slice %12 {offsets = [28, 0], sizes = [4, 64], strides = [1, 1]} : vector<32x64xf32> to vector<4x64xf32>
    %c0_17 = arith.constant 0 : index
    %c448 = arith.constant 448 : index
    %30 = vector.load %arg10[%c0_17, %c448] : memref<8x512xf32, #tpu.memory_space<vmem>>, vector<4x64xf32>
    tpu.vector_store %arg10[%c0_17, %c448], %29 {strides = array<i32>} : memref<8x512xf32, #tpu.memory_space<vmem>>, vector<4x64xf32>,
    %c0_18 = arith.constant 0 : index
    %c0_19 = arith.constant 0 : index
    %31 = vector.load %arg10[%c0_18, %c0_19] : memref<8x512xf32, #tpu.memory_space<vmem>>, vector<8x512xf32>
    %cst_20 = arith.constant 0.000000e+00 : f32
    %32 = vector.broadcast %cst_20 : f32 to vector<8x512xf32>
    %c73_i32 = arith.constant 73 : i32
    %33 = tpu.dynamic_rotate %31 by %c73_i32 dim 1 : vector<8x512xf32>, i32 -> vector<8x512xf32>
    %c0_21 = arith.constant 0 : index
    %c0_22 = arith.constant 0 : index
    %34 = vector.load %arg2[%c0_21, %c0_22] : memref<27x512xf32, #tpu.memory_space<vmem>>, vector<1x512xf32>
    %35 = vector.shape_cast %34 : vector<1x512xf32> to vector<512xf32>
    %36 = vector.shape_cast %35 : vector<512xf32> to vector<1x512xf32>
    %37 = vector.broadcast %36 : vector<1x512xf32> to vector<8x512xf32>
    %38 = arith.mulf %33, %37 : vector<8x512xf32>
    %c72_i32 = arith.constant 72 : i32
    %39 = tpu.dynamic_rotate %31 by %c72_i32 dim 1 : vector<8x512xf32>, i32 -> vector<8x512xf32>
    %c1 = arith.constant 1 : index
    %c0_23 = arith.constant 0 : index
    %40 = vector.load %arg2[%c1, %c0_23] : memref<27x512xf32, #tpu.memory_space<vmem>>, vector<1x512xf32>
    %41 = vector.shape_cast %40 : vector<1x512xf32> to vector<512xf32>
    %42 = vector.shape_cast %41 : vector<512xf32> to vector<1x512xf32>
    %43 = vector.broadcast %42 : vector<1x512xf32> to vector<8x512xf32>
    %44 = arith.mulf %39, %43 : vector<8x512xf32>
    %c71_i32 = arith.constant 71 : i32
    %45 = tpu.dynamic_rotate %31 by %c71_i32 dim 1 : vector<8x512xf32>, i32 -> vector<8x512xf32>
    %c2 = arith.constant 2 : index
    %c0_24 = arith.constant 0 : index
    %46 = vector.load %arg2[%c2, %c0_24] : memref<27x512xf32, #tpu.memory_space<vmem>>, vector<1x512xf32>
    %47 = vector.shape_cast %46 : vector<1x512xf32> to vector<512xf32>
    %48 = vector.shape_cast %47 : vector<512xf32> to vector<1x512xf32>
    %49 = vector.broadcast %48 : vector<1x512xf32> to vector<8x512xf32>
    %50 = arith.mulf %45, %49 : vector<8x512xf32>
    %51 = tpu.concatenate %38, %44, %50 in 0 : vector<8x512xf32>, vector<8x512xf32>, vector<8x512xf32> -> vector<24x512xf32>
    %c0_25 = arith.constant 0 : index
    %c0_26 = arith.constant 0 : index
    %c0_27 = arith.constant 0 : index
    %52 = vector.load %arg5[%c0_25, %c0_26, %c0_27] : memref<9x8x24xf32, #tpu.memory_space<vmem>>, vector<1x8x24xf32>
    %53 = vector.shape_cast %52 : vector<1x8x24xf32> to vector<8x24xf32>
    %cst_28 = arith.constant dense<0.000000e+00> : vector<8x512xf32>
    %54 = tpu.matmul %53, %51, %cst_28 {dimension_numbers = #tpu.dot_dimension_numbers<[1], [0], [0], [1], [0, 0, 1, 1], [], []>} : vector<8x24xf32>, vector<24x512xf32>, vector<8x512xf32> -> vector<8x512xf32>
    %55 = arith.addf %32, %54 : vector<8x512xf32>
    %c65_i32 = arith.constant 65 : i32
    %56 = tpu.dynamic_rotate %31 by %c65_i32 dim 1 : vector<8x512xf32>, i32 -> vector<8x512xf32>
    %c3 = arith.constant 3 : index
    %c0_29 = arith.constant 0 : index
    %57 = vector.load %arg2[%c3, %c0_29] : memref<27x512xf32, #tpu.memory_space<vmem>>, vector<1x512xf32>
    %58 = vector.shape_cast %57 : vector<1x512xf32> to vector<512xf32>
    %59 = vector.shape_cast %58 : vector<512xf32> to vector<1x512xf32>
    %60 = vector.broadcast %59 : vector<1x512xf32> to vector<8x512xf32>
    %61 = arith.mulf %56, %60 : vector<8x512xf32>
    %c64_i32 = arith.constant 64 : i32
    %62 = tpu.dynamic_rotate %31 by %c64_i32 dim 1 : vector<8x512xf32>, i32 -> vector<8x512xf32>
    %c4_30 = arith.constant 4 : index
    %c0_31 = arith.constant 0 : index
    %63 = vector.load %arg2[%c4_30, %c0_31] : memref<27x512xf32, #tpu.memory_space<vmem>>, vector<1x512xf32>
    %64 = vector.shape_cast %63 : vector<1x512xf32> to vector<512xf32>
    %65 = vector.shape_cast %64 : vector<512xf32> to vector<1x512xf32>
    %66 = vector.broadcast %65 : vector<1x512xf32> to vector<8x512xf32>
    %67 = arith.mulf %62, %66 : vector<8x512xf32>
    %c63_i32 = arith.constant 63 : i32
    %68 = tpu.dynamic_rotate %31 by %c63_i32 dim 1 : vector<8x512xf32>, i32 -> vector<8x512xf32>
    %c5 = arith.constant 5 : index
    %c0_32 = arith.constant 0 : index
    %69 = vector.load %arg2[%c5, %c0_32] : memref<27x512xf32, #tpu.memory_space<vmem>>, vector<1x512xf32>
    %70 = vector.shape_cast %69 : vector<1x512xf32> to vector<512xf32>
    %71 = vector.shape_cast %70 : vector<512xf32> to vector<1x512xf32>
    %72 = vector.broadcast %71 : vector<1x512xf32> to vector<8x512xf32>
    %73 = arith.mulf %68, %72 : vector<8x512xf32>
    %74 = tpu.concatenate %61, %67, %73 in 0 : vector<8x512xf32>, vector<8x512xf32>, vector<8x512xf32> -> vector<24x512xf32>
    %c1_33 = arith.constant 1 : index
    %c0_34 = arith.constant 0 : index
    %c0_35 = arith.constant 0 : index
    %75 = vector.load %arg5[%c1_33, %c0_34, %c0_35] : memref<9x8x24xf32, #tpu.memory_space<vmem>>, vector<1x8x24xf32>
    %76 = vector.shape_cast %75 : vector<1x8x24xf32> to vector<8x24xf32>
    %cst_36 = arith.constant dense<0.000000e+00> : vector<8x512xf32>
    %77 = tpu.matmul %76, %74, %cst_36 {dimension_numbers = #tpu.dot_dimension_numbers<[1], [0], [0], [1], [0, 0, 1, 1], [], []>} : vector<8x24xf32>, vector<24x512xf32>, vector<8x512xf32> -> vector<8x512xf32>
    %78 = arith.addf %55, %77 : vector<8x512xf32>
    %c57_i32 = arith.constant 57 : i32
    %79 = tpu.dynamic_rotate %31 by %c57_i32 dim 1 : vector<8x512xf32>, i32 -> vector<8x512xf32>
    %c6 = arith.constant 6 : index
    %c0_37 = arith.constant 0 : index
    %80 = vector.load %arg2[%c6, %c0_37] : memref<27x512xf32, #tpu.memory_space<vmem>>, vector<1x512xf32>
    %81 = vector.shape_cast %80 : vector<1x512xf32> to vector<512xf32>
    %82 = vector.shape_cast %81 : vector<512xf32> to vector<1x512xf32>
    %83 = vector.broadcast %82 : vector<1x512xf32> to vector<8x512xf32>
    %84 = arith.mulf %79, %83 : vector<8x512xf32>
    %c56_i32 = arith.constant 56 : i32
    %85 = tpu.dynamic_rotate %31 by %c56_i32 dim 1 : vector<8x512xf32>, i32 -> vector<8x512xf32>
    %c7 = arith.constant 7 : index
    %c0_38 = arith.constant 0 : index
    %86 = vector.load %arg2[%c7, %c0_38] : memref<27x512xf32, #tpu.memory_space<vmem>>, vector<1x512xf32>
    %87 = vector.shape_cast %86 : vector<1x512xf32> to vector<512xf32>
    %88 = vector.shape_cast %87 : vector<512xf32> to vector<1x512xf32>
    %89 = vector.broadcast %88 : vector<1x512xf32> to vector<8x512xf32>
    %90 = arith.mulf %85, %89 : vector<8x512xf32>
    %c55_i32 = arith.constant 55 : i32
    %91 = tpu.dynamic_rotate %31 by %c55_i32 dim 1 : vector<8x512xf32>, i32 -> vector<8x512xf32>
    %c8 = arith.constant 8 : index
    %c0_39 = arith.constant 0 : index
    %92 = vector.load %arg2[%c8, %c0_39] : memref<27x512xf32, #tpu.memory_space<vmem>>, vector<1x512xf32>
    %93 = vector.shape_cast %92 : vector<1x512xf32> to vector<512xf32>
    %94 = vector.shape_cast %93 : vector<512xf32> to vector<1x512xf32>
    %95 = vector.broadcast %94 : vector<1x512xf32> to vector<8x512xf32>
    %96 = arith.mulf %91, %95 : vector<8x512xf32>
    %97 = tpu.concatenate %84, %90, %96 in 0 : vector<8x512xf32>, vector<8x512xf32>, vector<8x512xf32> -> vector<24x512xf32>
    %c2_40 = arith.constant 2 : index
    %c0_41 = arith.constant 0 : index
    %c0_42 = arith.constant 0 : index
    %98 = vector.load %arg5[%c2_40, %c0_41, %c0_42] : memref<9x8x24xf32, #tpu.memory_space<vmem>>, vector<1x8x24xf32>
    %99 = vector.shape_cast %98 : vector<1x8x24xf32> to vector<8x24xf32>
    %cst_43 = arith.constant dense<0.000000e+00> : vector<8x512xf32>
    %100 = tpu.matmul %99, %97, %cst_43 {dimension_numbers = #tpu.dot_dimension_numbers<[1], [0], [0], [1], [0, 0, 1, 1], [], []>} : vector<8x24xf32>, vector<24x512xf32>, vector<8x512xf32> -> vector<8x512xf32>
    %101 = arith.addf %78, %100 : vector<8x512xf32>
    %c9_i32 = arith.constant 9 : i32
    %102 = tpu.dynamic_rotate %31 by %c9_i32 dim 1 : vector<8x512xf32>, i32 -> vector<8x512xf32>
    %c9 = arith.constant 9 : index
    %c0_44 = arith.constant 0 : index
    %103 = vector.load %arg2[%c9, %c0_44] : memref<27x512xf32, #tpu.memory_space<vmem>>, vector<1x512xf32>
    %104 = vector.shape_cast %103 : vector<1x512xf32> to vector<512xf32>
    %105 = vector.shape_cast %104 : vector<512xf32> to vector<1x512xf32>
    %106 = vector.broadcast %105 : vector<1x512xf32> to vector<8x512xf32>
    %107 = arith.mulf %102, %106 : vector<8x512xf32>
    %c8_i32 = arith.constant 8 : i32
    %108 = tpu.dynamic_rotate %31 by %c8_i32 dim 1 : vector<8x512xf32>, i32 -> vector<8x512xf32>
    %c10 = arith.constant 10 : index
    %c0_45 = arith.constant 0 : index
    %109 = vector.load %arg2[%c10, %c0_45] : memref<27x512xf32, #tpu.memory_space<vmem>>, vector<1x512xf32>
    %110 = vector.shape_cast %109 : vector<1x512xf32> to vector<512xf32>
    %111 = vector.shape_cast %110 : vector<512xf32> to vector<1x512xf32>
    %112 = vector.broadcast %111 : vector<1x512xf32> to vector<8x512xf32>
    %113 = arith.mulf %108, %112 : vector<8x512xf32>
    %c7_i32 = arith.constant 7 : i32
    %114 = tpu.dynamic_rotate %31 by %c7_i32 dim 1 : vector<8x512xf32>, i32 -> vector<8x512xf32>
    %c11 = arith.constant 11 : index
    %c0_46 = arith.constant 0 : index
    %115 = vector.load %arg2[%c11, %c0_46] : memref<27x512xf32, #tpu.memory_space<vmem>>, vector<1x512xf32>
    %116 = vector.shape_cast %115 : vector<1x512xf32> to vector<512xf32>
    %117 = vector.shape_cast %116 : vector<512xf32> to vector<1x512xf32>
    %118 = vector.broadcast %117 : vector<1x512xf32> to vector<8x512xf32>
    %119 = arith.mulf %114, %118 : vector<8x512xf32>
    %120 = tpu.concatenate %107, %113, %119 in 0 : vector<8x512xf32>, vector<8x512xf32>, vector<8x512xf32> -> vector<24x512xf32>
    %c3_47 = arith.constant 3 : index
    %c0_48 = arith.constant 0 : index
    %c0_49 = arith.constant 0 : index
    %121 = vector.load %arg5[%c3_47, %c0_48, %c0_49] : memref<9x8x24xf32, #tpu.memory_space<vmem>>, vector<1x8x24xf32>
    %122 = vector.shape_cast %121 : vector<1x8x24xf32> to vector<8x24xf32>
    %cst_50 = arith.constant dense<0.000000e+00> : vector<8x512xf32>
    %123 = tpu.matmul %122, %120, %cst_50 {dimension_numbers = #tpu.dot_dimension_numbers<[1], [0], [0], [1], [0, 0, 1, 1], [], []>} : vector<8x24xf32>, vector<24x512xf32>, vector<8x512xf32> -> vector<8x512xf32>
    %124 = arith.addf %101, %123 : vector<8x512xf32>
    %c1_i32 = arith.constant 1 : i32
    %125 = tpu.dynamic_rotate %31 by %c1_i32 dim 1 : vector<8x512xf32>, i32 -> vector<8x512xf32>
    %c12 = arith.constant 12 : index
    %c0_51 = arith.constant 0 : index
    %126 = vector.load %arg2[%c12, %c0_51] : memref<27x512xf32, #tpu.memory_space<vmem>>, vector<1x512xf32>
    %127 = vector.shape_cast %126 : vector<1x512xf32> to vector<512xf32>
    %128 = vector.shape_cast %127 : vector<512xf32> to vector<1x512xf32>
    %129 = vector.broadcast %128 : vector<1x512xf32> to vector<8x512xf32>
    %130 = arith.mulf %125, %129 : vector<8x512xf32>
    %c511_i32 = arith.constant 511 : i32
    %131 = tpu.dynamic_rotate %31 by %c511_i32 dim 1 : vector<8x512xf32>, i32 -> vector<8x512xf32>
    %c14 = arith.constant 14 : index
    %c0_52 = arith.constant 0 : index
    %132 = vector.load %arg2[%c14, %c0_52] : memref<27x512xf32, #tpu.memory_space<vmem>>, vector<1x512xf32>
    %133 = vector.shape_cast %132 : vector<1x512xf32> to vector<512xf32>
    %134 = vector.shape_cast %133 : vector<512xf32> to vector<1x512xf32>
    %135 = vector.broadcast %134 : vector<1x512xf32> to vector<8x512xf32>
    %136 = arith.mulf %131, %135 : vector<8x512xf32>
    %137 = tpu.concatenate %130, %31, %136 in 0 : vector<8x512xf32>, vector<8x512xf32>, vector<8x512xf32> -> vector<24x512xf32>
    %c4_53 = arith.constant 4 : index
    %c0_54 = arith.constant 0 : index
    %c0_55 = arith.constant 0 : index
    %138 = vector.load %arg5[%c4_53, %c0_54, %c0_55] : memref<9x8x24xf32, #tpu.memory_space<vmem>>, vector<1x8x24xf32>
    %139 = vector.shape_cast %138 : vector<1x8x24xf32> to vector<8x24xf32>
    %cst_56 = arith.constant dense<0.000000e+00> : vector<8x512xf32>
    %140 = tpu.matmul %139, %137, %cst_56 {dimension_numbers = #tpu.dot_dimension_numbers<[1], [0], [0], [1], [0, 0, 1, 1], [], []>} : vector<8x24xf32>, vector<24x512xf32>, vector<8x512xf32> -> vector<8x512xf32>
    %141 = arith.addf %124, %140 : vector<8x512xf32>
    %c505_i32 = arith.constant 505 : i32
    %142 = tpu.dynamic_rotate %31 by %c505_i32 dim 1 : vector<8x512xf32>, i32 -> vector<8x512xf32>
    %c15 = arith.constant 15 : index
    %c0_57 = arith.constant 0 : index
    %143 = vector.load %arg2[%c15, %c0_57] : memref<27x512xf32, #tpu.memory_space<vmem>>, vector<1x512xf32>
    %144 = vector.shape_cast %143 : vector<1x512xf32> to vector<512xf32>
    %145 = vector.shape_cast %144 : vector<512xf32> to vector<1x512xf32>
    %146 = vector.broadcast %145 : vector<1x512xf32> to vector<8x512xf32>
    %147 = arith.mulf %142, %146 : vector<8x512xf32>
    %c504_i32 = arith.constant 504 : i32
    %148 = tpu.dynamic_rotate %31 by %c504_i32 dim 1 : vector<8x512xf32>, i32 -> vector<8x512xf32>
    %c16 = arith.constant 16 : index
    %c0_58 = arith.constant 0 : index
    %149 = vector.load %arg2[%c16, %c0_58] : memref<27x512xf32, #tpu.memory_space<vmem>>, vector<1x512xf32>
    %150 = vector.shape_cast %149 : vector<1x512xf32> to vector<512xf32>
    %151 = vector.shape_cast %150 : vector<512xf32> to vector<1x512xf32>
    %152 = vector.broadcast %151 : vector<1x512xf32> to vector<8x512xf32>
    %153 = arith.mulf %148, %152 : vector<8x512xf32>
    %c503_i32 = arith.constant 503 : i32
    %154 = tpu.dynamic_rotate %31 by %c503_i32 dim 1 : vector<8x512xf32>, i32 -> vector<8x512xf32>
    %c17 = arith.constant 17 : index
    %c0_59 = arith.constant 0 : index
    %155 = vector.load %arg2[%c17, %c0_59] : memref<27x512xf32, #tpu.memory_space<vmem>>, vector<1x512xf32>
    %156 = vector.shape_cast %155 : vector<1x512xf32> to vector<512xf32>
    %157 = vector.shape_cast %156 : vector<512xf32> to vector<1x512xf32>
    %158 = vector.broadcast %157 : vector<1x512xf32> to vector<8x512xf32>
    %159 = arith.mulf %154, %158 : vector<8x512xf32>
    %160 = tpu.concatenate %147, %153, %159 in 0 : vector<8x512xf32>, vector<8x512xf32>, vector<8x512xf32> -> vector<24x512xf32>
    %c5_60 = arith.constant 5 : index
    %c0_61 = arith.constant 0 : index
    %c0_62 = arith.constant 0 : index
    %161 = vector.load %arg5[%c5_60, %c0_61, %c0_62] : memref<9x8x24xf32, #tpu.memory_space<vmem>>, vector<1x8x24xf32>
    %162 = vector.shape_cast %161 : vector<1x8x24xf32> to vector<8x24xf32>
    %cst_63 = arith.constant dense<0.000000e+00> : vector<8x512xf32>
    %163 = tpu.matmul %162, %160, %cst_63 {dimension_numbers = #tpu.dot_dimension_numbers<[1], [0], [0], [1], [0, 0, 1, 1], [], []>} : vector<8x24xf32>, vector<24x512xf32>, vector<8x512xf32> -> vector<8x512xf32>
    %164 = arith.addf %141, %163 : vector<8x512xf32>
    %c457_i32 = arith.constant 457 : i32
    %165 = tpu.dynamic_rotate %31 by %c457_i32 dim 1 : vector<8x512xf32>, i32 -> vector<8x512xf32>
    %c18 = arith.constant 18 : index
    %c0_64 = arith.constant 0 : index
    %166 = vector.load %arg2[%c18, %c0_64] : memref<27x512xf32, #tpu.memory_space<vmem>>, vector<1x512xf32>
    %167 = vector.shape_cast %166 : vector<1x512xf32> to vector<512xf32>
    %168 = vector.shape_cast %167 : vector<512xf32> to vector<1x512xf32>
    %169 = vector.broadcast %168 : vector<1x512xf32> to vector<8x512xf32>
    %170 = arith.mulf %165, %169 : vector<8x512xf32>
    %c456_i32 = arith.constant 456 : i32
    %171 = tpu.dynamic_rotate %31 by %c456_i32 dim 1 : vector<8x512xf32>, i32 -> vector<8x512xf32>
    %c19 = arith.constant 19 : index
    %c0_65 = arith.constant 0 : index
    %172 = vector.load %arg2[%c19, %c0_65] : memref<27x512xf32, #tpu.memory_space<vmem>>, vector<1x512xf32>
    %173 = vector.shape_cast %172 : vector<1x512xf32> to vector<512xf32>
    %174 = vector.shape_cast %173 : vector<512xf32> to vector<1x512xf32>
    %175 = vector.broadcast %174 : vector<1x512xf32> to vector<8x512xf32>
    %176 = arith.mulf %171, %175 : vector<8x512xf32>
    %c455_i32 = arith.constant 455 : i32
    %177 = tpu.dynamic_rotate %31 by %c455_i32 dim 1 : vector<8x512xf32>, i32 -> vector<8x512xf32>
    %c20 = arith.constant 20 : index
    %c0_66 = arith.constant 0 : index
    %178 = vector.load %arg2[%c20, %c0_66] : memref<27x512xf32, #tpu.memory_space<vmem>>, vector<1x512xf32>
    %179 = vector.shape_cast %178 : vector<1x512xf32> to vector<512xf32>
    %180 = vector.shape_cast %179 : vector<512xf32> to vector<1x512xf32>
    %181 = vector.broadcast %180 : vector<1x512xf32> to vector<8x512xf32>
    %182 = arith.mulf %177, %181 : vector<8x512xf32>
    %183 = tpu.concatenate %170, %176, %182 in 0 : vector<8x512xf32>, vector<8x512xf32>, vector<8x512xf32> -> vector<24x512xf32>
    %c6_67 = arith.constant 6 : index
    %c0_68 = arith.constant 0 : index
    %c0_69 = arith.constant 0 : index
    %184 = vector.load %arg5[%c6_67, %c0_68, %c0_69] : memref<9x8x24xf32, #tpu.memory_space<vmem>>, vector<1x8x24xf32>
    %185 = vector.shape_cast %184 : vector<1x8x24xf32> to vector<8x24xf32>
    %cst_70 = arith.constant dense<0.000000e+00> : vector<8x512xf32>
    %186 = tpu.matmul %185, %183, %cst_70 {dimension_numbers = #tpu.dot_dimension_numbers<[1], [0], [0], [1], [0, 0, 1, 1], [], []>} : vector<8x24xf32>, vector<24x512xf32>, vector<8x512xf32> -> vector<8x512xf32>
    %187 = arith.addf %164, %186 : vector<8x512xf32>
    %c449_i32 = arith.constant 449 : i32
    %188 = tpu.dynamic_rotate %31 by %c449_i32 dim 1 : vector<8x512xf32>, i32 -> vector<8x512xf32>
    %c21 = arith.constant 21 : index
    %c0_71 = arith.constant 0 : index
    %189 = vector.load %arg2[%c21, %c0_71] : memref<27x512xf32, #tpu.memory_space<vmem>>, vector<1x512xf32>
    %190 = vector.shape_cast %189 : vector<1x512xf32> to vector<512xf32>
    %191 = vector.shape_cast %190 : vector<512xf32> to vector<1x512xf32>
    %192 = vector.broadcast %191 : vector<1x512xf32> to vector<8x512xf32>
    %193 = arith.mulf %188, %192 : vector<8x512xf32>
    %c448_i32 = arith.constant 448 : i32
    %194 = tpu.dynamic_rotate %31 by %c448_i32 dim 1 : vector<8x512xf32>, i32 -> vector<8x512xf32>
    %c22 = arith.constant 22 : index
    %c0_72 = arith.constant 0 : index
    %195 = vector.load %arg2[%c22, %c0_72] : memref<27x512xf32, #tpu.memory_space<vmem>>, vector<1x512xf32>
    %196 = vector.shape_cast %195 : vector<1x512xf32> to vector<512xf32>
    %197 = vector.shape_cast %196 : vector<512xf32> to vector<1x512xf32>
    %198 = vector.broadcast %197 : vector<1x512xf32> to vector<8x512xf32>
    %199 = arith.mulf %194, %198 : vector<8x512xf32>
    %c447_i32 = arith.constant 447 : i32
    %200 = tpu.dynamic_rotate %31 by %c447_i32 dim 1 : vector<8x512xf32>, i32 -> vector<8x512xf32>
    %c23 = arith.constant 23 : index
    %c0_73 = arith.constant 0 : index
    %201 = vector.load %arg2[%c23, %c0_73] : memref<27x512xf32, #tpu.memory_space<vmem>>, vector<1x512xf32>
    %202 = vector.shape_cast %201 : vector<1x512xf32> to vector<512xf32>
    %203 = vector.shape_cast %202 : vector<512xf32> to vector<1x512xf32>
    %204 = vector.broadcast %203 : vector<1x512xf32> to vector<8x512xf32>
    %205 = arith.mulf %200, %204 : vector<8x512xf32>
    %206 = tpu.concatenate %193, %199, %205 in 0 : vector<8x512xf32>, vector<8x512xf32>, vector<8x512xf32> -> vector<24x512xf32>
    %c7_74 = arith.constant 7 : index
    %c0_75 = arith.constant 0 : index
    %c0_76 = arith.constant 0 : index
    %207 = vector.load %arg5[%c7_74, %c0_75, %c0_76] : memref<9x8x24xf32, #tpu.memory_space<vmem>>, vector<1x8x24xf32>
    %208 = vector.shape_cast %207 : vector<1x8x24xf32> to vector<8x24xf32>
    %cst_77 = arith.constant dense<0.000000e+00> : vector<8x512xf32>
    %209 = tpu.matmul %208, %206, %cst_77 {dimension_numbers = #tpu.dot_dimension_numbers<[1], [0], [0], [1], [0, 0, 1, 1], [], []>} : vector<8x24xf32>, vector<24x512xf32>, vector<8x512xf32> -> vector<8x512xf32>
    %210 = arith.addf %187, %209 : vector<8x512xf32>
    %c441_i32 = arith.constant 441 : i32
    %211 = tpu.dynamic_rotate %31 by %c441_i32 dim 1 : vector<8x512xf32>, i32 -> vector<8x512xf32>
    %c24 = arith.constant 24 : index
    %c0_78 = arith.constant 0 : index
    %212 = vector.load %arg2[%c24, %c0_78] : memref<27x512xf32, #tpu.memory_space<vmem>>, vector<1x512xf32>
    %213 = vector.shape_cast %212 : vector<1x512xf32> to vector<512xf32>
    %214 = vector.shape_cast %213 : vector<512xf32> to vector<1x512xf32>
    %215 = vector.broadcast %214 : vector<1x512xf32> to vector<8x512xf32>
    %216 = arith.mulf %211, %215 : vector<8x512xf32>
    %c440_i32 = arith.constant 440 : i32
    %217 = tpu.dynamic_rotate %31 by %c440_i32 dim 1 : vector<8x512xf32>, i32 -> vector<8x512xf32>
    %c25 = arith.constant 25 : index
    %c0_79 = arith.constant 0 : index
    %218 = vector.load %arg2[%c25, %c0_79] : memref<27x512xf32, #tpu.memory_space<vmem>>, vector<1x512xf32>
    %219 = vector.shape_cast %218 : vector<1x512xf32> to vector<512xf32>
    %220 = vector.shape_cast %219 : vector<512xf32> to vector<1x512xf32>
    %221 = vector.broadcast %220 : vector<1x512xf32> to vector<8x512xf32>
    %222 = arith.mulf %217, %221 : vector<8x512xf32>
    %c439_i32 = arith.constant 439 : i32
    %223 = tpu.dynamic_rotate %31 by %c439_i32 dim 1 : vector<8x512xf32>, i32 -> vector<8x512xf32>
    %c26 = arith.constant 26 : index
    %c0_80 = arith.constant 0 : index
    %224 = vector.load %arg2[%c26, %c0_80] : memref<27x512xf32, #tpu.memory_space<vmem>>, vector<1x512xf32>
    %225 = vector.shape_cast %224 : vector<1x512xf32> to vector<512xf32>
    %226 = vector.shape_cast %225 : vector<512xf32> to vector<1x512xf32>
    %227 = vector.broadcast %226 : vector<1x512xf32> to vector<8x512xf32>
    %228 = arith.mulf %223, %227 : vector<8x512xf32>
    %229 = tpu.concatenate %216, %222, %228 in 0 : vector<8x512xf32>, vector<8x512xf32>, vector<8x512xf32> -> vector<24x512xf32>
    %c8_81 = arith.constant 8 : index
    %c0_82 = arith.constant 0 : index
    %c0_83 = arith.constant 0 : index
    %230 = vector.load %arg5[%c8_81, %c0_82, %c0_83] : memref<9x8x24xf32, #tpu.memory_space<vmem>>, vector<1x8x24xf32>
    %231 = vector.shape_cast %230 : vector<1x8x24xf32> to vector<8x24xf32>
    %cst_84 = arith.constant dense<0.000000e+00> : vector<8x512xf32>
    %232 = tpu.matmul %231, %229, %cst_84 {dimension_numbers = #tpu.dot_dimension_numbers<[1], [0], [0], [1], [0, 0, 1, 1], [], []>} : vector<8x24xf32>, vector<24x512xf32>, vector<8x512xf32> -> vector<8x512xf32>
    %233 = arith.addf %210, %232 : vector<8x512xf32>
    %c0_85 = arith.constant 0 : index
    %c0_86 = arith.constant 0 : index
    %234 = vector.load %arg6[%c0_85, %c0_86] : memref<8x1xf32, #tpu.memory_space<vmem>>, vector<8x1xf32>
    %235 = vector.broadcast %234 : vector<8x1xf32> to vector<8x512xf32>
    %236 = arith.addf %233, %235 : vector<8x512xf32>
    %cst_87 = arith.constant 0.000000e+00 : f32
    %237 = vector.broadcast %cst_87 : f32 to vector<8x512xf32>
    %238 = arith.maximumf %236, %237 : vector<8x512xf32>
    %cst_88 = arith.constant 0.000000e+00 : f32
    %239 = vector.broadcast %cst_88 : f32 to vector<8x512xf32>
    %c73_i32_89 = arith.constant 73 : i32
    %240 = tpu.dynamic_rotate %238 by %c73_i32_89 dim 1 : vector<8x512xf32>, i32 -> vector<8x512xf32>
    %c0_90 = arith.constant 0 : index
    %c0_91 = arith.constant 0 : index
    %241 = vector.load %arg2[%c0_90, %c0_91] : memref<27x512xf32, #tpu.memory_space<vmem>>, vector<1x512xf32>
    %242 = vector.shape_cast %241 : vector<1x512xf32> to vector<512xf32>
    %243 = vector.shape_cast %242 : vector<512xf32> to vector<1x512xf32>
    %244 = vector.broadcast %243 : vector<1x512xf32> to vector<8x512xf32>
    %245 = arith.mulf %240, %244 : vector<8x512xf32>
    %c72_i32_92 = arith.constant 72 : i32
    %246 = tpu.dynamic_rotate %238 by %c72_i32_92 dim 1 : vector<8x512xf32>, i32 -> vector<8x512xf32>
    %c1_93 = arith.constant 1 : index
    %c0_94 = arith.constant 0 : index
    %247 = vector.load %arg2[%c1_93, %c0_94] : memref<27x512xf32, #tpu.memory_space<vmem>>, vector<1x512xf32>
    %248 = vector.shape_cast %247 : vector<1x512xf32> to vector<512xf32>
    %249 = vector.shape_cast %248 : vector<512xf32> to vector<1x512xf32>
    %250 = vector.broadcast %249 : vector<1x512xf32> to vector<8x512xf32>
    %251 = arith.mulf %246, %250 : vector<8x512xf32>
    %c71_i32_95 = arith.constant 71 : i32
    %252 = tpu.dynamic_rotate %238 by %c71_i32_95 dim 1 : vector<8x512xf32>, i32 -> vector<8x512xf32>
    %c2_96 = arith.constant 2 : index
    %c0_97 = arith.constant 0 : index
    %253 = vector.load %arg2[%c2_96, %c0_97] : memref<27x512xf32, #tpu.memory_space<vmem>>, vector<1x512xf32>
    %254 = vector.shape_cast %253 : vector<1x512xf32> to vector<512xf32>
    %255 = vector.shape_cast %254 : vector<512xf32> to vector<1x512xf32>
    %256 = vector.broadcast %255 : vector<1x512xf32> to vector<8x512xf32>
    %257 = arith.mulf %252, %256 : vector<8x512xf32>
    %258 = tpu.concatenate %245, %251, %257 in 0 : vector<8x512xf32>, vector<8x512xf32>, vector<8x512xf32> -> vector<24x512xf32>
    %c0_98 = arith.constant 0 : index
    %c0_99 = arith.constant 0 : index
    %c0_100 = arith.constant 0 : index
    %259 = vector.load %arg7[%c0_98, %c0_99, %c0_100] : memref<9x8x24xf32, #tpu.memory_space<vmem>>, vector<1x8x24xf32>
    %260 = vector.shape_cast %259 : vector<1x8x24xf32> to vector<8x24xf32>
    %cst_101 = arith.constant dense<0.000000e+00> : vector<8x512xf32>
    %261 = tpu.matmul %260, %258, %cst_101 {dimension_numbers = #tpu.dot_dimension_numbers<[1], [0], [0], [1], [0, 0, 1, 1], [], []>} : vector<8x24xf32>, vector<24x512xf32>, vector<8x512xf32> -> vector<8x512xf32>
    %262 = arith.addf %239, %261 : vector<8x512xf32>
    %c65_i32_102 = arith.constant 65 : i32
    %263 = tpu.dynamic_rotate %238 by %c65_i32_102 dim 1 : vector<8x512xf32>, i32 -> vector<8x512xf32>
    %c3_103 = arith.constant 3 : index
    %c0_104 = arith.constant 0 : index
    %264 = vector.load %arg2[%c3_103, %c0_104] : memref<27x512xf32, #tpu.memory_space<vmem>>, vector<1x512xf32>
    %265 = vector.shape_cast %264 : vector<1x512xf32> to vector<512xf32>
    %266 = vector.shape_cast %265 : vector<512xf32> to vector<1x512xf32>
    %267 = vector.broadcast %266 : vector<1x512xf32> to vector<8x512xf32>
    %268 = arith.mulf %263, %267 : vector<8x512xf32>
    %c64_i32_105 = arith.constant 64 : i32
    %269 = tpu.dynamic_rotate %238 by %c64_i32_105 dim 1 : vector<8x512xf32>, i32 -> vector<8x512xf32>
    %c4_106 = arith.constant 4 : index
    %c0_107 = arith.constant 0 : index
    %270 = vector.load %arg2[%c4_106, %c0_107] : memref<27x512xf32, #tpu.memory_space<vmem>>, vector<1x512xf32>
    %271 = vector.shape_cast %270 : vector<1x512xf32> to vector<512xf32>
    %272 = vector.shape_cast %271 : vector<512xf32> to vector<1x512xf32>
    %273 = vector.broadcast %272 : vector<1x512xf32> to vector<8x512xf32>
    %274 = arith.mulf %269, %273 : vector<8x512xf32>
    %c63_i32_108 = arith.constant 63 : i32
    %275 = tpu.dynamic_rotate %238 by %c63_i32_108 dim 1 : vector<8x512xf32>, i32 -> vector<8x512xf32>
    %c5_109 = arith.constant 5 : index
    %c0_110 = arith.constant 0 : index
    %276 = vector.load %arg2[%c5_109, %c0_110] : memref<27x512xf32, #tpu.memory_space<vmem>>, vector<1x512xf32>
    %277 = vector.shape_cast %276 : vector<1x512xf32> to vector<512xf32>
    %278 = vector.shape_cast %277 : vector<512xf32> to vector<1x512xf32>
    %279 = vector.broadcast %278 : vector<1x512xf32> to vector<8x512xf32>
    %280 = arith.mulf %275, %279 : vector<8x512xf32>
    %281 = tpu.concatenate %268, %274, %280 in 0 : vector<8x512xf32>, vector<8x512xf32>, vector<8x512xf32> -> vector<24x512xf32>
    %c1_111 = arith.constant 1 : index
    %c0_112 = arith.constant 0 : index
    %c0_113 = arith.constant 0 : index
    %282 = vector.load %arg7[%c1_111, %c0_112, %c0_113] : memref<9x8x24xf32, #tpu.memory_space<vmem>>, vector<1x8x24xf32>
    %283 = vector.shape_cast %282 : vector<1x8x24xf32> to vector<8x24xf32>
    %cst_114 = arith.constant dense<0.000000e+00> : vector<8x512xf32>
    %284 = tpu.matmul %283, %281, %cst_114 {dimension_numbers = #tpu.dot_dimension_numbers<[1], [0], [0], [1], [0, 0, 1, 1], [], []>} : vector<8x24xf32>, vector<24x512xf32>, vector<8x512xf32> -> vector<8x512xf32>
    %285 = arith.addf %262, %284 : vector<8x512xf32>
    %c57_i32_115 = arith.constant 57 : i32
    %286 = tpu.dynamic_rotate %238 by %c57_i32_115 dim 1 : vector<8x512xf32>, i32 -> vector<8x512xf32>
    %c6_116 = arith.constant 6 : index
    %c0_117 = arith.constant 0 : index
    %287 = vector.load %arg2[%c6_116, %c0_117] : memref<27x512xf32, #tpu.memory_space<vmem>>, vector<1x512xf32>
    %288 = vector.shape_cast %287 : vector<1x512xf32> to vector<512xf32>
    %289 = vector.shape_cast %288 : vector<512xf32> to vector<1x512xf32>
    %290 = vector.broadcast %289 : vector<1x512xf32> to vector<8x512xf32>
    %291 = arith.mulf %286, %290 : vector<8x512xf32>
    %c56_i32_118 = arith.constant 56 : i32
    %292 = tpu.dynamic_rotate %238 by %c56_i32_118 dim 1 : vector<8x512xf32>, i32 -> vector<8x512xf32>
    %c7_119 = arith.constant 7 : index
    %c0_120 = arith.constant 0 : index
    %293 = vector.load %arg2[%c7_119, %c0_120] : memref<27x512xf32, #tpu.memory_space<vmem>>, vector<1x512xf32>
    %294 = vector.shape_cast %293 : vector<1x512xf32> to vector<512xf32>
    %295 = vector.shape_cast %294 : vector<512xf32> to vector<1x512xf32>
    %296 = vector.broadcast %295 : vector<1x512xf32> to vector<8x512xf32>
    %297 = arith.mulf %292, %296 : vector<8x512xf32>
    %c55_i32_121 = arith.constant 55 : i32
    %298 = tpu.dynamic_rotate %238 by %c55_i32_121 dim 1 : vector<8x512xf32>, i32 -> vector<8x512xf32>
    %c8_122 = arith.constant 8 : index
    %c0_123 = arith.constant 0 : index
    %299 = vector.load %arg2[%c8_122, %c0_123] : memref<27x512xf32, #tpu.memory_space<vmem>>, vector<1x512xf32>
    %300 = vector.shape_cast %299 : vector<1x512xf32> to vector<512xf32>
    %301 = vector.shape_cast %300 : vector<512xf32> to vector<1x512xf32>
    %302 = vector.broadcast %301 : vector<1x512xf32> to vector<8x512xf32>
    %303 = arith.mulf %298, %302 : vector<8x512xf32>
    %304 = tpu.concatenate %291, %297, %303 in 0 : vector<8x512xf32>, vector<8x512xf32>, vector<8x512xf32> -> vector<24x512xf32>
    %c2_124 = arith.constant 2 : index
    %c0_125 = arith.constant 0 : index
    %c0_126 = arith.constant 0 : index
    %305 = vector.load %arg7[%c2_124, %c0_125, %c0_126] : memref<9x8x24xf32, #tpu.memory_space<vmem>>, vector<1x8x24xf32>
    %306 = vector.shape_cast %305 : vector<1x8x24xf32> to vector<8x24xf32>
    %cst_127 = arith.constant dense<0.000000e+00> : vector<8x512xf32>
    %307 = tpu.matmul %306, %304, %cst_127 {dimension_numbers = #tpu.dot_dimension_numbers<[1], [0], [0], [1], [0, 0, 1, 1], [], []>} : vector<8x24xf32>, vector<24x512xf32>, vector<8x512xf32> -> vector<8x512xf32>
    %308 = arith.addf %285, %307 : vector<8x512xf32>
    %c9_i32_128 = arith.constant 9 : i32
    %309 = tpu.dynamic_rotate %238 by %c9_i32_128 dim 1 : vector<8x512xf32>, i32 -> vector<8x512xf32>
    %c9_129 = arith.constant 9 : index
    %c0_130 = arith.constant 0 : index
    %310 = vector.load %arg2[%c9_129, %c0_130] : memref<27x512xf32, #tpu.memory_space<vmem>>, vector<1x512xf32>
    %311 = vector.shape_cast %310 : vector<1x512xf32> to vector<512xf32>
    %312 = vector.shape_cast %311 : vector<512xf32> to vector<1x512xf32>
    %313 = vector.broadcast %312 : vector<1x512xf32> to vector<8x512xf32>
    %314 = arith.mulf %309, %313 : vector<8x512xf32>
    %c8_i32_131 = arith.constant 8 : i32
    %315 = tpu.dynamic_rotate %238 by %c8_i32_131 dim 1 : vector<8x512xf32>, i32 -> vector<8x512xf32>
    %c10_132 = arith.constant 10 : index
    %c0_133 = arith.constant 0 : index
    %316 = vector.load %arg2[%c10_132, %c0_133] : memref<27x512xf32, #tpu.memory_space<vmem>>, vector<1x512xf32>
    %317 = vector.shape_cast %316 : vector<1x512xf32> to vector<512xf32>
    %318 = vector.shape_cast %317 : vector<512xf32> to vector<1x512xf32>
    %319 = vector.broadcast %318 : vector<1x512xf32> to vector<8x512xf32>
    %320 = arith.mulf %315, %319 : vector<8x512xf32>
    %c7_i32_134 = arith.constant 7 : i32
    %321 = tpu.dynamic_rotate %238 by %c7_i32_134 dim 1 : vector<8x512xf32>, i32 -> vector<8x512xf32>
    %c11_135 = arith.constant 11 : index
    %c0_136 = arith.constant 0 : index
    %322 = vector.load %arg2[%c11_135, %c0_136] : memref<27x512xf32, #tpu.memory_space<vmem>>, vector<1x512xf32>
    %323 = vector.shape_cast %322 : vector<1x512xf32> to vector<512xf32>
    %324 = vector.shape_cast %323 : vector<512xf32> to vector<1x512xf32>
    %325 = vector.broadcast %324 : vector<1x512xf32> to vector<8x512xf32>
    %326 = arith.mulf %321, %325 : vector<8x512xf32>
    %327 = tpu.concatenate %314, %320, %326 in 0 : vector<8x512xf32>, vector<8x512xf32>, vector<8x512xf32> -> vector<24x512xf32>
    %c3_137 = arith.constant 3 : index
    %c0_138 = arith.constant 0 : index
    %c0_139 = arith.constant 0 : index
    %328 = vector.load %arg7[%c3_137, %c0_138, %c0_139] : memref<9x8x24xf32, #tpu.memory_space<vmem>>, vector<1x8x24xf32>
    %329 = vector.shape_cast %328 : vector<1x8x24xf32> to vector<8x24xf32>
    %cst_140 = arith.constant dense<0.000000e+00> : vector<8x512xf32>
    %330 = tpu.matmul %329, %327, %cst_140 {dimension_numbers = #tpu.dot_dimension_numbers<[1], [0], [0], [1], [0, 0, 1, 1], [], []>} : vector<8x24xf32>, vector<24x512xf32>, vector<8x512xf32> -> vector<8x512xf32>
    %331 = arith.addf %308, %330 : vector<8x512xf32>
    %c1_i32_141 = arith.constant 1 : i32
    %332 = tpu.dynamic_rotate %238 by %c1_i32_141 dim 1 : vector<8x512xf32>, i32 -> vector<8x512xf32>
    %c12_142 = arith.constant 12 : index
    %c0_143 = arith.constant 0 : index
    %333 = vector.load %arg2[%c12_142, %c0_143] : memref<27x512xf32, #tpu.memory_space<vmem>>, vector<1x512xf32>
    %334 = vector.shape_cast %333 : vector<1x512xf32> to vector<512xf32>
    %335 = vector.shape_cast %334 : vector<512xf32> to vector<1x512xf32>
    %336 = vector.broadcast %335 : vector<1x512xf32> to vector<8x512xf32>
    %337 = arith.mulf %332, %336 : vector<8x512xf32>
    %c511_i32_144 = arith.constant 511 : i32
    %338 = tpu.dynamic_rotate %238 by %c511_i32_144 dim 1 : vector<8x512xf32>, i32 -> vector<8x512xf32>
    %c14_145 = arith.constant 14 : index
    %c0_146 = arith.constant 0 : index
    %339 = vector.load %arg2[%c14_145, %c0_146] : memref<27x512xf32, #tpu.memory_space<vmem>>, vector<1x512xf32>
    %340 = vector.shape_cast %339 : vector<1x512xf32> to vector<512xf32>
    %341 = vector.shape_cast %340 : vector<512xf32> to vector<1x512xf32>
    %342 = vector.broadcast %341 : vector<1x512xf32> to vector<8x512xf32>
    %343 = arith.mulf %338, %342 : vector<8x512xf32>
    %344 = tpu.concatenate %337, %238, %343 in 0 : vector<8x512xf32>, vector<8x512xf32>, vector<8x512xf32> -> vector<24x512xf32>
    %c4_147 = arith.constant 4 : index
    %c0_148 = arith.constant 0 : index
    %c0_149 = arith.constant 0 : index
    %345 = vector.load %arg7[%c4_147, %c0_148, %c0_149] : memref<9x8x24xf32, #tpu.memory_space<vmem>>, vector<1x8x24xf32>
    %346 = vector.shape_cast %345 : vector<1x8x24xf32> to vector<8x24xf32>
    %cst_150 = arith.constant dense<0.000000e+00> : vector<8x512xf32>
    %347 = tpu.matmul %346, %344, %cst_150 {dimension_numbers = #tpu.dot_dimension_numbers<[1], [0], [0], [1], [0, 0, 1, 1], [], []>} : vector<8x24xf32>, vector<24x512xf32>, vector<8x512xf32> -> vector<8x512xf32>
    %348 = arith.addf %331, %347 : vector<8x512xf32>
    %c505_i32_151 = arith.constant 505 : i32
    %349 = tpu.dynamic_rotate %238 by %c505_i32_151 dim 1 : vector<8x512xf32>, i32 -> vector<8x512xf32>
    %c15_152 = arith.constant 15 : index
    %c0_153 = arith.constant 0 : index
    %350 = vector.load %arg2[%c15_152, %c0_153] : memref<27x512xf32, #tpu.memory_space<vmem>>, vector<1x512xf32>
    %351 = vector.shape_cast %350 : vector<1x512xf32> to vector<512xf32>
    %352 = vector.shape_cast %351 : vector<512xf32> to vector<1x512xf32>
    %353 = vector.broadcast %352 : vector<1x512xf32> to vector<8x512xf32>
    %354 = arith.mulf %349, %353 : vector<8x512xf32>
    %c504_i32_154 = arith.constant 504 : i32
    %355 = tpu.dynamic_rotate %238 by %c504_i32_154 dim 1 : vector<8x512xf32>, i32 -> vector<8x512xf32>
    %c16_155 = arith.constant 16 : index
    %c0_156 = arith.constant 0 : index
    %356 = vector.load %arg2[%c16_155, %c0_156] : memref<27x512xf32, #tpu.memory_space<vmem>>, vector<1x512xf32>
    %357 = vector.shape_cast %356 : vector<1x512xf32> to vector<512xf32>
    %358 = vector.shape_cast %357 : vector<512xf32> to vector<1x512xf32>
    %359 = vector.broadcast %358 : vector<1x512xf32> to vector<8x512xf32>
    %360 = arith.mulf %355, %359 : vector<8x512xf32>
    %c503_i32_157 = arith.constant 503 : i32
    %361 = tpu.dynamic_rotate %238 by %c503_i32_157 dim 1 : vector<8x512xf32>, i32 -> vector<8x512xf32>
    %c17_158 = arith.constant 17 : index
    %c0_159 = arith.constant 0 : index
    %362 = vector.load %arg2[%c17_158, %c0_159] : memref<27x512xf32, #tpu.memory_space<vmem>>, vector<1x512xf32>
    %363 = vector.shape_cast %362 : vector<1x512xf32> to vector<512xf32>
    %364 = vector.shape_cast %363 : vector<512xf32> to vector<1x512xf32>
    %365 = vector.broadcast %364 : vector<1x512xf32> to vector<8x512xf32>
    %366 = arith.mulf %361, %365 : vector<8x512xf32>
    %367 = tpu.concatenate %354, %360, %366 in 0 : vector<8x512xf32>, vector<8x512xf32>, vector<8x512xf32> -> vector<24x512xf32>
    %c5_160 = arith.constant 5 : index
    %c0_161 = arith.constant 0 : index
    %c0_162 = arith.constant 0 : index
    %368 = vector.load %arg7[%c5_160, %c0_161, %c0_162] : memref<9x8x24xf32, #tpu.memory_space<vmem>>, vector<1x8x24xf32>
    %369 = vector.shape_cast %368 : vector<1x8x24xf32> to vector<8x24xf32>
    %cst_163 = arith.constant dense<0.000000e+00> : vector<8x512xf32>
    %370 = tpu.matmul %369, %367, %cst_163 {dimension_numbers = #tpu.dot_dimension_numbers<[1], [0], [0], [1], [0, 0, 1, 1], [], []>} : vector<8x24xf32>, vector<24x512xf32>, vector<8x512xf32> -> vector<8x512xf32>
    %371 = arith.addf %348, %370 : vector<8x512xf32>
    %c457_i32_164 = arith.constant 457 : i32
    %372 = tpu.dynamic_rotate %238 by %c457_i32_164 dim 1 : vector<8x512xf32>, i32 -> vector<8x512xf32>
    %c18_165 = arith.constant 18 : index
    %c0_166 = arith.constant 0 : index
    %373 = vector.load %arg2[%c18_165, %c0_166] : memref<27x512xf32, #tpu.memory_space<vmem>>, vector<1x512xf32>
    %374 = vector.shape_cast %373 : vector<1x512xf32> to vector<512xf32>
    %375 = vector.shape_cast %374 : vector<512xf32> to vector<1x512xf32>
    %376 = vector.broadcast %375 : vector<1x512xf32> to vector<8x512xf32>
    %377 = arith.mulf %372, %376 : vector<8x512xf32>
    %c456_i32_167 = arith.constant 456 : i32
    %378 = tpu.dynamic_rotate %238 by %c456_i32_167 dim 1 : vector<8x512xf32>, i32 -> vector<8x512xf32>
    %c19_168 = arith.constant 19 : index
    %c0_169 = arith.constant 0 : index
    %379 = vector.load %arg2[%c19_168, %c0_169] : memref<27x512xf32, #tpu.memory_space<vmem>>, vector<1x512xf32>
    %380 = vector.shape_cast %379 : vector<1x512xf32> to vector<512xf32>
    %381 = vector.shape_cast %380 : vector<512xf32> to vector<1x512xf32>
    %382 = vector.broadcast %381 : vector<1x512xf32> to vector<8x512xf32>
    %383 = arith.mulf %378, %382 : vector<8x512xf32>
    %c455_i32_170 = arith.constant 455 : i32
    %384 = tpu.dynamic_rotate %238 by %c455_i32_170 dim 1 : vector<8x512xf32>, i32 -> vector<8x512xf32>
    %c20_171 = arith.constant 20 : index
    %c0_172 = arith.constant 0 : index
    %385 = vector.load %arg2[%c20_171, %c0_172] : memref<27x512xf32, #tpu.memory_space<vmem>>, vector<1x512xf32>
    %386 = vector.shape_cast %385 : vector<1x512xf32> to vector<512xf32>
    %387 = vector.shape_cast %386 : vector<512xf32> to vector<1x512xf32>
    %388 = vector.broadcast %387 : vector<1x512xf32> to vector<8x512xf32>
    %389 = arith.mulf %384, %388 : vector<8x512xf32>
    %390 = tpu.concatenate %377, %383, %389 in 0 : vector<8x512xf32>, vector<8x512xf32>, vector<8x512xf32> -> vector<24x512xf32>
    %c6_173 = arith.constant 6 : index
    %c0_174 = arith.constant 0 : index
    %c0_175 = arith.constant 0 : index
    %391 = vector.load %arg7[%c6_173, %c0_174, %c0_175] : memref<9x8x24xf32, #tpu.memory_space<vmem>>, vector<1x8x24xf32>
    %392 = vector.shape_cast %391 : vector<1x8x24xf32> to vector<8x24xf32>
    %cst_176 = arith.constant dense<0.000000e+00> : vector<8x512xf32>
    %393 = tpu.matmul %392, %390, %cst_176 {dimension_numbers = #tpu.dot_dimension_numbers<[1], [0], [0], [1], [0, 0, 1, 1], [], []>} : vector<8x24xf32>, vector<24x512xf32>, vector<8x512xf32> -> vector<8x512xf32>
    %394 = arith.addf %371, %393 : vector<8x512xf32>
    %c449_i32_177 = arith.constant 449 : i32
    %395 = tpu.dynamic_rotate %238 by %c449_i32_177 dim 1 : vector<8x512xf32>, i32 -> vector<8x512xf32>
    %c21_178 = arith.constant 21 : index
    %c0_179 = arith.constant 0 : index
    %396 = vector.load %arg2[%c21_178, %c0_179] : memref<27x512xf32, #tpu.memory_space<vmem>>, vector<1x512xf32>
    %397 = vector.shape_cast %396 : vector<1x512xf32> to vector<512xf32>
    %398 = vector.shape_cast %397 : vector<512xf32> to vector<1x512xf32>
    %399 = vector.broadcast %398 : vector<1x512xf32> to vector<8x512xf32>
    %400 = arith.mulf %395, %399 : vector<8x512xf32>
    %c448_i32_180 = arith.constant 448 : i32
    %401 = tpu.dynamic_rotate %238 by %c448_i32_180 dim 1 : vector<8x512xf32>, i32 -> vector<8x512xf32>
    %c22_181 = arith.constant 22 : index
    %c0_182 = arith.constant 0 : index
    %402 = vector.load %arg2[%c22_181, %c0_182] : memref<27x512xf32, #tpu.memory_space<vmem>>, vector<1x512xf32>
    %403 = vector.shape_cast %402 : vector<1x512xf32> to vector<512xf32>
    %404 = vector.shape_cast %403 : vector<512xf32> to vector<1x512xf32>
    %405 = vector.broadcast %404 : vector<1x512xf32> to vector<8x512xf32>
    %406 = arith.mulf %401, %405 : vector<8x512xf32>
    %c447_i32_183 = arith.constant 447 : i32
    %407 = tpu.dynamic_rotate %238 by %c447_i32_183 dim 1 : vector<8x512xf32>, i32 -> vector<8x512xf32>
    %c23_184 = arith.constant 23 : index
    %c0_185 = arith.constant 0 : index
    %408 = vector.load %arg2[%c23_184, %c0_185] : memref<27x512xf32, #tpu.memory_space<vmem>>, vector<1x512xf32>
    %409 = vector.shape_cast %408 : vector<1x512xf32> to vector<512xf32>
    %410 = vector.shape_cast %409 : vector<512xf32> to vector<1x512xf32>
    %411 = vector.broadcast %410 : vector<1x512xf32> to vector<8x512xf32>
    %412 = arith.mulf %407, %411 : vector<8x512xf32>
    %413 = tpu.concatenate %400, %406, %412 in 0 : vector<8x512xf32>, vector<8x512xf32>, vector<8x512xf32> -> vector<24x512xf32>
    %c7_186 = arith.constant 7 : index
    %c0_187 = arith.constant 0 : index
    %c0_188 = arith.constant 0 : index
    %414 = vector.load %arg7[%c7_186, %c0_187, %c0_188] : memref<9x8x24xf32, #tpu.memory_space<vmem>>, vector<1x8x24xf32>
    %415 = vector.shape_cast %414 : vector<1x8x24xf32> to vector<8x24xf32>
    %cst_189 = arith.constant dense<0.000000e+00> : vector<8x512xf32>
    %416 = tpu.matmul %415, %413, %cst_189 {dimension_numbers = #tpu.dot_dimension_numbers<[1], [0], [0], [1], [0, 0, 1, 1], [], []>} : vector<8x24xf32>, vector<24x512xf32>, vector<8x512xf32> -> vector<8x512xf32>
    %417 = arith.addf %394, %416 : vector<8x512xf32>
    %c441_i32_190 = arith.constant 441 : i32
    %418 = tpu.dynamic_rotate %238 by %c441_i32_190 dim 1 : vector<8x512xf32>, i32 -> vector<8x512xf32>
    %c24_191 = arith.constant 24 : index
    %c0_192 = arith.constant 0 : index
    %419 = vector.load %arg2[%c24_191, %c0_192] : memref<27x512xf32, #tpu.memory_space<vmem>>, vector<1x512xf32>
    %420 = vector.shape_cast %419 : vector<1x512xf32> to vector<512xf32>
    %421 = vector.shape_cast %420 : vector<512xf32> to vector<1x512xf32>
    %422 = vector.broadcast %421 : vector<1x512xf32> to vector<8x512xf32>
    %423 = arith.mulf %418, %422 : vector<8x512xf32>
    %c440_i32_193 = arith.constant 440 : i32
    %424 = tpu.dynamic_rotate %238 by %c440_i32_193 dim 1 : vector<8x512xf32>, i32 -> vector<8x512xf32>
    %c25_194 = arith.constant 25 : index
    %c0_195 = arith.constant 0 : index
    %425 = vector.load %arg2[%c25_194, %c0_195] : memref<27x512xf32, #tpu.memory_space<vmem>>, vector<1x512xf32>
    %426 = vector.shape_cast %425 : vector<1x512xf32> to vector<512xf32>
    %427 = vector.shape_cast %426 : vector<512xf32> to vector<1x512xf32>
    %428 = vector.broadcast %427 : vector<1x512xf32> to vector<8x512xf32>
    %429 = arith.mulf %424, %428 : vector<8x512xf32>
    %c439_i32_196 = arith.constant 439 : i32
    %430 = tpu.dynamic_rotate %238 by %c439_i32_196 dim 1 : vector<8x512xf32>, i32 -> vector<8x512xf32>
    %c26_197 = arith.constant 26 : index
    %c0_198 = arith.constant 0 : index
    %431 = vector.load %arg2[%c26_197, %c0_198] : memref<27x512xf32, #tpu.memory_space<vmem>>, vector<1x512xf32>
    %432 = vector.shape_cast %431 : vector<1x512xf32> to vector<512xf32>
    %433 = vector.shape_cast %432 : vector<512xf32> to vector<1x512xf32>
    %434 = vector.broadcast %433 : vector<1x512xf32> to vector<8x512xf32>
    %435 = arith.mulf %430, %434 : vector<8x512xf32>
    %436 = tpu.concatenate %423, %429, %435 in 0 : vector<8x512xf32>, vector<8x512xf32>, vector<8x512xf32> -> vector<24x512xf32>
    %c8_199 = arith.constant 8 : index
    %c0_200 = arith.constant 0 : index
    %c0_201 = arith.constant 0 : index
    %437 = vector.load %arg7[%c8_199, %c0_200, %c0_201] : memref<9x8x24xf32, #tpu.memory_space<vmem>>, vector<1x8x24xf32>
    %438 = vector.shape_cast %437 : vector<1x8x24xf32> to vector<8x24xf32>
    %cst_202 = arith.constant dense<0.000000e+00> : vector<8x512xf32>
    %439 = tpu.matmul %438, %436, %cst_202 {dimension_numbers = #tpu.dot_dimension_numbers<[1], [0], [0], [1], [0, 0, 1, 1], [], []>} : vector<8x24xf32>, vector<24x512xf32>, vector<8x512xf32> -> vector<8x512xf32>
    %440 = arith.addf %417, %439 : vector<8x512xf32>
    %c0_203 = arith.constant 0 : index
    %c0_204 = arith.constant 0 : index
    %441 = vector.load %arg8[%c0_203, %c0_204] : memref<8x1xf32, #tpu.memory_space<vmem>>, vector<8x1xf32>
    %442 = vector.broadcast %441 : vector<8x1xf32> to vector<8x512xf32>
    %443 = arith.addf %440, %442 : vector<8x512xf32>
    %cst_205 = arith.constant 0.000000e+00 : f32
    %444 = vector.broadcast %cst_205 : f32 to vector<8x512xf32>
    %445 = arith.maximumf %443, %444 : vector<8x512xf32>
    %c0_206 = arith.constant 0 : index
    %c0_207 = arith.constant 0 : index
    %c0_208 = arith.constant 0 : index
    %446 = vector.load %arg9[%c0_206, %c0_207, %c0_208] : memref<1x8x512xf32, #tpu.memory_space<vmem>>, vector<1x8x512xf32>
    %447 = vector.shape_cast %446 : vector<1x8x512xf32> to vector<8x512xf32>
    %448 = vector.shape_cast %445 : vector<8x512xf32> to vector<1x8x512xf32>
    tpu.vector_store %arg9[%c0_206, %c0_207, %c0_208], %448 {strides = array<i32>} : memref<1x8x512xf32, #tpu.memory_space<vmem>>, vector<1x8x512xf32>,
    return
  }
  func.func @transform_0(%arg0: i32) -> (i32, i32, i32) {
    %c0_i32 = arith.constant 0 : i32
    %c0_i32_0 = arith.constant 0 : i32
    %c0_i32_1 = arith.constant 0 : i32
    return %arg0, %c0_i32, %c0_i32_0 : i32, i32, i32
  }
  func.func @transform_1(%arg0: i32) -> (i32, i32) {
    %c0_i32 = arith.constant 0 : i32
    %c0_i32_0 = arith.constant 0 : i32
    %c0_i32_1 = arith.constant 0 : i32
    return %c0_i32, %c0_i32_0 : i32, i32
  }
  func.func @transform_2(%arg0: i32) -> (i32, i32) {
    %c0_i32 = arith.constant 0 : i32
    %c0_i32_0 = arith.constant 0 : i32
    %c0_i32_1 = arith.constant 0 : i32
    return %c0_i32, %c0_i32_0 : i32, i32
  }
  func.func @transform_3(%arg0: i32) -> (i32, i32) {
    %c0_i32 = arith.constant 0 : i32
    %c0_i32_0 = arith.constant 0 : i32
    %c0_i32_1 = arith.constant 0 : i32
    return %c0_i32, %c0_i32_0 : i32, i32
  }
  func.func @transform_4(%arg0: i32) -> (i32, i32, i32) {
    %c0_i32 = arith.constant 0 : i32
    %c0_i32_0 = arith.constant 0 : i32
    %c0_i32_1 = arith.constant 0 : i32
    %c0_i32_2 = arith.constant 0 : i32
    return %c0_i32, %c0_i32_0, %c0_i32_1 : i32, i32, i32
  }
  func.func @transform_5(%arg0: i32) -> (i32, i32) {
    %c0_i32 = arith.constant 0 : i32
    %c0_i32_0 = arith.constant 0 : i32
    %c0_i32_1 = arith.constant 0 : i32
    return %c0_i32, %c0_i32_0 : i32, i32
  }
  func.func @transform_6(%arg0: i32) -> (i32, i32, i32) {
    %c0_i32 = arith.constant 0 : i32
    %c0_i32_0 = arith.constant 0 : i32
    %c0_i32_1 = arith.constant 0 : i32
    %c0_i32_2 = arith.constant 0 : i32
    return %c0_i32, %c0_i32_0, %c0_i32_1 : i32, i32, i32
  }
  func.func @transform_7(%arg0: i32) -> (i32, i32) {
    %c0_i32 = arith.constant 0 : i32
    %c0_i32_0 = arith.constant 0 : i32
    %c0_i32_1 = arith.constant 0 : i32
    return %c0_i32, %c0_i32_0 : i32, i32
  }
  func.func @transform_8(%arg0: i32) -> (i32, i32, i32) {
    %c0_i32 = arith.constant 0 : i32
    %c0_i32_0 = arith.constant 0 : i32
    %c0_i32_1 = arith.constant 0 : i32
    return %arg0, %c0_i32, %c0_i32_0 : i32, i32, i32
  }
}

</mosaic_0001>

<bundles_post_ra>
// kernel: down3d_forward.1
= control target key start
LH: loop header
LB: loop body
LE: loop exit
PB: predicated region body
PF: predicated region fallthrough
CT: control target
= control target key end

     0   :  { %s5222_s27 = smov 0   ;;  %s7448_s0 = inlined_call_operand.vmem [shape: f32[2,32,512], index: 0, kind: input, shape index: {}]   ;;  %s7449_s1 = inlined_call_operand.vmem [shape: f32[27,512], index: 1, kind: input, shape index: {}]   ;;  %s7450_s2 = inlined_call_operand.vmem [shape: f32[256,64], index: 2, kind: input, shape index: {}]   ;;  %s7451_s3 = inlined_call_operand.vmem [shape: f32[32,32], index: 3, kind: input, shape index: {}]   ;;  %s7452_s4 = inlined_call_operand.vmem [shape: f32[9,8,24], index: 4, kind: input, shape index: {}]   ;;  %s7453_s5 = inlined_call_operand.vmem [shape: f32[8,1], index: 5, kind: input, shape index: {}]   ;;  %s7454_s6 = inlined_call_operand.vmem [shape: f32[9,8,24], index: 6, kind: input, shape index: {}]   ;;  %s7455_s7 = inlined_call_operand.vmem [shape: f32[8,1], index: 7, kind: input, shape index: {}]   ;;  %s7456_s8 = inlined_call_operand.vmem [shape: f32[2,8,512], index: 8, kind: output, shape index: {}]  }
   0x1 LB: > { %s4672_s28 = sadd.s32 4294967295, %s5155_s27   ;;  %p4676_p0 = scmp.ge.s32.totalorder %s5155_s27, 1  ;;  %s5155_s27 = sphi %s5222_s27, %s18_s27  }
   0x2   : > { %p262_p1 = scmp.lt.s32.totalorder %s5155_s27, 3 }
   0x4   : > { %p263_p2 = pnand %p4676_p0, %p262_p1 }
   0x6   : > { %266 = sbr.rel (%p263_p2) target bundleno = 1831 (0x727), region = 52 }
   0xd   : > { %p296_p3 = scmp.lt.s32.totalorder %s4672_s28, 1  ;;  %s7463_s11 = smov 127   ;;  %v414_v28 = vld [vmem:[%s7450_s2 + $0x80] sm:$0xff]  ;;  %v415_v29 = vld [vmem:[%s7450_s2 + $0x88] sm:$0xff]  ;;  %v416_v33 = vld [vmem:[%s7450_s2 + $0x90] sm:$0xff]  ;;  %vm519_vm2 = vcmask 261120  }
   0xe   : > { %v398_v30 = vld [vmem:[%s7450_s2] sm:$0xff]  ;;  %v4832_v31 = vpack.c.bf16 %v415_v29, %v414_v28  ;;  %v399_v32 = vld [vmem:[%s7450_s2 + $0x8] sm:$0xff]  ;;  %v417_v34 = vld [vmem:[%s7450_s2 + $0x98] sm:$0xff]  ;;  %s5158_s19 = smov 112   ;;  %vm621_vm3 = vcmask 519168   ;;  %s7459_s30 = smov 64  }
   0xf   : > { %s7870_s28 = smov (!%p296_p3, %s4672_s28), 1  ;;  %v4834_v35 = vpack.c.bf16 %v399_v32, %v398_v30  ;;  %v4836_v36 = vpack.c.bf16 %v417_v34, %v416_v33  ;;  %v400_v37 = vld [vmem:[%s7450_s2 + $0x10] sm:$0xff]  ;;  %v401_v38 = vld [vmem:[%s7450_s2 + $0x18] sm:$0xff]  ;;  %v418_v39 = vld [vmem:[%s7450_s2 + $0xa0] sm:$0xff]  ;;  %vm628_vm4 = vcmask 1043968   ;;  %s5161_s9 = smov 73  }
  0x10   : > { %s4764_s29 = sshll.u32 %s7870_s28, 7  ;;  %4833 = vmatprep.subr.bf16.mxu0 %v4832_v31  ;;  %v419_v40 = vld [vmem:[%s7450_s2 + $0xa8] sm:$0xff]  ;;  %v4838_v41 = vpack.c.bf16 %v401_v38, %v400_v37  ;;  %v402_v43 = vld [vmem:[%s7450_s2 + $0x20] sm:$0xff]  ;;  %v420_v45 = vld [vmem:[%s7450_s2 + $0xb0] sm:$0xff]  ;;  %s5163_s12 = smov 72   ;;  %vm897_vm12 = vcmask 195584  }
  0x11   : > { %s300_s10 = scalar_lea.vmem %s7448_s0, %s4764_s29  ;;  %4835 = vmatpush3.bf16.msra.mxu0 %v4834_v35  ;;  %v4840_v42 = vpack.c.bf16 %v419_v40, %v418_v39  ;;  %v403_v44 = vld [vmem:[%s7450_s2 + $0x28] sm:$0xff]  ;;  %v421_v46 = vld [vmem:[%s7450_s2 + $0xb8] sm:$0xff]  ;;  %v404_v49 = vld [vmem:[%s7450_s2 + $0x30] sm:$0xff]  ;;  %s7457_s13 = smov 63  }
  0x12   : > { %v306_v0 = vld [vmem:[%s300_s10] sm:$0xff]  ;;  %v307_v1 = vld [vmem:[%s300_s10 + $0x8] sm:$0xff]  ;;  %v308_v2 = vld [vmem:[%s300_s10 + $0x10] sm:$0xff]  ;;  %4837 = vmatprep.subr.bf16.mxu0 %v4836_v36  ;;  %v4842_v47 = vpack.c.bf16 %v403_v44, %v402_v43  ;;  %v4844_v48 = vpack.c.bf16 %v421_v46, %v420_v45  ;;  %s5165_s14 = smov 71   ;;  %s5166_s15 = smov 57  }
  0x13   : > { %v309_v3 = vld [vmem:[%s300_s10 + $0x18] sm:$0xff]  ;;  %v5236_v4 = vmax.f32 %v306_v0, %v308_v2  ;;  %v314_v5 = vld [vmem:[%s300_s10 + $0x40] sm:$0xff]  ;;  %v315_v6 = vld [vmem:[%s300_s10 + $0x48] sm:$0xff]  ;;  %s5167_s16 = smov 56   ;;  %s5168_s17 = smov 55  }
  0x14   : > { %v5238_v7 = vmax.f32 %v307_v1, %v309_v3  ;;  %v316_v8 = vld [vmem:[%s300_s10 + $0x50] sm:$0xff]  ;;  %v317_v9 = vld [vmem:[%s300_s10 + $0x58] sm:$0xff]  ;;  %v310_v10 = vld [vmem:[%s300_s10 + $0x20] sm:$0xff]  ;;  %s5169_s18 = smov 9   ;;  %s5171_s20 = smov 7  }
  0x15   : > { %v5240_v11 = vmax.f32 %v314_v5, %v316_v8  ;;  %v5242_v12 = vmax.f32 %v315_v6, %v317_v9  ;;  %v311_v13 = vld [vmem:[%s300_s10 + $0x28] sm:$0xff]  ;;  %v312_v14 = vld [vmem:[%s300_s10 + $0x30] sm:$0xff]  ;;  %v313_v15 = vld [vmem:[%s300_s10 + $0x38] sm:$0xff]  ;;  %4839 = vmatpush3.bf16.msra.mxu0 %v4838_v41  ;;  %v346_v8 = vlaneseq  ;;  %s5172_s21 = smov 1   ;;  %s5173_s22 = smov 120  }
  0x16   : > { %v5108_v16 = vpack.i.bf16 %v5238_v7, %v5236_v4  ;;  %v5246_v17 = vmax.f32 %v310_v10, %v312_v14  ;;  %v5248_v18 = vmax.f32 %v311_v13, %v313_v15  ;;  %v318_v19 = vld [vmem:[%s300_s10 + $0x60] sm:$0xff]  ;;  %v319_v20 = vld [vmem:[%s300_s10 + $0x68] sm:$0xff]  ;;  %v320_v21 = vld [vmem:[%s300_s10 + $0x70] sm:$0xff]  ;;  %4841 = vmatprep.subr.bf16.mxu0 %v4840_v42  ;;  %s5174_s23 = smov 121  }
  0x17   : > { %v5118_v22 = vpack.i.bf16 %v5242_v12, %v5240_v11  ;;  %v321_v23 = vld [vmem:[%s300_s10 + $0x78] sm:$0xff]  ;;  %v5252_v24 = vmax.f32 %v318_v19, %v320_v21  ;;  %v422_v51 = vld [vmem:[%s7450_s2 + $0xc0] sm:$0xff]  ;;  %v423_v52 = vld [vmem:[%s7450_s2 + $0xc8] sm:$0xff]  ;;  %s7461_s10 = smov 65  }
  0x18   : > { %5109 = vrot.lane.b32.xlu0 %v5108_v16, %s7463_s11  ;;  %v5113_v25 = vpack.i.bf16 %v5248_v18, %v5246_v17  ;;  %v5257_v26 = vmax.f32 %v319_v20, %v321_v23  ;;  %v405_v50 = vld [vmem:[%s7450_s2 + $0x38] sm:$0xff]  ;;  %v4848_v54 = vpack.c.bf16 %v423_v52, %v422_v51  ;;  %v406_v55 = vld [vmem:[%s7450_s2 + $0x40] sm:$0xff]  ;;  %v407_v56 = vld [vmem:[%s7450_s2 + $0x48] sm:$0xff]  ;;  %v5361_v16 = vand.u32 127, %v346_v8 }
  0x19   : > { %5119 = vrot.lane.b32.xlu1 %v5118_v22, %s7463_s11  ;;  %4843 = vmatpush3.bf16.msra.mxu0 %v4842_v47  ;;  %v4846_v53 = vpack.c.bf16 %v405_v50, %v404_v49  ;;  %v424_v57 = vld [vmem:[%s7450_s2 + $0xd0] sm:$0xff]  ;;  %v425_v58 = vld [vmem:[%s7450_s2 + $0xd8] sm:$0xff]  ;;  %v4850_v59 = vpack.c.bf16 %v407_v56, %v406_v55  ;;  %v426_v63 = vld [vmem:[%s7450_s2 + $0xe0] sm:$0xff] }
  0x1a   : > { %v5123_v27 = vpack.i.bf16 %v5257_v26, %v5252_v24  ;;  %4845 = vmatprep.subr.bf16.mxu0 %v4844_v48  ;;  %v4852_v60 = vpack.c.bf16 %v425_v58, %v424_v57  ;;  %v408_v61 = vld [vmem:[%s7450_s2 + $0x50] sm:$0xff]  ;;  %v409_v62 = vld [vmem:[%s7450_s2 + $0x58] sm:$0xff]  ;;  %v427_v0 = vld [vmem:[%s7450_s2 + $0xe8] sm:$0xff]  ;;  %vm348_vm0 = vcmp.lt.s32.totalorder %v5361_v16, 127  ;;  %vm381_vm1 = vcmp.lt.s32.totalorder %v5361_v16, 112 }
  0x1b   : > { %v4854_v1 = vpack.c.bf16 %v409_v62, %v408_v61  ;;  %v4856_v2 = vpack.c.bf16 %v427_v0, %v426_v63  ;;  %v410_v3 = vld [vmem:[%s7450_s2 + $0x60] sm:$0xff]  ;;  %v411_v5 = vld [vmem:[%s7450_s2 + $0x68] sm:$0xff]  ;;  %v428_v9 = vld [vmem:[%s7450_s2 + $0xf0] sm:$0xff]  ;;  %vm783_vm5 = vcmp.lt.s32.totalorder %v5361_v16, 65  ;;  %vm7562_vm6 = vcmp.lt.s32.totalorder %v5361_v16, 64 }
  0x1c   : > { %5114 = vrot.lane.b32.xlu0 %v5113_v25, %s7463_s11  ;;  %v4858_v6 = vpack.c.bf16 %v411_v5, %v410_v3  ;;  %v429_v10 = vld [vmem:[%s7450_s2 + $0xf8] sm:$0xff]  ;;  %v412_v14 = vld [vmem:[%s7450_s2 + $0x70] sm:$0xff]  ;;  %vm1196_vm7 = vcmp.lt.s32.totalorder %v5361_v16, 57  ;;  %vm1236_vm8 = vcmp.lt.s32.totalorder %v5361_v16, 56  ;;  %vm663_vm9 = vcmp.lt.s32.totalorder %v5361_v16, 73 }
  0x1d   : > { %5124 = vrot.lane.b32.xlu1 %v5123_v27, %s7463_s11  ;;  %4847 = vmatpush3.bf16.msra.mxu0 %v4846_v53  ;;  %v4860_v13 = vpack.c.bf16 %v429_v10, %v428_v9  ;;  %v413_v15 = vld [vmem:[%s7450_s2 + $0x78] sm:$0xff]  ;;  %vm702_vm10 = vcmp.lt.s32.totalorder %v5361_v16, 72  ;;  %vm7554_vm11 = vcmp.lt.s32.totalorder %v5361_v16, 63  ;;  %vm742_vm13 = vcmp.lt.s32.totalorder %v5361_v16, 71 }
  0x1e   : > { %4849 = vmatprep.subr.bf16.mxu0 %v4848_v54  ;;  %v4862_v19 = vpack.c.bf16 %v413_v15, %v412_v14  ;;  %v515_v15 = vld [vmem:[%s7451_s3] sm:$0xff]  ;;  %vm1276_vm14 = vcmp.lt.s32.totalorder %v5361_v16, 55  ;;  %vm1507_vm15 = vcmp.lt.s32.totalorder %v5361_v16, 8 }
  0x1f   : > { %4826 = vmatprep.mubr.msk.f32.mxu1 %vm519_vm2, %v515_v15 }
  0x21   : > { %4851 = vmatpush3.bf16.msra.mxu0 %v4850_v59 }
  0x22   : > { %4853 = vmatprep.subr.bf16.mxu0 %v4852_v60 }
  0x25   : > { %4855 = vmatpush3.bf16.msra.mxu0 %v4854_v1 }
  0x26   : > { %4857 = vmatprep.subr.bf16.mxu0 %v4856_v2 }
  0x29   : > { %4859 = vmatpush3.bf16.msra.mxu0 %v4858_v6 }
  0x2a   : > { %4861 = vmatprep.subr.bf16.mxu0 %v4860_v13 }
  0x2d   : > { %4863 = vmatpush3.bf16.msra.mxu0 %v4862_v19 }
  0x8a   : > { %v5110_v20 = vpop.permute.xlu0 %5109 }
  0x8b   : > { %v5112_v21 = vunpack.i.h.bf16 %v5110_v20  ;;  %v5111_v22 = vunpack.i.l.bf16 %v5110_v20  ;;  %v5120_v23 = vpop.permute.xlu1 %5119 }
  0x8c   : > { %v5122_v25 = vunpack.i.h.bf16 %v5120_v23  ;;  %v5121_v27 = vunpack.i.l.bf16 %v5120_v23 }
  0x8d   : > { %v349_v28 = vsel %vm348_vm0, %v5111_v22, %v5112_v21  ;;  %v353_v29 = vsel %vm348_vm0, %v5112_v21, %v5111_v22 }
  0x8e   : > { %v5115_v30 = vpop.permute.xlu0 %5114  ;;  %v357_v31 = vmax.f32 %v5236_v4, %v349_v28  ;;  %v358_v32 = vmax.f32 %v5238_v7, %v353_v29  ;;  %v351_v33 = vsel %vm348_vm0, %v5121_v27, %v5122_v25  ;;  %v355_v34 = vsel %vm348_vm0, %v5122_v25, %v5121_v27 }
  0x8f   : > { %v5117_v35 = vunpack.i.h.bf16 %v5115_v30  ;;  %v5116_v36 = vunpack.i.l.bf16 %v5115_v30  ;;  %v5125_v37 = vpop.permute.xlu1 %5124  ;;  %v361_v38 = vmax.f32 %v5240_v11, %v351_v33  ;;  %v362_v39 = vmax.f32 %v5242_v12, %v355_v34 }
  0x90   : > { %v5127_v40 = vunpack.i.h.bf16 %v5125_v37  ;;  %v5126_v41 = vunpack.i.l.bf16 %v5125_v37  ;;  %v5128_v42 = vpack.i.bf16 %v358_v32, %v357_v31  ;;  %v518_v37 = vld [vmem:[%s7451_s3 + $0x18] sm:$0xff] }
  0x91   : > { %v350_v4 = vsel %vm348_vm0, %v5116_v36, %v5117_v35  ;;  %v354_v7 = vsel %vm348_vm0, %v5117_v35, %v5116_v36  ;;  %v5138_v43 = vpack.i.bf16 %v362_v39, %v361_v38  ;;  %v516_v35 = vld [vmem:[%s7451_s3 + $0x8] sm:$0xff]  ;;  %v517_v36 = vld [vmem:[%s7451_s3 + $0x10] sm:$0xff] }
  0x92   : > { %5129 = vrot.lane.b32.xlu0 %v5128_v42, %s5158_s19  ;;  %v359_v44 = vmax.f32 %v5246_v17, %v350_v4  ;;  %v360_v45 = vmax.f32 %v5248_v18, %v354_v7  ;;  %v352_v11 = vsel %vm348_vm0, %v5126_v41, %v5127_v40  ;;  %v356_v12 = vsel %vm348_vm0, %v5127_v40, %v5126_v41 }
  0x93   : > { %v363_v46 = vmax.f32 %v5252_v24, %v352_v11  ;;  %v364_v47 = vmax.f32 %v5257_v26, %v356_v12 }
  0x94   : > { %v5133_v48 = vpack.i.bf16 %v360_v45, %v359_v44 }
  0x95   : > { %v5143_v49 = vpack.i.bf16 %v364_v47, %v363_v46 }
  0x96   : > { %5134 = vrot.lane.b32.xlu1 %v5133_v48, %s5158_s19  ;;  %5139 = vrot.lane.b32.xlu0 %v5138_v43, %s5158_s19 }
  0x9a   : > { %5144 = vrot.lane.b32.xlu1 %v5143_v49, %s5158_s19  ;;  %s5170_s19 = smov 8  }
 0x104   : > { %v5130_v50 = vpop.permute.xlu0 %5129 }
 0x105   : > { %v5132_v17 = vunpack.i.h.bf16 %v5130_v50  ;;  %v5131_v18 = vunpack.i.l.bf16 %v5130_v50 }
 0x107   : > { %v386_v51 = vsel %vm381_vm1, %v5132_v17, %v5131_v18  ;;  %v382_v52 = vsel %vm381_vm1, %v5131_v18, %v5132_v17 }
 0x108   : > { %v5135_v53 = vpop.permute.xlu1 %5134  ;;  %v5140_v24 = vpop.permute.xlu0 %5139  ;;  %v391_v54 = vmax.f32 %v358_v32, %v386_v51  ;;  %v390_v26 = vmax.f32 %v357_v31, %v382_v52  ;;  %v5560_v51 = vshrl.u32 %v346_v8, 7  ;;  %v5584_v8 = vld [vmem:[%s7449_s1 + $0x3] ss:$8 sm:$0xf] }
 0x109   : > { %v5137_v55 = vunpack.i.h.bf16 %v5135_v53  ;;  %v5136_v56 = vunpack.i.l.bf16 %v5135_v53  ;;  %v5142_v57 = vunpack.i.h.bf16 %v5140_v24  ;;  %v5141_v58 = vunpack.i.l.bf16 %v5140_v24 }
 0x10a   : > { %494 = vmatprep.mubr.f32.mxu0 %v391_v54  ;;  %v5571_v24 = vsub.s32 0, %v5560_v51  ;;  %v5574_v54 = vsub.s32 1, %v5560_v51 }
 0x10b   : > { %495 = vmatmul.mubr.f32.vlgmr.msra.gmra.mrb[0].mxu0 %v390_v26  ;;  %v387_v59 = vsel %vm381_vm1, %v5137_v55, %v5136_v56  ;;  %v383_v60 = vsel %vm381_vm1, %v5136_v56, %v5137_v55  ;;  %v388_v61 = vsel %vm381_vm1, %v5142_v57, %v5141_v58  ;;  %v384_v5 = vsel %vm381_vm1, %v5141_v58, %v5142_v57  ;;  %v5589_v26 = vld [vmem:[%s7449_s1 + $0x45] ss:$8 sm:$0xf]  ;;  %v5594_v55 = vld [vmem:[%s7449_s1 + $0x4] ss:$8 sm:$0xf] }
 0x10c   : > { %v5145_v62 = vpop.permute.xlu1 %5144  ;;  %v393_v63 = vmax.f32 %v360_v45, %v387_v59  ;;  %v392_v0 = vmax.f32 %v359_v44, %v383_v60  ;;  %v395_v3 = vmax.f32 %v362_v39, %v388_v61  ;;  %v394_v9 = vmax.f32 %v361_v38, %v384_v5  ;;  %v5599_v56 = vld [vmem:[%s7449_s1 + $0x46] ss:$8 sm:$0xf] }
 0x10d   : > { %v5147_v1 = vunpack.i.h.bf16 %v5145_v62  ;;  %v5146_v2 = vunpack.i.l.bf16 %v5145_v62  ;;  %v7465_v38 = vmov 0.0   ;;  %v5607_v59 = vrot.slane %v5584_v8, %v5574_v54 }
 0x10e   : > { %499 = vmatprep.mubr.f32.mxu0 %v393_v63  ;;  %618 = vst [vmem:[#allocation2 + $0x8] sm:$0xf0] %v7465_v38  ;;  %617 = vst [vmem:[#allocation2] sm:$0xf0] %v7465_v38  ;;  %v5611_v60 = vrot.slane %v5589_v26, %v5571_v24  ;;  %v5624_v62 = vrot.slane %v5594_v55, %v5574_v54  ;;  %v5628_v63 = vrot.slane %v5599_v56, %v5571_v24 }
 0x10f   : > { %500 = vmatmul.mubr.f32.gmra.mrb[2].mxu0 %v392_v0  ;;  %v389_v6 = vsel %vm381_vm1, %v5147_v1, %v5146_v2  ;;  %v385_v13 = vsel %vm381_vm1, %v5146_v2, %v5147_v1  ;;  %619 = vst [vmem:[#allocation2 + $0x10] sm:$0xf0] %v7465_v38  ;;  %620 = vst [vmem:[#allocation2 + $0x18] sm:$0xf0] %v7465_v38  ;;  %vm1467_vm1 = vcmp.lt.s32.totalorder %v5361_v16, 9 }
 0x110   : > { %504 = vmatprep.mubr.f32.mxu0 %v395_v3  ;;  %v397_v10 = vmax.f32 %v364_v47, %v389_v6  ;;  %v396_v14 = vmax.f32 %v363_v46, %v385_v13  ;;  %7598 = vst [vmem:[#allocation7_spill] sm:$0xff] %v5607_v59  ;;  %7599 = vst [vmem:[#allocation8_spill] sm:$0xff] %v5611_v60 }
 0x111   : > { %7600 = vst [vmem:[#allocation9_spill] sm:$0xff] %v5624_v62  ;;  %7601 = vst [vmem:[#allocation10_spill] sm:$0xff] %v5628_v63 }
 0x113   : > { %505 = vmatmul.mubr.f32.gmra.mrb[4].mxu0 %v394_v9 }
 0x114   : > { %509 = vmatprep.mubr.f32.mxu0 %v397_v10 }
 0x117   : > { %510 = vmatmul.mubr.f32.gmra.mrb[6].mxu0 %v396_v14 }
 0x118   : > { %3323 = vmatprep.mubr.f32.mxu0 %v7465_v38 }
 0x1de   : > { %v4798_v19 = vpop.f32.mrb[0].mxu0 }
 0x1df   : > { %v4799_v20 = vpop.f32.mrb[1].mxu0 }
 0x1e0   : > { %v4800_v21 = vadd.f32 %v4799_v20, %v4798_v19 }
 0x1e2   : > { %v4801_v22 = vpop.f32.mrb[2].mxu0 }
 0x1e3   : > { %v4802_v23 = vpop.f32.mrb[3].mxu0 }
 0x1e4   : > { %v4803_v25 = vadd.f32 %v4802_v23, %v4801_v22  ;;  %v5672_v22 = vld [vmem:[%s7449_s1 + $0x61] ss:$8 sm:$0xf] }
 0x1e6   : > { %v4804_v27 = vpop.f32.mrb[4].mxu0  ;;  %v4864_v28 = vpack.c.bf16 %v4803_v25, %v4800_v21  ;;  %v5667_v21 = vld [vmem:[%s7449_s1 + $0x60] ss:$8 sm:$0xf] }
 0x1e7   : > { %v4805_v29 = vpop.f32.mrb[5].mxu0 }
 0x1e8   : > { %v4806_v30 = vadd.f32 %v4805_v29, %v4804_v27  ;;  %4865 = vmatprep.subr.bf16.mxu1 %v4864_v28  ;;  %v5681_v27 = vrot.slane %v5667_v21, %v5571_v24 }
 0x1e9   : > { %4867 = vmatpush3.bf16.msra.mxu1 %v4864_v28  ;;  %v5686_v28 = vrot.slane %v5672_v22, %v5571_v24 }
 0x1ea   : > { %v4807_v31 = vpop.f32.mrb[6].mxu0  ;;  %7604 = vst [vmem:[#allocation13_spill] sm:$0xff] %v5681_v27 }
 0x1eb   : > { %v4808_v32 = vpop.f32.mrb[7].mxu0  ;;  %7605 = vst [vmem:[#allocation14_spill] sm:$0xff] %v5686_v28 }
 0x1ec   : > { %v4809_v33 = vadd.f32 %v4808_v32, %v4807_v31 }
 0x1ee   : > { %v4868_v34 = vpack.c.bf16 %v4809_v33, %v4806_v30 }
 0x1f0   : > { %4869 = vmatprep.subr.bf16.mxu1 %v4868_v34 }
 0x1f1   : > { %4871 = vmatpush3.bf16.msra.mxu1 %v4868_v34 }
 0x1f4   : > { %4827 = vmatmul.mubr.msk.f32.vlgmr.msra.gmra.mrb[0].mxu1 %vm519_vm2, %v516_v35  ;;  %v5783_v35 = vld [vmem:[%s7449_s1 + $0x5] ss:$8 sm:$0xf] }
 0x1f5   : > { %4829 = vmatprep.mubr.msk.f32.mxu1 %vm519_vm2, %v517_v36  ;;  %v5804_v10 = vrot.slane %v5783_v35, %v5574_v54 }
 0x1f7   : > { %7619 = vst [vmem:[#allocation28_spill] sm:$0xff] %v5804_v10 }
 0x1f8   : > { %4830 = vmatmul.mubr.msk.f32.gmra.mrb[2].mxu1 %vm519_vm2, %v518_v37  ;;  %vm1547_vm2 = vcmp.lt.s32.totalorder %v5361_v16, 7 }
 0x1f9   : > { %965 = vmatprep.mubr.f32.mxu1 %v7465_v38 }
 0x2c7   : > { %v4828_v39 = vpop.f32.mrb[0].mxu1 }
 0x2c8   : > { %630 = vst.msk [vmem:[#allocation2 + $0x8] sm:$0xf] %vm621_vm3, %v4828_v39  ;;  %v632_v40 = vrot.slane %v4828_v39, 4  ;;  %v598_v41 = vpop.f32.mrb[1].mxu1 }
 0x2c9   : > { %622 = vst.msk [vmem:[#allocation2] sm:$0xf] %vm621_vm3, %v598_v41  ;;  %v624_v42 = vrot.slane %v598_v41, 4  ;;  %v5721_v39 = vld [vmem:[%s7449_s1 + $0x42] ss:$8 sm:$0xf] }
 0x2ca   : > { %633 = vrot.lane.b32.xlu1 %v632_v40, %s7459_s30  ;;  %7608 = vst [vmem:[#allocation17_spill] sm:$0xff] %v5721_v39  ;;  %v5726_v40 = vld [vmem:[%s7449_s1 + $0x43] ss:$8 sm:$0xf] }
 0x2cb   : > { %625 = vrot.lane.b32.xlu0 %v624_v42, %s7459_s30  ;;  %v4831_v4 = vpop.f32.mrb[2].mxu1  ;;  %7609 = vst [vmem:[#allocation18_spill] sm:$0xff] %v5726_v40 }
 0x2cc   : > { %644 = vst.msk [vmem:[#allocation2 + $0x18] sm:$0xf] %vm621_vm3, %v4831_v4  ;;  %v646_v7 = vrot.slane %v4831_v4, 4  ;;  %v608_v43 = vpop.f32.mrb[3].mxu1  ;;  %v5732_v4 = vsub.s32 3, %v5560_v51 }
 0x2cd   : > { %637 = vst.msk [vmem:[#allocation2 + $0x10] sm:$0xf] %vm621_vm3, %v608_v43  ;;  %v639_v44 = vrot.slane %v608_v43, 4  ;;  %v5741_v43 = vrot.slane %v5726_v40, %v5571_v24  ;;  %vm1738_vm3 = vcmp.lt.s32.totalorder %v5361_v16, 1 }
 0x2cf   : > { %647 = vrot.lane.b32.xlu0 %v646_v7, %s7459_s30  ;;  %640 = vrot.lane.b32.xlu1 %v639_v44, %s7459_s30  ;;  %v5736_v7 = vrot.slane %v5721_v39, %v5571_v24  ;;  %7611 = vst [vmem:[#allocation20_spill] sm:$0xff] %v5741_v43 }
 0x2d1   : > { %7610 = vst [vmem:[#allocation19_spill] sm:$0xff] %v5736_v7 }
 0x33c   : > { %v634_v45 = vpop.permute.xlu1 %633 }
 0x33d   : > { %636 = vst.msk [vmem:[#allocation2 + $0x8] sm:$0xf] %vm628_vm4, %v634_v45  ;;  %v626_v11 = vpop.permute.xlu0 %625 }
 0x33e   : > { %629 = vst.msk [vmem:[#allocation2] sm:$0xf] %vm628_vm4, %v626_v11 }
 0x341   : > { %v648_v12 = vpop.permute.xlu0 %647  ;;  %v641_v46 = vpop.permute.xlu1 %640 }
 0x342   : > { %650 = vst.msk [vmem:[#allocation2 + $0x18] sm:$0xf] %vm628_vm4, %v648_v12  ;;  %643 = vst.msk [vmem:[#allocation2 + $0x10] sm:$0xf] %vm628_vm4, %v641_v46  ;;  %v5758_v46 = vrot.slane %v5584_v8, %v5571_v24  ;;  %vm1968_vm4 = vcmp.lt.s32.totalorder %v5361_v16, 121 }
 0x344   : > { %v5431_v47 = vld [vmem:[#allocation2 + $0x8] sm:$0xff]  ;;  %7612 = vst [vmem:[#allocation21_spill] sm:$0xff] %v5758_v46 }
 0x345   : > { %7594 = vst [vmem:[#allocation3_spill] sm:$0xff] %v5431_v47  ;;  %657 = vrot.lane.b32.xlu0 %v5431_v47, %s5161_s9  ;;  %777 = vrot.lane.b32.xlu1 %v5431_v47, %s7461_s10  ;;  %v5441_v48 = vld [vmem:[#allocation2] sm:$0xff] }
 0x346   : > { %7595 = vst [vmem:[#allocation4_spill] sm:$0xff] %v5441_v48 }
 0x349   : > { %696 = vrot.lane.b32.xlu0 %v5431_v47, %s5163_s12  ;;  %817 = vrot.lane.b32.xlu1 %v5431_v47, %s7459_s30  ;;  %v5479_v49 = vld [vmem:[#allocation2 + $0x18] sm:$0xff]  ;;  %v5501_v50 = vld [vmem:[#allocation2 + $0x10] sm:$0xff] }
 0x34a   : > { %7596 = vst [vmem:[#allocation5_spill] sm:$0xff] %v5479_v49  ;;  %7597 = vst [vmem:[#allocation6_spill] sm:$0xff] %v5501_v50 }
 0x34d   : > { %775 = vrot.lane.b32.xlu0 %v5441_v48, %s7461_s10  ;;  %857 = vrot.lane.b32.xlu1 %v5431_v47, %s7457_s13 }
 0x351   : > { %815 = vrot.lane.b32.xlu0 %v5441_v48, %s7459_s30  ;;  %736 = vrot.lane.b32.xlu1 %v5431_v47, %s5165_s14 }
 0x355   : > { %855 = vrot.lane.b32.xlu0 %v5441_v48, %s7457_s13  ;;  %1190 = vrot.lane.b32.xlu1 %v5431_v47, %s5166_s15 }
 0x359   : > { %734 = vrot.lane.b32.xlu0 %v5441_v48, %s5165_s14  ;;  %1230 = vrot.lane.b32.xlu1 %v5431_v47, %s5167_s16 }
 0x35d   : > { %1188 = vrot.lane.b32.xlu0 %v5441_v48, %s5166_s15  ;;  %1270 = vrot.lane.b32.xlu1 %v5431_v47, %s5168_s17 }
 0x361   : > { %1228 = vrot.lane.b32.xlu0 %v5441_v48, %s5167_s16  ;;  %1461 = vrot.lane.b32.xlu1 %v5431_v47, %s5169_s18 }
 0x365   : > { %1268 = vrot.lane.b32.xlu0 %v5441_v48, %s5168_s17  ;;  %1501 = vrot.lane.b32.xlu1 %v5431_v47, %s5170_s19 }
 0x369   : > { %1459 = vrot.lane.b32.xlu0 %v5441_v48, %s5169_s18  ;;  %655 = vrot.lane.b32.xlu1 %v5441_v48, %s5161_s9 }
 0x36d   : > { %1499 = vrot.lane.b32.xlu0 %v5441_v48, %s5170_s19  ;;  %694 = vrot.lane.b32.xlu1 %v5441_v48, %s5163_s12 }
 0x371   : > { %781 = vrot.lane.b32.xlu0 %v5479_v49, %s7461_s10  ;;  %821 = vrot.lane.b32.xlu1 %v5479_v49, %s7459_s30 }
 0x375   : > { %861 = vrot.lane.b32.xlu0 %v5479_v49, %s7457_s13  ;;  %700 = vrot.lane.b32.xlu1 %v5479_v49, %s5163_s12 }
 0x379   : > { %661 = vrot.lane.b32.xlu0 %v5479_v49, %s5161_s9  ;;  %1234 = vrot.lane.b32.xlu1 %v5479_v49, %s5167_s16 }
 0x37d   : > { %740 = vrot.lane.b32.xlu0 %v5479_v49, %s5165_s14  ;;  %1505 = vrot.lane.b32.xlu1 %v5479_v49, %s5170_s19 }
 0x381   : > { %1194 = vrot.lane.b32.xlu0 %v5479_v49, %s5166_s15  ;;  %1541 = vrot.lane.b32.xlu1 %v5431_v47, %s5171_s20 }
 0x385   : > { %1274 = vrot.lane.b32.xlu0 %v5479_v49, %s5168_s17  ;;  %819 = vrot.lane.b32.xlu1 %v5501_v50, %s7459_s30 }
 0x389   : > { %859 = vrot.lane.b32.xlu1 %v5501_v50, %s7457_s13  ;;  %779 = vrot.lane.b32.xlu0 %v5501_v50, %s7461_s10  ;;  %s7737_s10 = smov 127  }
 0x38d   : > { %1732 = vrot.lane.b32.xlu1 %v5431_v47, %s5172_s21  ;;  %1465 = vrot.lane.b32.xlu0 %v5479_v49, %s5169_s18 }
 0x391   : > { %698 = vrot.lane.b32.xlu1 %v5501_v50, %s5163_s12  ;;  %1539 = vrot.lane.b32.xlu0 %v5441_v48, %s5171_s20 }
 0x395   : > { %738 = vrot.lane.b32.xlu1 %v5501_v50, %s5165_s14  ;;  %659 = vrot.lane.b32.xlu0 %v5501_v50, %s5161_s9 }
 0x399   : > { %1232 = vrot.lane.b32.xlu1 %v5501_v50, %s5167_s16  ;;  %1545 = vrot.lane.b32.xlu0 %v5479_v49, %s5171_s20 }
 0x39d   : > { %1272 = vrot.lane.b32.xlu1 %v5501_v50, %s5168_s17  ;;  %1730 = vrot.lane.b32.xlu0 %v5441_v48, %s5172_s21 }
 0x3a1   : > { %1776 = vrot.lane.b32.xlu1 %v5479_v49, %s7463_s11  ;;  %1192 = vrot.lane.b32.xlu0 %v5501_v50, %s5166_s15 }
 0x3a5   : > { %2000 = vrot.lane.b32.xlu1 %v5441_v48, %s5173_s22  ;;  %1736 = vrot.lane.b32.xlu0 %v5479_v49, %s5172_s21 }
 0x3a9   : > { %1503 = vrot.lane.b32.xlu1 %v5501_v50, %s5170_s19  ;;  %1772 = vrot.lane.b32.xlu0 %v5431_v47, %s7463_s11 }
 0x3ad   : > { %1543 = vrot.lane.b32.xlu1 %v5501_v50, %s5171_s20  ;;  %1463 = vrot.lane.b32.xlu0 %v5501_v50, %s5169_s18 }
 0x3b1   : > { %1734 = vrot.lane.b32.xlu1 %v5501_v50, %s5172_s21  ;;  %1770 = vrot.lane.b32.xlu0 %v5441_v48, %s7463_s11 }
 0x3b5   : > { %1774 = vrot.lane.b32.xlu1 %v5501_v50, %s7463_s11  ;;  %1962 = vrot.lane.b32.xlu0 %v5431_v47, %s5174_s23  ;;  %s5175_s11 = smov 119  }
 0x3b7   : > { %v5555_v17 = vpop.permute.xlu0 %657  ;;  %v5557_v18 = vpop.permute.xlu1 %777 }
 0x3b9   : > { %1964 = vrot.lane.b32.xlu1 %v5501_v50, %s5174_s23  ;;  %2002 = vrot.lane.b32.xlu0 %v5431_v47, %s5173_s22 }
 0x3bb   : > { %v5566_v52 = vpop.permute.xlu0 %696  ;;  %v5568_v53 = vpop.permute.xlu1 %817 }
 0x3bd   : > { %2004 = vrot.lane.b32.xlu1 %v5501_v50, %s5173_s22  ;;  %1960 = vrot.lane.b32.xlu0 %v5441_v48, %s5174_s23 }
 0x3bf   : > { %v5601_v57 = vpop.permute.xlu0 %775  ;;  %v5603_v58 = vpop.permute.xlu1 %857 }
 0x3c0   : > { %v786_v61 = vsel %vm783_vm5, %v5601_v57, %v5557_v18 }
 0x3c1   : > { %2006 = vrot.lane.b32.xlu1 %v5479_v49, %s5173_s22  ;;  %1966 = vrot.lane.b32.xlu0 %v5479_v49, %s5174_s23  ;;  %v812_v2 = vmul.f32 %v5607_v59, %v786_v61  ;;  %v5640_v5 = vmul.f32 %v5611_v60, %v786_v61  ;;  %v5762_v61 = vrot.slane %v5589_v26, %v5732_v4 }
 0x3c3   : > { %v5630_v0 = vpop.permute.xlu0 %815  ;;  %v5632_v1 = vpop.permute.xlu1 %736  ;;  %7602 = vst [vmem:[#allocation11_spill] sm:$0xff] %v5640_v5  ;;  %7613 = vst [vmem:[#allocation22_spill] sm:$0xff] %v5762_v61 }
 0x3c4   : > { %v826_v3 = vsel %vm7562_vm6, %v5630_v0, %v5568_v53 }
 0x3c5   : > { %v852_v6 = vmul.f32 %v5624_v62, %v826_v3  ;;  %v5644_v9 = vmul.f32 %v5628_v63, %v826_v3  ;;  %2044 = vrot.lane.b32.xlu1 %v5501_v50, %s5175_s11  ;;  %2042 = vrot.lane.b32.xlu0 %v5431_v47, %s5175_s11 }
 0x3c7   : > { %7603 = vst [vmem:[#allocation12_spill] sm:$0xff] %v5644_v9  ;;  %v5652_v13 = vpop.permute.xlu0 %855  ;;  %v5654_v14 = vpop.permute.xlu1 %1190  ;;  %v4872_v15 = vpack.c.bf16 %v852_v6, %v812_v2  ;;  %v5774_v6 = vrot.slane %v5594_v55, %v5571_v24 }
 0x3c8   : > { %v5793_v63 = vsel %vm7554_vm11, %v5652_v13, %v5603_v58 }
 0x3c9   : > { %4873 = vmatprep.subr.bf16.mxu1 %v4872_v15  ;;  %2046 = vrot.lane.b32.xlu1 %v5479_v49, %s5175_s11  ;;  %7616 = vst [vmem:[#allocation25_spill] sm:$0xff] %v5774_v6  ;;  %v5778_v15 = vrot.slane %v5599_v56, %v5732_v4  ;;  %7618 = vst [vmem:[#allocation27_spill] sm:$0xff] %v5793_v63 }
 0x3ca   : > { %2040 = vrot.lane.b32.xlu0 %v5441_v48, %s5175_s11 }
 0x3cb   : > { %v5660_v19 = vpop.permute.xlu0 %734  ;;  %v5662_v20 = vpop.permute.xlu1 %1230  ;;  %7617 = vst [vmem:[#allocation26_spill] sm:$0xff] %v5778_v15 }
 0x3cf   : > { %v5675_v23 = vpop.permute.xlu0 %1188  ;;  %v5677_v25 = vpop.permute.xlu1 %1270 }
 0x3d0   : > { %v5692_v29 = vsel %vm1196_vm7, %v5675_v23, %v5654_v14 }
 0x3d1   : > { %v5706_v33 = vmul.f32 %v5681_v27, %v5692_v29 }
 0x3d3   : > { %v5694_v30 = vpop.permute.xlu0 %1228  ;;  %v5696_v31 = vpop.permute.xlu1 %1461  ;;  %7606 = vst [vmem:[#allocation15_spill] sm:$0xff] %v5706_v33 }
 0x3d4   : > { %v5702_v32 = vsel %vm1236_vm8, %v5694_v30, %v5662_v20 }
 0x3d5   : > { %v5710_v34 = vmul.f32 %v5686_v28, %v5702_v32 }
 0x3d7   : > { %7607 = vst [vmem:[#allocation16_spill] sm:$0xff] %v5710_v34  ;;  %v5714_v36 = vpop.permute.xlu0 %1268  ;;  %v5716_v37 = vpop.permute.xlu1 %1501 }
 0x3db   : > { %v5728_v41 = vpop.permute.xlu0 %1459  ;;  %v656_v42 = vpop.permute.xlu1 %655 }
 0x3dc   : > { %v5746_v44 = vsel %vm663_vm9, %v656_v42, %v5555_v17 }
 0x3dd   : > { %v5766_v2 = vmul.f32 %v5736_v7, %v5746_v44 }
 0x3df   : > { %v5748_v45 = vpop.permute.xlu0 %1499  ;;  %v695_v11 = vpop.permute.xlu1 %694  ;;  %7614 = vst [vmem:[#allocation23_spill] sm:$0xff] %v5766_v2 }
 0x3e0   : > { %v5754_v12 = vsel %vm702_vm10, %v695_v11, %v5566_v52 }
 0x3e1   : > { %v5770_v3 = vmul.f32 %v5741_v43, %v5754_v12 }
 0x3e3   : > { %7615 = vst [vmem:[#allocation24_spill] sm:$0xff] %v5770_v3  ;;  %v5787_v38 = vpop.permute.xlu0 %781  ;;  %v822_v60 = vpop.permute.xlu1 %821 }
 0x3e4   : > { %v787_v62 = vsel %vm783_vm5, %v5787_v38, %v5601_v57  ;;  %v827_v59 = vsel %vm7562_vm6, %v822_v60, %v5630_v0  ;;  %v5816_v57 = vrot.slane %v5783_v35, %v5571_v24 }
 0x3e5   : > { %v811_v43 = vmul.f32 %v5758_v46, %v787_v62  ;;  %v5808_v7 = vmul.f32 %v5762_v61, %v787_v62  ;;  %v851_v28 = vmul.f32 %v5774_v6, %v827_v59  ;;  %v5812_v27 = vmul.f32 %v5778_v15, %v827_v59  ;;  %v2927_v15 = vld [vmem:[%s7453_s5] sm:$0xff] }
 0x3e6   : > { %7622 = vst [vmem:[#allocation31_spill] sm:$0xff] %v5816_v57  ;;  %v892_v59 = vmul.f32 %v5804_v10, %v5793_v63 }
 0x3e7   : > { %7620 = vst [vmem:[#allocation29_spill] sm:$0xff] %v5808_v7  ;;  %7621 = vst [vmem:[#allocation30_spill] sm:$0xff] %v5812_v27  ;;  %v4874_v33 = vpack.c.bf16 %v851_v28, %v811_v43  ;;  %v5818_v0 = vpop.permute.xlu0 %861  ;;  %v5820_v34 = vpop.permute.xlu1 %700  ;;  %v5834_v28 = vrot.slane %v5726_v40, %v5732_v4  ;;  %v5838_v43 = vrot.slane %v5721_v39, %v5732_v4 }
 0x3e8   : > { %v5828_v62 = vsel %vm7554_vm11, %v5818_v0, %v5652_v13  ;;  %v5843_v46 = vsel %vm702_vm10, %v5820_v34, %v695_v11 }
 0x3e9   : > { %7623 = vst [vmem:[#allocation32_spill] sm:$0xff] %v5828_v62  ;;  %7624 = vst [vmem:[#allocation33_spill] sm:$0xff] %v5834_v28  ;;  %4875 = vmatpush1.bf16.msra.mxu1 %v4874_v33  ;;  %v891_v13 = vmul.f32 %v5816_v57, %v5828_v62  ;;  %v5854_v33 = vld [vmem:[%s7452_s4 + $0x8] sm:$0xff]  ;;  %v5866_v57 = vmul.f32 %v5834_v28, %v5843_v46  ;;  %v5883_v28 = vrot.slane %v5672_v22, %v5732_v4 }
 0x3ea   : > { %7625 = vst [vmem:[#allocation34_spill] sm:$0xff] %v5838_v43  ;;  %905 = vmatprep.subr.mxu1 %v892_v59  ;;  %v5176_v59 = vmov 0  }
 0x3eb   : > { %v5847_v61 = vpop.permute.xlu0 %661  ;;  %v5849_v10 = vpop.permute.xlu1 %1234  ;;  %5148 = vset.pattern.permute.xlu0 %v5176_v59  ;;  %7626 = vst [vmem:[#allocation35_spill] sm:$0xff] %v5866_v57  ;;  %7630 = vst [vmem:[#allocation38_spill] sm:$0xff] %v5883_v28  ;;  %v5900_v59 = vsub.s32 2, %v5560_v51  ;;  %v5923_v57 = vld [vmem:[%s7449_s1 + $0x1] ss:$8 sm:$0xf] }
 0x3ec   : > { %v5862_v11 = vsel %vm663_vm9, %v5847_v61, %v656_v42  ;;  %2930 = vperm.xlu0 %5148, %v2927_v15   ;;  %v7629_v42 = vmov 0.0   ;;  %v5893_v15 = vsel %vm1236_vm8, %v5849_v10, %v5694_v30 }
 0x3ed   : > { %v5870_v6 = vmul.f32 %v5838_v43, %v5862_v11  ;;  %906 = vmatpush1.msra.mxu1 %v891_v13  ;;  %v5887_v13 = vrot.slane %v5667_v21, %v5732_v4  ;;  %v5910_v5 = vmul.f32 %v5883_v28, %v5893_v15  ;;  %v5931_v28 = vrot.slane %v5594_v55, %v5732_v4 }
 0x3ee   : > { %4691 = vmatmul.mubr.msk.f32.vlgmr.msra.gmra.mrb[4].mxu1 %vm897_vm12, %v5854_v33  ;;  %v5953_v2 = vrot.slane %v5599_v56, %v5900_v59  ;;  %v5963_v40 = vrot.slane %v5589_v26, %v5900_v59 }
 0x3ef   : > { %7627 = vst [vmem:[#allocation36_spill] sm:$0xff] %v5870_v6  ;;  %v5874_v62 = vpop.permute.xlu0 %740  ;;  %v5876_v7 = vpop.permute.xlu1 %1505  ;;  %1036 = vmatprep.mubr.f32.mxu1 %v7629_v42  ;;  %7631 = vst [vmem:[#allocation39_spill] sm:$0xff] %v5887_v13 }
 0x3f0   : > { %7628 = vst [vmem:[#allocation37_spill] sm:$0xff] %v5876_v7  ;;  %7633 = vst [vmem:[#allocation41_spill] sm:$0xff] %v5910_v5  ;;  %v5946_v5 = vrot.slane %v5584_v8, %v5732_v4 }
 0x3f1   : > { %7636 = vst [vmem:[#allocation44_spill] sm:$0xff] %v5931_v28  ;;  %7640 = vst [vmem:[#allocation48_spill] sm:$0xff] %v5953_v2 }
 0x3f2   : > { %7639 = vst [vmem:[#allocation47_spill] sm:$0xff] %v5946_v5  ;;  %7642 = vst [vmem:[#allocation50_spill] sm:$0xff] %v5963_v40 }
 0x3f3   : > { %v5895_v43 = vpop.permute.xlu0 %1194  ;;  %v5897_v27 = vpop.permute.xlu1 %1541 }
 0x3f4   : > { %7632 = vst [vmem:[#allocation40_spill] sm:$0xff] %v5897_v27  ;;  %v5906_v63 = vsel %vm1196_vm7, %v5895_v43, %v5675_v23  ;;  %v5927_v23 = vrot.slane %v5594_v55, %v5900_v59  ;;  %v668_v55 = vld [vmem:[%s7449_s1] ss:$8 sm:$0xf] }
 0x3f5   : > { %v5914_v30 = vmul.f32 %v5887_v13, %v5906_v63  ;;  %v5935_v13 = vrot.slane %v5599_v56, %v5574_v54  ;;  %v5970_v39 = vrot.slane %v668_v55, %v5571_v24 }
 0x3f6   : > { %7635 = vst [vmem:[#allocation43_spill] sm:$0xff] %v5927_v23 }
 0x3f7   : > { %7634 = vst [vmem:[#allocation42_spill] sm:$0xff] %v5914_v30  ;;  %v5916_v9 = vpop.permute.xlu0 %1274  ;;  %v820_v6 = vpop.permute.xlu1 %819  ;;  %7637 = vst [vmem:[#allocation45_spill] sm:$0xff] %v5935_v13  ;;  %v5942_v30 = vrot.slane %v5584_v8, %v5900_v59  ;;  %v5967_v8 = vrot.slane %v5923_v57, %v5574_v54 }
 0x3f8   : > { %v825_v51 = vsel %vm7562_vm6, %v5568_v53, %v820_v6  ;;  %v824_v3 = vsel %vm7562_vm6, %v820_v6, %v822_v60  ;;  %v5959_v53 = vrot.slane %v5589_v26, %v5574_v54  ;;  %7644 = vst [vmem:[#allocation52_spill] sm:$0xff] %v5970_v39  ;;  %v5981_v6 = vrot.slane %v5783_v35, %v5732_v4 }
 0x3f9   : > { %7638 = vst [vmem:[#allocation46_spill] sm:$0xff] %v5942_v30  ;;  %7643 = vst [vmem:[#allocation51_spill] sm:$0xff] %v5967_v8  ;;  %v853_v49 = vmul.f32 %v5927_v23, %v825_v51  ;;  %v854_v48 = vmul.f32 %v5931_v28, %v824_v3  ;;  %v5985_v47 = vmul.f32 %v5935_v13, %v825_v51  ;;  %vm2048_vm6 = vcmp.lt.s32.totalorder %v5361_v16, 119 }
 0x3fa   : > { %7641 = vst [vmem:[#allocation49_spill] sm:$0xff] %v5959_v53  ;;  %7645 = vst [vmem:[#allocation53_spill] sm:$0xff] %v5981_v6  ;;  %v5990_v7 = vmul.f32 %v5953_v2, %v824_v3  ;;  %v6004_v51 = vrot.slane %v668_v55, %v5574_v54  ;;  %v6012_v2 = vrot.slane %v5923_v57, %v5571_v24 }
 0x3fb   : > { %v860_v56 = vpop.permute.xlu1 %859  ;;  %v780_v50 = vpop.permute.xlu0 %779 }
 0x3fc   : > { %v784_v60 = vsel %vm783_vm5, %v780_v50, %v5787_v38  ;;  %v785_v26 = vsel %vm783_vm5, %v5557_v18, %v780_v50  ;;  %v5995_v38 = vsel %vm7554_vm11, %v860_v56, %v5818_v0  ;;  %7648 = vst [vmem:[#allocation56_spill] sm:$0xff] %v6004_v51  ;;  %7649 = vst [vmem:[#allocation57_spill] sm:$0xff] %v6012_v2  ;;  %v6017_v0 = vld [vmem:[%s7449_s1 + $0x2] ss:$8 sm:$0xf] }
 0x3fd   : > { %v813_v27 = vmul.f32 %v5942_v30, %v785_v26  ;;  %v814_v23 = vmul.f32 %v5946_v5, %v784_v60  ;;  %7646 = vst [vmem:[#allocation54_spill] sm:$0xff] %v5995_v38  ;;  %v5998_v50 = vmul.f32 %v5959_v53, %v785_v26  ;;  %v6001_v18 = vmul.f32 %v5963_v40, %v784_v60 }
 0x3fe   : > { %v6021_v60 = vrot.slane %v5783_v35, %v5900_v59  ;;  %v894_v35 = vmul.f32 %v5981_v6, %v5995_v38  ;;  %v690_v26 = vmul.f32 %v5970_v39, %v5862_v11  ;;  %v730_v11 = vmul.f32 %v6012_v2, %v5843_v46 }
 0x3ff   : > { %7647 = vst [vmem:[#allocation55_spill] sm:$0xff] %v6001_v18  ;;  %v4878_v30 = vpack.c.bf16 %v853_v49, %v813_v27  ;;  %v6006_v28 = vpop.permute.xlu1 %1732  ;;  %v6008_v5 = vpop.permute.xlu0 %1465  ;;  %v4876_v3 = vpack.c.bf16 %v854_v48, %v814_v23  ;;  %v731_v48 = vmul.f32 %v5967_v8, %v5754_v12  ;;  %v6033_v23 = vsel %vm7554_vm11, %v5603_v58, %v860_v56 }
 0x400   : > { %7650 = vst [vmem:[#allocation58_spill] sm:$0xff] %v6021_v60  ;;  %v691_v49 = vmul.f32 %v6004_v51, %v5746_v44  ;;  %v6045_v12 = vrot.slane %v6017_v0, %v5574_v54  ;;  %v6051_v58 = vsel %vm742_vm13, %v5660_v19, %v5632_v1  ;;  %v893_v44 = vmul.f32 %v6021_v60, %v6033_v23 }
 0x401   : > { %4877 = vmatprep.subr.bf16.mxu1 %v4876_v3  ;;  %v4882_v56 = vpack.c.bf16 %v730_v11, %v690_v26  ;;  %v6059_v3 = vrot.slane %v6017_v0, %v5571_v24  ;;  %v6065_v8 = vrot.slane %v668_v55, %v5732_v4  ;;  %v6071_v46 = vsel %vm742_vm13, %v5874_v62, %v5660_v19  ;;  %v4695_v11 = vld [vmem:[%s7449_s1 + $0x6] ss:$8 sm:$0xf]  ;;  %v4696_v19 = vld [vmem:[%s7449_s1 + $0x7] ss:$8 sm:$0xf] }
 0x402   : > { %4879 = vmatpush1.bf16.msra.mxu1 %v4878_v30  ;;  %7651 = vst [vmem:[#allocation59_spill] sm:$0xff] %v6045_v12  ;;  %v4880_v30 = vpack.c.bf16 %v731_v48, %v691_v49  ;;  %v6075_v49 = vrot.slane %v5923_v57, %v5900_v59  ;;  %v6138_v6 = vrot.slane %v4695_v11, %v5571_v24  ;;  %vm2008_vm11 = vcmp.lt.s32.totalorder %v5361_v16, 120 }
 0x403   : > { %v699_v27 = vpop.permute.xlu1 %698  ;;  %976 = vmatprep.subr.mxu1 %v894_v35  ;;  %v6041_v40 = vpop.permute.xlu0 %1539  ;;  %7652 = vst [vmem:[#allocation60_spill] sm:$0xff] %v6059_v3  ;;  %v6062_v35 = vrot.slane %v668_v55, %v5900_v59  ;;  %7654 = vst [vmem:[#allocation62_spill] sm:$0xff] %v6065_v8  ;;  %v771_v55 = vmul.f32 %v6045_v12, %v6051_v58  ;;  %v6144_v53 = vrot.slane %v6017_v0, %v5732_v4 }
 0x404   : > { %7655 = vst [vmem:[#allocation63_spill] sm:$0xff] %v6075_v49  ;;  %7659 = vst [vmem:[#allocation67_spill] sm:$0xff] %v6138_v6  ;;  %v6180_v38 = vrot.slane %v4695_v11, %v5900_v59 }
 0x405   : > { %7653 = vst [vmem:[#allocation61_spill] sm:$0xff] %v6062_v35  ;;  %7660 = vst [vmem:[#allocation68_spill] sm:$0xff] %v6144_v53 }
 0x406   : > { %977 = vmatpush1.msra.mxu1 %v893_v44  ;;  %v6089_v44 = vrot.slane %v5923_v57, %v5732_v4  ;;  %v6109_v57 = vsel %vm702_vm10, %v699_v27, %v5820_v34  ;;  %v774_v34 = vld [vmem:[%s7452_s4] sm:$0xff]  ;;  %7666 = vst [vmem:[#allocation74_spill] sm:$0xff] %v6180_v38 }
 0x407   : > { %v739_v48 = vpop.permute.xlu1 %738  ;;  %4881 = vmatprep.subr.bf16.mxu1 %v4880_v30  ;;  %v660_v26 = vpop.permute.xlu0 %659  ;;  %4692 = vmatmul.mubr.msk.f32.vlgmr.msra.gmra.mrb[6].mxu1 %vm897_vm12, %v5854_v33  ;;  %v6094_v30 = vsel %vm702_vm10, %v5566_v52, %v699_v27  ;;  %v770_v52 = vmul.f32 %v6059_v3, %v6071_v46  ;;  %v6127_v27 = vrot.slane %v4695_v11, %v5574_v54 }
 0x408   : > { %7656 = vst [vmem:[#allocation64_spill] sm:$0xff] %v6089_v44  ;;  %v6099_v33 = vsel %vm663_vm9, %v660_v26, %v5847_v61  ;;  %v6104_v12 = vsel %vm663_vm9, %v5555_v17, %v660_v26  ;;  %4883 = vmatpush1.bf16.msra.mxu1 %v4882_v56  ;;  %v6116_v61 = vld [vmem:[%s7449_s1 + $0x20] ss:$8 sm:$0xf]  ;;  %1110 = vmatprep.mubr.f32.mxu1 %v7629_v42 }
 0x409   : > { %1050 = vmatprep.subr.mxu1 %v771_v55  ;;  %v692_v60 = vmul.f32 %v6062_v35, %v6104_v12  ;;  %v693_v17 = vmul.f32 %v6065_v8, %v6099_v33  ;;  %7657 = vst [vmem:[#allocation65_spill] sm:$0xff] %v6127_v27  ;;  %v6130_v56 = vrot.slane %v4696_v19, %v5574_v54 }
 0x40a   : > { %v732_v26 = vmul.f32 %v6075_v49, %v6094_v30  ;;  %v733_v51 = vmul.f32 %v6089_v44, %v6109_v57  ;;  %v6150_v13 = vsel %vm742_vm13, %v739_v48, %v5874_v62  ;;  %v6155_v2 = vrot.slane %v6116_v61, %v5574_v54 }
 0x40b   : > { %7658 = vst [vmem:[#allocation66_spill] sm:$0xff] %v6130_v56  ;;  %v1233_v55 = vpop.permute.xlu1 %1232  ;;  %v6134_v3 = vpop.permute.xlu0 %1545  ;;  %v6158_v35 = vrot.slane %v4696_v19, %v5571_v24  ;;  %v6166_v44 = vrot.slane %v6017_v0, %v5900_v59  ;;  %v6183_v0 = vrot.slane %v4695_v11, %v5732_v4  ;;  %v1225_v11 = vmul.f32 %v6127_v27, %v5692_v29 }
 0x40c   : > { %1051 = vmatpush1.msra.mxu1 %v770_v52  ;;  %v4886_v39 = vpack.c.bf16 %v732_v26, %v692_v60  ;;  %7661 = vst [vmem:[#allocation69_spill] sm:$0xff] %v6155_v2  ;;  %v6162_v52 = vrot.slane %v6116_v61, %v5571_v24  ;;  %v4884_v62 = vpack.c.bf16 %v733_v51, %v693_v17 }
 0x40d   : > { %4693 = vmatmul.mubr.msk.f32.vlgmr.msra.gmra.mrb[4].mxu1 %vm897_vm12, %v774_v34  ;;  %7662 = vst [vmem:[#allocation70_spill] sm:$0xff] %v6158_v35  ;;  %7664 = vst [vmem:[#allocation72_spill] sm:$0xff] %v6166_v44  ;;  %v1265_v60 = vmul.f32 %v6130_v56, %v5702_v32  ;;  %v6173_v26 = vrot.slane %v5672_v22, %v5900_v59  ;;  %v6189_v51 = vsel %vm1276_vm14, %v5714_v36, %v5677_v25 }
 0x40e   : > { %7663 = vst [vmem:[#allocation71_spill] sm:$0xff] %v6162_v52  ;;  %1181 = vmatprep.mubr.f32.mxu1 %v7629_v42  ;;  %7667 = vst [vmem:[#allocation75_spill] sm:$0xff] %v6183_v0  ;;  %v1224_v32 = vmul.f32 %v6138_v6, %v5906_v63  ;;  %v6196_v17 = vsel %vm742_vm13, %v5632_v1, %v739_v48  ;;  %v773_v56 = vmul.f32 %v6144_v53, %v6150_v13 }
 0x40f   : > { %7665 = vst [vmem:[#allocation73_spill] sm:$0xff] %v6173_v26  ;;  %v6175_v8 = vpop.permute.xlu1 %1272  ;;  %v6177_v49 = vpop.permute.xlu0 %1730  ;;  %4885 = vmatprep.subr.bf16.mxu1 %v4884_v62  ;;  %v1237_v18 = vsel %vm1236_vm8, %v1233_v55, %v5849_v10  ;;  %v6207_v63 = vrot.slane %v5667_v21, %v5574_v54  ;;  %v6211_v1 = vrot.slane %v5667_v21, %v5900_v59 }
 0x410   : > { %4887 = vmatpush1.bf16.msra.mxu1 %v4886_v39  ;;  %v1264_v48 = vmul.f32 %v6158_v35, %v5893_v15  ;;  %v6216_v62 = vrot.slane %v4696_v19, %v5900_v59  ;;  %v6219_v29 = vrot.slane %v4696_v19, %v5732_v4  ;;  %v6223_v10 = vrot.slane %v5672_v22, %v5574_v54  ;;  %v4702_v22 = vld [vmem:[%s7449_s1 + $0x22] ss:$8 sm:$0xf] }
 0x411   : > { %7668 = vst [vmem:[#allocation76_spill] sm:$0xff] %v6211_v1  ;;  %1121 = vmatprep.subr.mxu1 %v773_v56  ;;  %v772_v39 = vmul.f32 %v6166_v44, %v6196_v17  ;;  %v1238_v21 = vsel %vm1236_vm8, %v5662_v20, %v1233_v55  ;;  %v4888_v15 = vpack.c.bf16 %v1265_v60, %v1225_v11 }
 0x412   : > { %7669 = vst [vmem:[#allocation77_spill] sm:$0xff] %v6216_v62  ;;  %7670 = vst [vmem:[#allocation78_spill] sm:$0xff] %v6219_v29  ;;  %v1305_v19 = vmul.f32 %v6155_v2, %v6189_v51  ;;  %v4890_v27 = vpack.c.bf16 %v1264_v48, %v1224_v32  ;;  %v6238_v56 = vmul.f32 %v6173_v26, %v1237_v18  ;;  %v7677_v26 = vld [vmem:[#allocation37_spill] sm:$0xff] }
 0x413   : > { %v6230_v6 = vpop.permute.xlu1 %1776  ;;  %v1193_v35 = vpop.permute.xlu0 %1192  ;;  %v1267_v48 = vmul.f32 %v6219_v29, %v1237_v18 }
 0x414   : > { %v1197_v44 = vsel %vm1196_vm7, %v1193_v35, %v5895_v43  ;;  %v1198_v20 = vsel %vm1196_vm7, %v5654_v14, %v1193_v35  ;;  %1122 = vmatpush1.msra.mxu1 %v772_v39  ;;  %v6258_v43 = vsel %vm1276_vm14, %v5916_v9, %v5714_v36  ;;  %v6262_v14 = vmul.f32 %v6223_v10, %v1238_v21  ;;  %v4701_v35 = vld [vmem:[%s7449_s1 + $0x21] ss:$8 sm:$0xf] }
 0x415   : > { %v1226_v55 = vmul.f32 %v6180_v38, %v1198_v20  ;;  %v1227_v60 = vmul.f32 %v6183_v0, %v1197_v44  ;;  %v6249_v11 = vmul.f32 %v6207_v63, %v1198_v20  ;;  %v6252_v32 = vmul.f32 %v6211_v1, %v1197_v44  ;;  %4889 = vmatprep.subr.bf16.mxu1 %v4888_v15 }
 0x416   : > { %4694 = vmatmul.mubr.msk.f32.vlgmr.msra.gmra.mrb[6].mxu1 %vm897_vm12, %v774_v34  ;;  %v6270_v44 = vrot.slane %v4702_v22, %v5574_v54  ;;  %v1266_v36 = vmul.f32 %v6216_v62, %v1238_v21  ;;  %v1510_v34 = vsel %vm1507_vm15, %v5748_v45, %v5716_v37  ;;  %v6286_v20 = vrot.slane %v6116_v61, %v5732_v4 }
 0x417   : > { %4891 = vmatpush1.bf16.msra.mxu1 %v4890_v27  ;;  %v6275_v39 = vpop.permute.xlu1 %2000  ;;  %v6277_v15 = vpop.permute.xlu0 %1736  ;;  %1377 = vmatprep.mubr.f32.mxu1 %v7629_v42  ;;  %v4892_v21 = vpack.c.bf16 %v1267_v48, %v1227_v60  ;;  %v1304_v18 = vmul.f32 %v6162_v52, %v6258_v43  ;;  %v6293_v38 = vrot.slane %v4701_v35, %v5571_v24 }
 0x418   : > { %7671 = vst [vmem:[#allocation79_spill] sm:$0xff] %v6270_v44  ;;  %7672 = vst [vmem:[#allocation80_spill] sm:$0xff] %v6286_v20  ;;  %1317 = vmatprep.subr.mxu1 %v1305_v19  ;;  %v6299_v0 = vsel %vm1276_vm14, %v6175_v8, %v5916_v9  ;;  %v4894_v62 = vpack.c.bf16 %v1266_v36, %v1226_v55  ;;  %v4698_v19 = vld [vmem:[%s7452_s4 + $0x10] sm:$0xff]  ;;  %v6305_v60 = vrot.slane %v4701_v35, %v5574_v54 }
 0x419   : > { %7673 = vst [vmem:[#allocation81_spill] sm:$0xff] %v6293_v38  ;;  %v1471_v48 = vsel %vm1467_vm1, %v6008_v5, %v5728_v41  ;;  %v1470_v27 = vsel %vm1467_vm1, %v5728_v41, %v5696_v31  ;;  %v1536_v9 = vmul.f32 %v6270_v44, %v1510_v34  ;;  %v6317_v55 = vrot.slane %v4702_v22, %v5571_v24  ;;  %v4703_v36 = vld [vmem:[%s7449_s1 + $0x23] ss:$8 sm:$0xf] }
 0x41a   : > { %7674 = vst [vmem:[#allocation82_spill] sm:$0xff] %v6305_v60  ;;  %v6324_v52 = vrot.slane %v6116_v61, %v5900_v59  ;;  %v1511_v41 = vsel %vm1507_vm15, %v7677_v26, %v5748_v45  ;;  %v6337_v34 = vsel %vm1276_vm14, %v5677_v25, %v6175_v8  ;;  %v1307_v61 = vmul.f32 %v6286_v20, %v6299_v0 }
 0x41b   : > { %7675 = vst [vmem:[#allocation83_spill] sm:$0xff] %v6317_v55  ;;  %1318 = vmatpush1.msra.mxu1 %v1304_v18  ;;  %v1504_v29 = vpop.permute.xlu1 %1503  ;;  %v6326_v2 = vpop.permute.xlu0 %1772  ;;  %v1495_v18 = vmul.f32 %v6293_v38, %v1471_v48  ;;  %v6345_v45 = vrot.slane %v4701_v35, %v5900_v59  ;;  %v6348_v44 = vrot.slane %v4701_v35, %v5732_v4  ;;  %v7679_v38 = vld [vmem:[#allocation40_spill] sm:$0xff] }
 0x41c   : > { %7676 = vst [vmem:[#allocation84_spill] sm:$0xff] %v6324_v52  ;;  %4893 = vmatprep.subr.bf16.mxu1 %v4892_v21  ;;  %4699 = vmatmul.mubr.msk.f32.vlgmr.msra.gmra.mrb[4].mxu1 %vm897_vm12, %v4698_v19  ;;  %v1496_v25 = vmul.f32 %v6305_v60, %v1470_v27  ;;  %v6352_v8 = vrot.slane %v4702_v22, %v5900_v59 }
 0x41d   : > { %4895 = vmatpush1.bf16.msra.mxu1 %v4894_v62  ;;  %1448 = vmatprep.mubr.f32.mxu1 %v7629_v42  ;;  %7678 = vst [vmem:[#allocation37_spill] sm:$0xff] %v6345_v45  ;;  %v6355_v21 = vrot.slane %v4702_v22, %v5732_v4  ;;  %v6358_v48 = vrot.slane %v4703_v36, %v5574_v54 }
 0x41e   : > { %1388 = vmatprep.subr.mxu1 %v1307_v61  ;;  %v1535_v62 = vmul.f32 %v6317_v55, %v1511_v41  ;;  %v1550_v35 = vsel %vm1547_vm2, %v6041_v40, %v7679_v38  ;;  %v1306_v27 = vmul.f32 %v6324_v52, %v6337_v34  ;;  %v1508_v60 = vsel %vm1507_vm15, %v1504_v29, %v7677_v26  ;;  %v4707_v26 = vld [vmem:[%s7449_s1 + $0x24] ss:$8 sm:$0xf] }
 0x41f   : > { %v1544_v22 = vpop.permute.xlu1 %1543  ;;  %v1464_v20 = vpop.permute.xlu0 %1463  ;;  %v1509_v61 = vsel %vm1507_vm15, %v5716_v37, %v1504_v29  ;;  %v4896_v1 = vpack.c.bf16 %v1536_v9, %v1496_v25  ;;  %v6380_v53 = vrot.slane %v4703_v36, %v5571_v24  ;;  %v6398_v25 = vrot.slane %v4707_v26, %v5574_v54 }
 0x420   : > { %v1468_v41 = vsel %vm1467_vm1, %v1464_v20, %v6008_v5  ;;  %v1469_v55 = vsel %vm1467_vm1, %v5696_v31, %v1464_v20  ;;  %v4898_v52 = vpack.c.bf16 %v1535_v62, %v1495_v18  ;;  %v1551_v5 = vsel %vm1547_vm2, %v6134_v3, %v6041_v40 }
 0x421   : > { %7680 = vst [vmem:[#allocation40_spill] sm:$0xff] %v6380_v53  ;;  %1389 = vmatpush1.msra.mxu1 %v1306_v27  ;;  %v1497_v37 = vmul.f32 %v6345_v45, %v1469_v55  ;;  %v1498_v29 = vmul.f32 %v6348_v44, %v1468_v41  ;;  %v1538_v31 = vmul.f32 %v6355_v21, %v1508_v60  ;;  %7681 = vst [vmem:[#allocation85_spill] sm:$0xff] %v6398_v25  ;;  %v4704_v27 = vld [vmem:[%s7452_s4 + $0x18] sm:$0xff] }
 0x422   : > { %4897 = vmatprep.subr.bf16.mxu1 %v4896_v1  ;;  %4700 = vmatmul.mubr.msk.f32.vlgmr.msra.gmra.mrb[6].mxu1 %vm897_vm12, %v4698_v19  ;;  %v1576_v20 = vmul.f32 %v6358_v48, %v1550_v35  ;;  %v1537_v9 = vmul.f32 %v6352_v8, %v1509_v61  ;;  %v6401_v40 = vrot.slane %v4707_v26, %v5571_v24 }
 0x423   : > { %4899 = vmatpush1.bf16.msra.mxu1 %v4898_v52  ;;  %v1735_v55 = vpop.permute.xlu1 %1734  ;;  %v1771_v18 = vpop.permute.xlu0 %1770  ;;  %1648 = vmatprep.mubr.f32.mxu1 %v7629_v42  ;;  %v6404_v60 = vrot.slane %v4703_v36, %v5732_v4  ;;  %v4900_v1 = vpack.c.bf16 %v1538_v31, %v1498_v29  ;;  %v1575_v19 = vmul.f32 %v6380_v53, %v1551_v5 }
 0x424   : > { %7682 = vst [vmem:[#allocation86_spill] sm:$0xff] %v6401_v40  ;;  %1588 = vmatprep.subr.mxu1 %v1576_v20  ;;  %v1741_v52 = vsel %vm1738_vm3, %v6177_v49, %v6006_v28  ;;  %v1548_v62 = vsel %vm1547_vm2, %v1544_v22, %v6134_v3  ;;  %v4902_v35 = vpack.c.bf16 %v1537_v9, %v1497_v37 }
 0x425   : > { %7683 = vst [vmem:[#allocation87_spill] sm:$0xff] %v6404_v60  ;;  %v1742_v61 = vsel %vm1738_vm3, %v6277_v15, %v6177_v49  ;;  %v6422_v41 = vrot.slane %v4703_v36, %v5900_v59  ;;  %v1767_v31 = vmul.f32 %v6398_v25, %v1741_v52  ;;  %v1549_v3 = vsel %vm1547_vm2, %v7679_v38, %v1544_v22  ;;  %v4708_v49 = vld [vmem:[%s7449_s1 + $0x26] ss:$8 sm:$0xf] }
 0x426   : > { %v1578_v37 = vmul.f32 %v6404_v60, %v1548_v62  ;;  %v1766_v20 = vmul.f32 %v6401_v40, %v1742_v61  ;;  %v6436_v36 = vrot.slane %v4707_v26, %v5732_v4  ;;  %v6439_v9 = vrot.slane %v4708_v49, %v5574_v54  ;;  %v7688_v61 = vld [vmem:[#allocation3_spill] sm:$0xff] }
 0x427   : > { %7684 = vst [vmem:[#allocation88_spill] sm:$0xff] %v6422_v41  ;;  %1589 = vmatpush1.msra.mxu1 %v1575_v19  ;;  %v1775_v29 = vpop.permute.xlu1 %1774  ;;  %v1963_v5 = vpop.permute.xlu0 %1962  ;;  %v1577_v38 = vmul.f32 %v6422_v41, %v1549_v3  ;;  %v6443_v22 = vrot.slane %v4707_v26, %v5900_v59  ;;  %v4904_v3 = vpack.c.bf16 %v7688_v61, %v1767_v31  ;;  %v4712_v31 = vld [vmem:[%s7449_s1 + $0x27] ss:$8 sm:$0xf] }
 0x428   : > { %4901 = vmatprep.subr.bf16.mxu1 %v4900_v1  ;;  %4705 = vmatmul.mubr.msk.f32.vlgmr.msra.gmra.mrb[4].mxu1 %vm897_vm12, %v4704_v27  ;;  %7685 = vst [vmem:[#allocation89_spill] sm:$0xff] %v6436_v36  ;;  %7686 = vst [vmem:[#allocation90_spill] sm:$0xff] %v6439_v9  ;;  %v1739_v1 = vsel %vm1738_vm3, %v1735_v55, %v6277_v15  ;;  %v1779_v19 = vsel %vm348_vm0, %v6326_v2, %v1775_v29 }
 0x429   : > { %4903 = vmatpush1.bf16.msra.mxu1 %v4902_v35  ;;  %1719 = vmatprep.mubr.f32.mxu1 %v7629_v42  ;;  %7687 = vst [vmem:[#allocation91_spill] sm:$0xff] %v6443_v22  ;;  %v1740_v35 = vsel %vm1738_vm3, %v6006_v28, %v1735_v55  ;;  %v6459_v41 = vrot.slane %v4708_v49, %v5571_v24 }
 0x42a   : > { %1659 = vmatprep.subr.mxu1 %v1578_v37  ;;  %v7689_v37 = vld [vmem:[#allocation4_spill] sm:$0xff]  ;;  %v1769_v15 = vmul.f32 %v6436_v36, %v1739_v1  ;;  %v1780_v40 = vsel %vm348_vm0, %v1771_v18, %v6326_v2  ;;  %v1806_v60 = vmul.f32 %v6439_v9, %v1779_v19  ;;  %v1768_v28 = vmul.f32 %v6443_v22, %v1740_v35  ;;  %v7693_v22 = vld [vmem:[#allocation6_spill] sm:$0xff] }
 0x42b   : > { %v6451_v52 = vpop.permute.xlu1 %1964  ;;  %v2003_v62 = vpop.permute.xlu0 %2002  ;;  %v4906_v26 = vpack.c.bf16 %v7689_v37, %v1766_v20  ;;  %7690 = vst [vmem:[#allocation3_spill] sm:$0xff] %v6459_v41  ;;  %v6469_v55 = vrot.slane %v4708_v49, %v5732_v4  ;;  %v4713_v20 = vld [vmem:[%s7449_s1 + $0x40] ss:$8 sm:$0xf]  ;;  %v1805_v19 = vmul.f32 %v6459_v41, %v1780_v40  ;;  %v6490_v61 = vrot.slane %v4712_v31, %v5571_v24 }
 0x42c   : > { %v6484_v1 = vrot.slane %v4713_v20, %v5574_v54  ;;  %v7692_v40 = vld [vmem:[#allocation5_spill] sm:$0xff]  ;;  %v4910_v36 = vpack.c.bf16 %v7693_v22, %v1768_v28  ;;  %v6513_v25 = vrot.slane %v4713_v20, %v5571_v24  ;;  %v2011_v22 = vsel %vm2008_vm11, %v6275_v39, %v2003_v62 }
 0x42d   : > { %1660 = vmatpush1.msra.mxu1 %v1577_v38  ;;  %v4714_v41 = vld [vmem:[%s7449_s1 + $0x41] ss:$8 sm:$0xf] }
 0x42e   : > { %4905 = vmatprep.subr.bf16.mxu1 %v4904_v3  ;;  %4706 = vmatmul.mubr.msk.f32.vlgmr.msra.gmra.mrb[6].mxu1 %vm897_vm12, %v4704_v27  ;;  %v1781_v27 = vsel %vm348_vm0, %v6230_v6, %v1771_v18  ;;  %v4709_v18 = vld [vmem:[%s7452_s4 + $0x20] sm:$0xff]  ;;  %v6496_v3 = vrot.slane %v4708_v49, %v5900_v59  ;;  %v1970_v49 = vsel %vm1968_vm4, %v1963_v5, %v6451_v52 }
 0x42f   : > { %4907 = vmatpush1.bf16.msra.mxu1 %v4906_v26  ;;  %v2005_v2 = vpop.permute.xlu1 %2004  ;;  %v1961_v38 = vpop.permute.xlu0 %1960  ;;  %1878 = vmatprep.mubr.f32.mxu1 %v7629_v42  ;;  %v4908_v26 = vpack.c.bf16 %v7692_v40, %v1769_v15  ;;  %v1808_v9 = vmul.f32 %v6469_v55, %v1781_v27  ;;  %7694 = vst [vmem:[#allocation5_spill] sm:$0xff] %v6513_v25 }
 0x430   : > { %1818 = vmatprep.subr.mxu1 %v1806_v60  ;;  %v2010_v35 = vsel %vm2008_vm11, %v2003_v62, %v2005_v2  ;;  %7691 = vst [vmem:[#allocation4_spill] sm:$0xff] %v6496_v3  ;;  %v6499_v60 = vrot.slane %v4712_v31, %v5574_v54  ;;  %v1971_v37 = vsel %vm1968_vm4, %v1961_v38, %v1963_v5 }
 0x431   : > { %v1778_v15 = vsel %vm348_vm0, %v1775_v29, %v6230_v6  ;;  %v2037_v28 = vmul.f32 %v6484_v1, %v2010_v35  ;;  %v1996_v5 = vmul.f32 %v6490_v61, %v1971_v37  ;;  %v6526_v27 = vrot.slane %v4714_v41, %v5574_v54 }
 0x432   : > { %v6530_v6 = vrot.slane %v4713_v20, %v5900_v59  ;;  %v6533_v29 = vrot.slane %v4713_v20, %v5732_v4  ;;  %v1807_v62 = vmul.f32 %v6496_v3, %v1778_v15  ;;  %v6539_v35 = vrot.slane %v4712_v31, %v5900_v59 }
 0x433   : > { %1819 = vmatpush1.msra.mxu1 %v1805_v19  ;;  %v2007_v53 = vpop.permute.xlu1 %2006  ;;  %v1967_v45 = vpop.permute.xlu0 %1966  ;;  %v1997_v19 = vmul.f32 %v6499_v60, %v1970_v49  ;;  %v6542_v37 = vrot.slane %v4712_v31, %v5732_v4 }
 0x434   : > { %4909 = vmatprep.subr.bf16.mxu1 %v4908_v26  ;;  %4710 = vmatmul.mubr.msk.f32.vlgmr.msra.gmra.mrb[4].mxu1 %vm897_vm12, %v4709_v18  ;;  %v2012_v20 = vsel %vm2008_vm11, %v2007_v53, %v6275_v39  ;;  %v2009_v3 = vsel %vm2008_vm11, %v2005_v2, %v2007_v53  ;;  %v1969_v31 = vsel %vm1968_vm4, %v6451_v52, %v1967_v45  ;;  %v7695_v2 = vld [vmem:[#allocation17_spill] sm:$0xff] }
 0x435   : > { %4911 = vmatpush1.bf16.msra.mxu1 %v4910_v36  ;;  %1949 = vmatprep.mubr.f32.mxu1 %v7629_v42  ;;  %v2036_v36 = vmul.f32 %v6513_v25, %v2011_v22  ;;  %v4912_v49 = vpack.c.bf16 %v2037_v28, %v1997_v19  ;;  %v6559_v39 = vrot.slane %v4714_v41, %v5571_v24 }
 0x436   : > { %1889 = vmatprep.subr.mxu1 %v1808_v9  ;;  %v1972_v9 = vsel %vm1968_vm4, %v1967_v45, %v1961_v38  ;;  %v2039_v38 = vmul.f32 %v6533_v29, %v2012_v20  ;;  %v2038_v53 = vmul.f32 %v6530_v6, %v2009_v3  ;;  %v1998_v45 = vmul.f32 %v6539_v35, %v1969_v31  ;;  %v7697_v3 = vld [vmem:[#allocation18_spill] sm:$0xff] }
 0x437   : > { %v2045_v40 = vpop.permute.xlu1 %2044  ;;  %v2043_v26 = vpop.permute.xlu0 %2042  ;;  %v4914_v22 = vpack.c.bf16 %v2036_v36, %v1996_v5  ;;  %v1999_v28 = vmul.f32 %v6542_v37, %v1972_v9  ;;  %v6571_v19 = vrot.slane %v4714_v41, %v5732_v4  ;;  %v6583_v9 = vrot.slane %v7697_v3, %v5574_v54 }
 0x438   : > { %v2050_v15 = vsel %vm2048_vm6, %v2043_v26, %v2045_v40 }
 0x439   : > { %1890 = vmatpush1.msra.mxu1 %v1807_v62  ;;  %v2077_v25 = vmul.f32 %v6526_v27, %v2050_v15  ;;  %7696 = vst [vmem:[#allocation6_spill] sm:$0xff] %v6571_v19  ;;  %v4918_v15 = vpack.c.bf16 %v2038_v53, %v1998_v45  ;;  %v6613_v45 = vrot.slane %v7697_v3, %v5900_v59 }
 0x43a   : > { %4913 = vmatprep.subr.bf16.mxu1 %v4912_v49  ;;  %4711 = vmatmul.mubr.msk.f32.vlgmr.msra.gmra.mrb[6].mxu1 %vm897_vm12, %v4709_v18  ;;  %v6568_v18 = vrot.slane %v7695_v2, %v5574_v54  ;;  %v4916_v49 = vpack.c.bf16 %v2039_v38, %v1999_v28  ;;  %v4720_v38 = vld [vmem:[%s7449_s1 + $0x44] ss:$8 sm:$0xf] }
 0x43b   : > { %4915 = vmatpush1.bf16.msra.mxu1 %v4914_v22  ;;  %v2047_v5 = vpop.permute.xlu1 %2046  ;;  %2149 = vmatprep.mubr.f32.mxu1 %v7629_v42  ;;  %v6586_v22 = vrot.slane %v4714_v41, %v5900_v59  ;;  %v2282_v41 = vmul.f32 %v6583_v9, %v6094_v30  ;;  %v6609_v53 = vrot.slane %v4720_v38, %v5571_v24 }
 0x43c   : > { %2089 = vmatprep.subr.mxu1 %v2077_v25  ;;  %v2041_v52 = vpop.permute.xlu0 %2040  ;;  %v4715_v25 = vld [vmem:[%s7452_s4 + $0x28] sm:$0xff]  ;;  %v2049_v31 = vsel %vm2048_vm6, %v2045_v40, %v2047_v5  ;;  %v6605_v40 = vrot.slane %v7695_v2, %v5900_v59  ;;  %v6625_v3 = vrot.slane %v4720_v38, %v5732_v4 }
 0x43d   : > { %v2051_v62 = vsel %vm2048_vm6, %v2041_v52, %v2043_v26  ;;  %v2052_v36 = vsel %vm2048_vm6, %v2047_v5, %v2041_v52  ;;  %7698 = vst [vmem:[#allocation17_spill] sm:$0xff] %v6586_v22  ;;  %v2255_v26 = vmul.f32 %v6568_v18, %v6104_v12  ;;  %v6601_v12 = vrot.slane %v4720_v38, %v5574_v54 }
 0x43e   : > { %v2076_v20 = vmul.f32 %v6559_v39, %v2051_v62  ;;  %v2079_v52 = vmul.f32 %v6571_v19, %v2052_v36  ;;  %v2078_v28 = vmul.f32 %v6586_v22, %v2049_v31  ;;  %7700 = vst [vmem:[#allocation92_spill] sm:$0xff] %v6609_v53  ;;  %v2256_v2 = vmul.f32 %v6605_v40, %v6099_v33  ;;  %v7701_v62 = vld [vmem:[#allocation24_spill] sm:$0xff]  ;;  %v7702_v36 = vld [vmem:[#allocation23_spill] sm:$0xff]  ;;  %v4721_v33 = vld [vmem:[%s7452_s4 + $0x30] sm:$0xff] }
 0x43f   : > { %7699 = vst [vmem:[#allocation18_spill] sm:$0xff] %v6601_v12  ;;  %v4920_v5 = vpack.c.bf16 %v2282_v41, %v2255_v26  ;;  %v2309_v30 = vmul.f32 %v6601_v12, %v6196_v17  ;;  %7704 = vst [vmem:[#allocation24_spill] sm:$0xff] %v6625_v3  ;;  %v2283_v17 = vmul.f32 %v6613_v45, %v6109_v57  ;;  %v7706_v26 = vld [vmem:[#allocation35_spill] sm:$0xff]  ;;  %v7707_v31 = vld [vmem:[#allocation36_spill] sm:$0xff] }
 0x440   : > { %2090 = vmatpush1.msra.mxu1 %v2076_v20  ;;  %v7703_v20 = vpack.c.bf16 %v7701_v62, %v7702_v36  ;;  %v4726_v57 = vld [vmem:[%s7449_s1 + $0x47] ss:$8 sm:$0xf] }
 0x441   : > { %4917 = vmatprep.subr.bf16.mxu1 %v4916_v49  ;;  %4716 = vmatmul.mubr.msk.f32.vlgmr.msra.gmra.mrb[4].mxu1 %vm897_vm12, %v4715_v25  ;;  %v2308_v49 = vmul.f32 %v6609_v53, %v6051_v58  ;;  %v2311_v58 = vmul.f32 %v6625_v3, %v6071_v46  ;;  %v7711_v46 = vpack.c.bf16 %v5985_v47, %v5998_v50  ;;  %v7716_v36 = vld [vmem:[#allocation27_spill] sm:$0xff]  ;;  %v4727_v47 = vld [vmem:[%s7452_s4 + $0x38] sm:$0xff]  ;;  %v7753_v22 = vld [vmem:[#allocation64_spill] sm:$0xff] }
 0x442   : > { %4919 = vmatpush1.bf16.msra.mxu1 %v4918_v15  ;;  %2220 = vmatprep.mubr.f32.mxu1 %v7629_v42  ;;  %v4926_v15 = vpack.c.bf16 %v2283_v17, %v2256_v2  ;;  %v7713_v2 = vld [vmem:[#allocation11_spill] sm:$0xff]  ;;  %v6674_v50 = vrot.slane %v4726_v57, %v5900_v59  ;;  %v7767_v53 = vld [vmem:[#allocation73_spill] sm:$0xff] }
 0x443   : > { %2160 = vmatprep.subr.mxu1 %v2079_v52  ;;  %v7708_v52 = vpack.c.bf16 %v7706_v26, %v7707_v31  ;;  %v4732_v26 = vld [vmem:[%s7449_s1 + $0x62] ss:$8 sm:$0xf] }
 0x444   : > { %7717 = vst [vmem:[#allocation11_spill] sm:$0xff] %v6674_v50  ;;  %v7722_v31 = vld [vmem:[#allocation55_spill] sm:$0xff] }
 0x446   : > { %2161 = vmatpush1.msra.mxu1 %v2078_v28  ;;  %v6653_v28 = vrot.slane %v4726_v57, %v5571_v24 }
 0x447   : > { %4921 = vmatprep.subr.bf16.mxu1 %v4920_v5  ;;  %4717 = vmatmul.mubr.msk.f32.vlgmr.msra.gmra.mrb[6].mxu1 %vm897_vm12, %v4715_v25  ;;  %v6635_v25 = vrot.slane %v4720_v38, %v5900_v59  ;;  %v6648_v38 = vrot.slane %v4726_v57, %v5574_v54 }
 0x448   : > { %4923 = vmatpush1.bf16.msra.mxu1 %v7703_v20  ;;  %2381 = vmatprep.mubr.f32.mxu1 %v7629_v42  ;;  %7710 = vst [vmem:[#allocation36_spill] sm:$0xff] %v6653_v28  ;;  %v2540_v20 = vmul.f32 %v6653_v28, %v7716_v36  ;;  %v7734_v36 = vld [vmem:[#allocation42_spill] sm:$0xff] }
 0x449   : > { %2321 = vmatprep.subr.mxu1 %v2309_v30  ;;  %7705 = vst [vmem:[#allocation23_spill] sm:$0xff] %v6635_v25  ;;  %7709 = vst [vmem:[#allocation35_spill] sm:$0xff] %v6648_v38  ;;  %v2310_v41 = vmul.f32 %v6635_v25, %v6150_v13  ;;  %v2541_v5 = vmul.f32 %v6648_v38, %v6033_v23  ;;  %v7712_v30 = vld [vmem:[#allocation12_spill] sm:$0xff]  ;;  %v6666_v13 = vrot.slane %v4726_v57, %v5732_v4  ;;  %v7718_v23 = vld [vmem:[#allocation30_spill] sm:$0xff] }
 0x44a   : > { %v7714_v62 = vpack.c.bf16 %v7712_v30, %v7713_v2  ;;  %v7725_v57 = vld [vmem:[#allocation54_spill] sm:$0xff]  ;;  %v7728_v30 = vld [vmem:[#allocation16_spill] sm:$0xff] }
 0x44b   : > { %7715 = vst [vmem:[#allocation12_spill] sm:$0xff] %v6666_v13 }
 0x44c   : > { %2322 = vmatpush1.msra.mxu1 %v2308_v49  ;;  %v7719_v49 = vld [vmem:[#allocation29_spill] sm:$0xff] }
 0x44d   : > { %4925 = vmatprep.subr.bf16.mxu1 %v7708_v52  ;;  %4722 = vmatmul.mubr.msk.f32.vlgmr.msra.gmra.mrb[4].mxu1 %vm897_vm12, %v4721_v33  ;;  %v7720_v17 = vpack.c.bf16 %v7718_v23, %v7719_v49  ;;  %v7723_v52 = vpack.c.bf16 %v5990_v7, %v7722_v31  ;;  %v7727_v7 = vpack.c.bf16 %v6262_v14, %v6249_v11  ;;  %v4733_v11 = vld [vmem:[%s7452_s4 + $0x40] sm:$0xff] }
 0x44e   : > { %4927 = vmatpush1.bf16.msra.mxu1 %v4926_v15  ;;  %2452 = vmatprep.mubr.f32.mxu1 %v7629_v42  ;;  %v6716_v14 = vrot.slane %v4732_v26, %v5900_v59 }
 0x44f   : > { %2392 = vmatprep.subr.mxu1 %v2311_v58  ;;  %v6690_v58 = vrot.slane %v4732_v26, %v5574_v54  ;;  %v7729_v54 = vld [vmem:[#allocation15_spill] sm:$0xff] }
 0x450   : > { %v7730_v2 = vpack.c.bf16 %v7728_v30, %v7729_v54  ;;  %v2774_v59 = vmul.f32 %v6716_v14, %v6299_v0 }
 0x451   : > { %7724 = vst [vmem:[#allocation27_spill] sm:$0xff] %v6690_v58 }
 0x452   : > { %2393 = vmatpush1.msra.mxu1 %v2310_v41  ;;  %v2542_v41 = vmul.f32 %v6674_v50, %v7725_v57 }
 0x453   : > { %4929 = vmatprep.subr.bf16.mxu1 %v7711_v46  ;;  %4723 = vmatmul.mubr.msk.f32.vlgmr.msra.gmra.mrb[6].mxu1 %vm897_vm12, %v4721_v33  ;;  %v7721_v33 = vld [vmem:[#allocation32_spill] sm:$0xff]  ;;  %v6695_v46 = vrot.slane %v4732_v26, %v5571_v24  ;;  %v6708_v24 = vrot.slane %v4732_v26, %v5732_v4 }
 0x454   : > { %4931 = vmatpush1.bf16.msra.mxu1 %v7714_v62  ;;  %2613 = vmatprep.mubr.f32.mxu1 %v7629_v42  ;;  %v2543_v15 = vmul.f32 %v6666_v13, %v7721_v33  ;;  %7732 = vst [vmem:[#allocation32_spill] sm:$0xff] %v6716_v14 }
 0x455   : > { %2553 = vmatprep.subr.mxu1 %v2541_v5  ;;  %7726 = vst [vmem:[#allocation30_spill] sm:$0xff] %v6695_v46  ;;  %v2773_v5 = vmul.f32 %v6690_v58, %v6337_v34  ;;  %7731 = vst [vmem:[#allocation29_spill] sm:$0xff] %v6708_v24  ;;  %v2772_v62 = vmul.f32 %v6695_v46, %v6189_v51  ;;  %v7733_v34 = vld [vmem:[#allocation41_spill] sm:$0xff]  ;;  %v2775_v4 = vmul.f32 %v6708_v24, %v6258_v43 }
 0x456   : > { %v7736_v51 = vpack.c.bf16 %v6238_v56, %v6252_v32 }
 0x458   : > { %2554 = vmatpush1.msra.mxu1 %v2540_v20  ;;  %v7735_v20 = vpack.c.bf16 %v7733_v34, %v7734_v36 }
 0x459   : > { %4933 = vmatprep.subr.bf16.mxu1 %v7720_v17  ;;  %4728 = vmatmul.mubr.msk.f32.vlgmr.msra.gmra.mrb[4].mxu1 %vm897_vm12, %v4727_v47 }
 0x45a   : > { %4935 = vmatpush1.bf16.msra.mxu1 %v7723_v52  ;;  %2684 = vmatprep.mubr.f32.mxu1 %v7629_v42 }
 0x45b   : > { %2624 = vmatprep.subr.mxu1 %v2543_v15 }
 0x45e   : > { %2625 = vmatpush1.msra.mxu1 %v2542_v41 }
 0x45f   : > { %4937 = vmatprep.subr.bf16.mxu1 %v7727_v7  ;;  %4729 = vmatmul.mubr.msk.f32.vlgmr.msra.gmra.mrb[6].mxu1 %vm897_vm12, %v4727_v47 }
 0x460   : > { %4939 = vmatpush1.bf16.msra.mxu1 %v7730_v2  ;;  %2845 = vmatprep.mubr.f32.mxu1 %v7629_v42 }
 0x461   : > { %2785 = vmatprep.subr.mxu1 %v2773_v5 }
 0x464   : > { %2786 = vmatpush1.msra.mxu1 %v2772_v62 }
 0x465   : > { %4734 = vmatmul.mubr.msk.f32.vlgmr.msra.gmra.mrb[4].mxu1 %vm897_vm12, %v4733_v11  ;;  %4941 = vmatprep.subr.bf16.mxu1 %v7735_v20 }
 0x466   : > { %4943 = vmatpush1.bf16.msra.mxu1 %v7736_v51  ;;  %2916 = vmatprep.mubr.f32.mxu1 %v7629_v42 }
 0x467   : > { %2856 = vmatprep.subr.mxu1 %v2775_v4 }
 0x46a   : > { %2857 = vmatpush1.msra.mxu1 %v2774_v59 }
 0x46b   : > { %4735 = vmatmul.mubr.msk.f32.vlgmr.msra.gmra.mrb[6].mxu1 %vm897_vm12, %v4733_v11  ;;  %v2931_v47 = vpop.permute.xlu0 %2930  ;;  %v4599_v11 = vld [vmem:[%s7455_s7] sm:$0xff] }
 0x46c   : > { %3107 = vmatprep.mubr.f32.mxu1 %v7629_v42 }
 0x538   : > { %v2847_v23 = vpop.f32.mrb[4].mxu1 }
 0x539   : > { %v2933_v49 = vadd.f32 %v2931_v47, %v2847_v23  ;;  %v2849_v17 = vpop.f32.mrb[5].mxu1 }
 0x53a   : > { %v2934_v32 = vadd.f32 %v2931_v47, %v2849_v17 }
 0x53b   : > { %v6732_v43 = vmax.f32 %v2933_v49, 0.0 }
 0x53c   : > { %v6742_v33 = vmax.f32 %v2934_v32, 0.0 }
 0x53d   : > { %3362 = vrot.lane.b32.xlu1 %v6732_v43, %s5168_s17  ;;  %3330 = vrot.lane.b32.xlu0 %v6732_v43, %s5166_s15 }
 0x53e   : > { %v2918_v56 = vpop.f32.mrb[6].mxu1 }
 0x53f   : > { %v2920_v0 = vpop.f32.mrb[7].mxu1  ;;  %v2935_v15 = vadd.f32 %v2931_v47, %v2918_v56  ;;  %v7743_v56 = vld [vmem:[#allocation13_spill] sm:$0xff] }
 0x540   : > { %v2936_v31 = vadd.f32 %v2931_v47, %v2920_v0  ;;  %v7745_v0 = vld [vmem:[#allocation14_spill] sm:$0xff] }
 0x541   : > { %3529 = vrot.lane.b32.xlu1 %v6732_v43, %s5169_s18  ;;  %3346 = vrot.lane.b32.xlu0 %v6732_v43, %s5167_s16  ;;  %v6768_v26 = vmax.f32 %v2935_v15, 0.0 }
 0x542   : > { %v6782_v52 = vmax.f32 %v2936_v31, 0.0 }
 0x545   : > { %3545 = vrot.lane.b32.xlu1 %v6732_v43, %s5170_s19  ;;  %2943 = vrot.lane.b32.xlu0 %v6742_v33, %s5161_s9 }
 0x549   : > { %3561 = vrot.lane.b32.xlu1 %v6732_v43, %s5171_s20  ;;  %2975 = vrot.lane.b32.xlu0 %v6742_v33, %s5165_s14 }
 0x54d   : > { %3728 = vrot.lane.b32.xlu1 %v6732_v43, %s5172_s21  ;;  %3364 = vrot.lane.b32.xlu0 %v6742_v33, %s5168_s17 }
 0x551   : > { %2959 = vrot.lane.b32.xlu1 %v6742_v33, %s5163_s12  ;;  %3531 = vrot.lane.b32.xlu0 %v6742_v33, %s5169_s18 }
 0x555   : > { %3332 = vrot.lane.b32.xlu1 %v6742_v33, %s5166_s15  ;;  %3547 = vrot.lane.b32.xlu0 %v6742_v33, %s5170_s19 }
 0x559   : > { %3348 = vrot.lane.b32.xlu1 %v6742_v33, %s5167_s16  ;;  %3563 = vrot.lane.b32.xlu0 %v6742_v33, %s5171_s20 }
 0x55d   : > { %2945 = vrot.lane.b32.xlu1 %v6768_v26, %s5161_s9  ;;  %3730 = vrot.lane.b32.xlu0 %v6742_v33, %s5172_s21 }
 0x561   : > { %3334 = vrot.lane.b32.xlu1 %v6768_v26, %s5166_s15  ;;  %2961 = vrot.lane.b32.xlu0 %v6768_v26, %s5163_s12 }
 0x565   : > { %3533 = vrot.lane.b32.xlu1 %v6768_v26, %s5169_s18  ;;  %2977 = vrot.lane.b32.xlu0 %v6768_v26, %s5165_s14 }
 0x569   : > { %2947 = vrot.lane.b32.xlu1 %v6782_v52, %s5161_s9  ;;  %3350 = vrot.lane.b32.xlu0 %v6768_v26, %s5167_s16 }
 0x56d   : > { %2963 = vrot.lane.b32.xlu1 %v6782_v52, %s5163_s12  ;;  %3366 = vrot.lane.b32.xlu0 %v6768_v26, %s5168_s17 }
 0x571   : > { %2979 = vrot.lane.b32.xlu1 %v6782_v52, %s5165_s14  ;;  %3549 = vrot.lane.b32.xlu0 %v6768_v26, %s5170_s19 }
 0x575   : > { %3336 = vrot.lane.b32.xlu1 %v6782_v52, %s5166_s15  ;;  %3565 = vrot.lane.b32.xlu0 %v6768_v26, %s5171_s20  ;;  %s7738_s15 = smov 65  }
 0x579   : > { %3746 = vrot.lane.b32.xlu1 %v6742_v33, %s7737_s10  ;;  %3352 = vrot.lane.b32.xlu0 %v6782_v52, %s5167_s16 }
 0x57d   : > { %3744 = vrot.lane.b32.xlu1 %v6732_v43, %s7737_s10  ;;  %3732 = vrot.lane.b32.xlu0 %v6768_v26, %s5172_s21 }
 0x581   : > { %3913 = vrot.lane.b32.xlu1 %v6742_v33, %s5174_s23  ;;  %3748 = vrot.lane.b32.xlu0 %v6768_v26, %s7737_s10 }
 0x585   : > { %3368 = vrot.lane.b32.xlu1 %v6782_v52, %s5168_s17  ;;  %3551 = vrot.lane.b32.xlu0 %v6782_v52, %s5170_s19 }
 0x589   : > { %3535 = vrot.lane.b32.xlu1 %v6782_v52, %s5169_s18  ;;  %3915 = vrot.lane.b32.xlu0 %v6768_v26, %s5174_s23 }
 0x58d   : > { %3929 = vrot.lane.b32.xlu1 %v6742_v33, %s5173_s22  ;;  %3931 = vrot.lane.b32.xlu0 %v6768_v26, %s5173_s22 }
 0x591   : > { %3567 = vrot.lane.b32.xlu1 %v6782_v52, %s5171_s20  ;;  %3927 = vrot.lane.b32.xlu0 %v6732_v43, %s5173_s22 }
 0x595   : > { %3734 = vrot.lane.b32.xlu1 %v6782_v52, %s5172_s21  ;;  %3947 = vrot.lane.b32.xlu0 %v6768_v26, %s5175_s11 }
 0x599   : > { %3911 = vrot.lane.b32.xlu1 %v6732_v43, %s5174_s23  ;;  %2957 = vrot.lane.b32.xlu0 %v6732_v43, %s5163_s12  ;;  %s7739_s12 = smov 64  }
 0x59d   : > { %3945 = vrot.lane.b32.xlu1 %v6742_v33, %s5175_s11  ;;  %3750 = vrot.lane.b32.xlu0 %v6782_v52, %s7737_s10 }
 0x5a1   : > { %3943 = vrot.lane.b32.xlu1 %v6732_v43, %s5175_s11  ;;  %3933 = vrot.lane.b32.xlu0 %v6782_v52, %s5173_s22 }
 0x5a5   : > { %2941 = vrot.lane.b32.xlu1 %v6732_v43, %s5161_s9  ;;  %2992 = vrot.lane.b32.xlu0 %v6742_v33, %s7738_s15  ;;  %s7740_s9 = smov 63  }
 0x5a9   : > { %3917 = vrot.lane.b32.xlu1 %v6782_v52, %s5174_s23  ;;  %3949 = vrot.lane.b32.xlu0 %v6782_v52, %s5175_s11 }
 0x5ad   : > { %2973 = vrot.lane.b32.xlu1 %v6732_v43, %s5165_s14  ;;  %3008 = vrot.lane.b32.xlu0 %v6742_v33, %s7739_s12  ;;  %s4765_s14 = sshll.u32 %s7870_s28, 5 }
 0x5ae   : > { %s305_s18 = scalar_lea.vmem %s7456_s8, %s4765_s14 }
 0x5af   : > { %v6856_v57 = vpop.permute.xlu1 %3362  ;;  %v6858_v41 = vpop.permute.xlu0 %3330 }
 0x5b1   : > { %2994 = vrot.lane.b32.xlu1 %v6768_v26, %s7738_s15  ;;  %2990 = vrot.lane.b32.xlu0 %v6732_v43, %s7738_s15 }
 0x5b3   : > { %v6864_v5 = vpop.permute.xlu1 %3529  ;;  %v6866_v7 = vpop.permute.xlu0 %3346 }
 0x5b5   : > { %3010 = vrot.lane.b32.xlu1 %v6768_v26, %s7739_s12  ;;  %3024 = vrot.lane.b32.xlu0 %v6742_v33, %s7740_s9 }
 0x5b7   : > { %v6872_v30 = vpop.permute.xlu1 %3545  ;;  %v6874_v54 = vpop.permute.xlu0 %2943 }
 0x5b8   : > { %7741 = vst [vmem:[#allocation55_spill] sm:$0xff] %v6874_v54 }
 0x5b9   : > { %3006 = vrot.lane.b32.xlu1 %v6732_v43, %s7739_s12  ;;  %2996 = vrot.lane.b32.xlu0 %v6782_v52, %s7738_s15 }
 0x5bb   : > { %v6880_v2 = vpop.permute.xlu1 %3561  ;;  %v6882_v62 = vpop.permute.xlu0 %2975 }
 0x5bd   : > { %3012 = vrot.lane.b32.xlu1 %v6782_v52, %s7739_s12  ;;  %3022 = vrot.lane.b32.xlu0 %v6732_v43, %s7740_s9 }
 0x5bf   : > { %v6891_v34 = vpop.permute.xlu1 %3728  ;;  %v6893_v36 = vpop.permute.xlu0 %3364 }
 0x5c1   : > { %3026 = vrot.lane.b32.xlu1 %v6768_v26, %s7740_s9  ;;  %4602 = vperm.xlu0 %5148, %v4599_v11  }
 0x5c3   : > { %v6897_v20 = vpop.permute.xlu1 %2959  ;;  %v6899_v4 = vpop.permute.xlu0 %3531 }
 0x5c4   : > { %7742 = vst [vmem:[#allocation54_spill] sm:$0xff] %v6897_v20 }
 0x5c5   : > { %3028 = vrot.lane.b32.xlu1 %v6782_v52, %s7740_s9 }
 0x5c7   : > { %v3333_v51 = vpop.permute.xlu1 %3332  ;;  %v6903_v59 = vpop.permute.xlu0 %3547 }
 0x5c8   : > { %v3340_v47 = vsel %vm1196_vm7, %v6858_v41, %v3333_v51 }
 0x5c9   : > { %v6914_v32 = vmul.f32 %v3340_v47, %v7743_v56 }
 0x5cb   : > { %v3349_v23 = vpop.permute.xlu1 %3348  ;;  %v6908_v49 = vpop.permute.xlu0 %3563  ;;  %7744 = vst [vmem:[#allocation16_spill] sm:$0xff] %v6914_v32 }
 0x5cc   : > { %v3356_v17 = vsel %vm1236_vm8, %v6866_v7, %v3349_v23 }
 0x5cd   : > { %v6917_v15 = vmul.f32 %v3356_v17, %v7745_v0 }
 0x5cf   : > { %7746 = vst [vmem:[#allocation15_spill] sm:$0xff] %v6917_v15  ;;  %v2946_v11 = vpop.permute.xlu1 %2945  ;;  %v6921_v14 = vpop.permute.xlu0 %3730 }
 0x5d0   : > { %v2950_v24 = vsel %vm663_vm9, %v6874_v54, %v2946_v11 }
 0x5d1   : > { %v6930_v50 = vmul.f32 %v2950_v24, %v6568_v18 }
 0x5d3   : > { %v3335_v46 = vpop.permute.xlu1 %3334  ;;  %v2962_v58 = vpop.permute.xlu0 %2961  ;;  %7747 = vst [vmem:[#allocation41_spill] sm:$0xff] %v6930_v50  ;;  %v7751_v50 = vld [vmem:[#allocation63_spill] sm:$0xff] }
 0x5d4   : > { %v2966_v56 = vsel %vm702_vm10, %v6897_v20, %v2962_v58  ;;  %v6941_v13 = vsel %vm1196_vm7, %v3333_v51, %v3335_v46  ;;  %v7754_v20 = vld [vmem:[#allocation61_spill] sm:$0xff] }
 0x5d5   : > { %v6933_v0 = vmul.f32 %v2966_v56, %v6583_v9  ;;  %v6949_v9 = vmul.f32 %v6941_v13, %v6207_v63  ;;  %v2955_v54 = vmul.f32 %v2950_v24, %v7754_v20  ;;  %v7757_v24 = vld [vmem:[#allocation68_spill] sm:$0xff] }
 0x5d7   : > { %7748 = vst [vmem:[#allocation42_spill] sm:$0xff] %v6933_v0  ;;  %v6935_v31 = vpop.permute.xlu1 %3533  ;;  %v2978_v32 = vpop.permute.xlu0 %2977  ;;  %7749 = vst [vmem:[#allocation13_spill] sm:$0xff] %v6949_v9  ;;  %v7752_v0 = vld [vmem:[#allocation62_spill] sm:$0xff] }
 0x5db   : > { %v6943_v28 = vpop.permute.xlu1 %2947  ;;  %v3351_v38 = vpop.permute.xlu0 %3350 }
 0x5dc   : > { %v3355_v18 = vsel %vm1236_vm8, %v3349_v23, %v3351_v38  ;;  %v2949_v15 = vsel %vm663_vm9, %v2946_v11, %v6943_v28  ;;  %v2971_v23 = vmul.f32 %v2966_v56, %v7751_v50 }
 0x5dd   : > { %v6952_v25 = vmul.f32 %v3355_v18, %v6223_v10  ;;  %v2956_v10 = vmul.f32 %v2949_v15, %v7752_v0  ;;  %v6969_v12 = vmul.f32 %v2949_v15, %v6605_v40  ;;  %v7758_v0 = vld [vmem:[#allocation65_spill] sm:$0xff] }
 0x5de   : > { %v4958_v9 = vpack.c.bf16 %v2971_v23, %v2955_v54 }
 0x5df   : > { %7750 = vst [vmem:[#allocation14_spill] sm:$0xff] %v6952_v25  ;;  %v6957_v3 = vpop.permute.xlu1 %2963  ;;  %v6959_v51 = vpop.permute.xlu0 %3366 }
 0x5e0   : > { %v2965_v63 = vsel %vm702_vm10, %v2962_v58, %v6957_v3 }
 0x5e1   : > { %v2972_v11 = vmul.f32 %v2965_v63, %v7753_v22  ;;  %v6973_v19 = vmul.f32 %v2965_v63, %v6613_v45  ;;  %v7756_v22 = vld [vmem:[#allocation66_spill] sm:$0xff]  ;;  %v6991_v45 = vsel %vm742_vm13, %v6882_v62, %v2978_v32  ;;  %v3343_v63 = vmul.f32 %v3340_v47, %v7758_v0  ;;  %v7762_v0 = vld [vmem:[#allocation76_spill] sm:$0xff] }
 0x5e2   : > { %v3359_v15 = vmul.f32 %v3356_v17, %v7756_v22  ;;  %v7003_v17 = vld [vmem:[%s7454_s6] sm:$0xff] }
 0x5e3   : > { %v6978_v50 = vpop.permute.xlu1 %2979  ;;  %v6980_v56 = vpop.permute.xlu0 %3549  ;;  %v4956_v58 = vpack.c.bf16 %v2972_v11, %v2956_v10  ;;  %v7759_v10 = vld [vmem:[#allocation72_spill] sm:$0xff]  ;;  %7760 = vst [vmem:[#allocation62_spill] sm:$0xff] %v7003_v17 }
 0x5e4   : > { %v6985_v40 = vsel %vm742_vm13, %v2978_v32, %v6978_v50  ;;  %v2987_v11 = vmul.f32 %v6991_v45, %v7759_v10  ;;  %v4960_v47 = vpack.c.bf16 %v3359_v15, %v3343_v63  ;;  %v7764_v63 = vld [vmem:[#allocation39_spill] sm:$0xff] }
 0x5e5   : > { %7755 = vst [vmem:[#allocation63_spill] sm:$0xff] %v6985_v40  ;;  %v2988_v20 = vmul.f32 %v6985_v40, %v7757_v24  ;;  %4957 = vmatprep.subr.bf16.mxu0 %v4956_v58  ;;  %v7014_v58 = vsel %vm1276_vm14, %v6856_v57, %v6893_v36 }
 0x5e6   : > { %4959 = vmatpush1.bf16.msra.mxu0 %v4958_v9 }
 0x5e7   : > { %v3337_v54 = vpop.permute.xlu1 %3336  ;;  %3263 = vmatprep.subr.mxu0 %v2988_v20  ;;  %v6996_v23 = vpop.permute.xlu0 %3565 }
 0x5e8   : > { %v3338_v32 = vsel %vm1196_vm7, %v3335_v46, %v3337_v54  ;;  %v3341_v9 = vsel %vm1196_vm7, %v3337_v54, %v6858_v41  ;;  %v7761_v46 = vld [vmem:[#allocation67_spill] sm:$0xff] }
 0x5e9   : > { %v3342_v20 = vmul.f32 %v3341_v9, %v7761_v46  ;;  %v7022_v10 = vmul.f32 %v3338_v32, %v7762_v0  ;;  %v7031_v54 = vmul.f32 %v3341_v9, %v7764_v63  ;;  %v7769_v46 = vld [vmem:[#allocation38_spill] sm:$0xff]  ;;  %v3555_v9 = vsel %vm1507_vm15, %v6872_v30, %v6903_v59 }
 0x5ea   : > { %3264 = vmatpush1.msra.mxu0 %v2987_v11  ;;  %v7766_v11 = vld [vmem:[#allocation70_spill] sm:$0xff] }
 0x5eb   : > { %v7016_v22 = vpop.permute.xlu1 %3746  ;;  %4961 = vmatprep.subr.bf16.mxu0 %v4960_v47  ;;  %v3353_v24 = vpop.permute.xlu0 %3352  ;;  %4740 = vmatmul.mubr.msk.f32.vlgmr.msra.gmra.mrb[8].mxu0 %vm897_vm12, %v7003_v17  ;;  %7763 = vst [vmem:[#allocation64_spill] sm:$0xff] %v7022_v10  ;;  %7765 = vst [vmem:[#allocation61_spill] sm:$0xff] %v7031_v54 }
 0x5ec   : > { %v3354_v41 = vsel %vm1236_vm8, %v3351_v38, %v3353_v24  ;;  %v3357_v15 = vsel %vm1236_vm8, %v3353_v24, %v6866_v7  ;;  %3447 = vmatprep.mubr.f32.mxu0 %v7629_v42  ;;  %v7771_v24 = vld [vmem:[#allocation69_spill] sm:$0xff]  ;;  %vm7826_vm8 = vcmp.lt.s32.totalorder %v5361_v16, 63 }
 0x5ed   : > { %v3358_v47 = vmul.f32 %v3357_v15, %v7766_v11  ;;  %v7035_v17 = vmul.f32 %v3354_v41, %v7767_v53  ;;  %v7038_v0 = vmul.f32 %v3357_v15, %v7769_v46  ;;  %v3375_v63 = vmul.f32 %v7014_v58, %v7771_v24  ;;  %v7776_v24 = vld [vmem:[#allocation74_spill] sm:$0xff] }
 0x5ef   : > { %7768 = vst [vmem:[#allocation66_spill] sm:$0xff] %v7035_v17  ;;  %7770 = vst [vmem:[#allocation68_spill] sm:$0xff] %v7038_v0  ;;  %v4962_v25 = vpack.c.bf16 %v3358_v47, %v3342_v20  ;;  %v7042_v40 = vpop.permute.xlu1 %3744  ;;  %v7044_v7 = vpop.permute.xlu0 %3732  ;;  %v7772_v20 = vld [vmem:[#allocation78_spill] sm:$0xff]  ;;  %v7773_v47 = vld [vmem:[#allocation77_spill] sm:$0xff] }
 0x5f0   : > { %v3361_v11 = vmul.f32 %v3354_v41, %v7772_v20  ;;  %v3360_v46 = vmul.f32 %v3355_v18, %v7773_v47  ;;  %v7774_v17 = vld [vmem:[#allocation75_spill] sm:$0xff] }
 0x5f1   : > { %4963 = vmatpush1.bf16.msra.mxu0 %v4962_v25  ;;  %v3345_v54 = vmul.f32 %v3338_v32, %v7774_v17  ;;  %v7777_v41 = vld [vmem:[#allocation71_spill] sm:$0xff]  ;;  %v4741_v17 = vld [vmem:[%s7454_s6 + $0x10] sm:$0xff] }
 0x5f2   : > { %3387 = vmatprep.subr.mxu0 %v3375_v63  ;;  %v3344_v63 = vmul.f32 %v6941_v13, %v7776_v24  ;;  %v7778_v47 = vld [vmem:[#allocation79_spill] sm:$0xff] }
 0x5f3   : > { %v7050_v53 = vpop.permute.xlu1 %3913  ;;  %v7052_v15 = vpop.permute.xlu0 %3748  ;;  %v4964_v32 = vpack.c.bf16 %v3361_v11, %v3345_v54  ;;  %v3558_v13 = vmul.f32 %v3555_v9, %v7778_v47 }
 0x5f4   : > { %v4966_v24 = vpack.c.bf16 %v3360_v46, %v3344_v63  ;;  %v7781_v46 = vld [vmem:[#allocation82_spill] sm:$0xff] }
 0x5f7   : > { %v3369_v38 = vpop.permute.xlu1 %3368  ;;  %v3552_v10 = vpop.permute.xlu0 %3551 }
 0x5f8   : > { %v7064_v25 = vsel %vm1276_vm14, %v3369_v38, %v6856_v57  ;;  %v7071_v18 = vsel %vm1276_vm14, %v6959_v51, %v3369_v38  ;;  %v3539_v57 = vsel %vm1467_vm1, %v6864_v5, %v6899_v4  ;;  %v7087_v38 = vsel %vm1276_vm14, %v6893_v36, %v6959_v51  ;;  %v7780_v36 = vld [vmem:[#allocation81_spill] sm:$0xff] }
 0x5f9   : > { %7775 = vst [vmem:[#allocation65_spill] sm:$0xff] %v7064_v25  ;;  %v3374_v20 = vmul.f32 %v7064_v25, %v7777_v41  ;;  %v7779_v25 = vld [vmem:[#allocation80_spill] sm:$0xff]  ;;  %v3556_v11 = vsel %vm1507_vm15, %v3552_v10, %v6872_v30  ;;  %v3542_v63 = vmul.f32 %v3539_v57, %v7781_v46  ;;  %v3571_v30 = vsel %vm1547_vm2, %v6880_v2, %v6908_v49 }
 0x5fa   : > { %v3377_v54 = vmul.f32 %v7071_v18, %v7779_v25  ;;  %v7782_v25 = vld [vmem:[#allocation84_spill] sm:$0xff]  ;;  %v3554_v57 = vsel %vm1507_vm15, %v6903_v59, %v6980_v56 }
 0x5fb   : > { %v3536_v41 = vpop.permute.xlu1 %3535  ;;  %3388 = vmatpush1.msra.mxu0 %v3374_v20  ;;  %v7089_v0 = vpop.permute.xlu0 %3915  ;;  %v3376_v20 = vmul.f32 %v7087_v38, %v7782_v25  ;;  %v3559_v59 = vmul.f32 %v3554_v57, %v6352_v8  ;;  %v7787_v57 = vld [vmem:[#allocation87_spill] sm:$0xff] }
 0x5fc   : > { %v3540_v9 = vsel %vm1467_vm1, %v3536_v41, %v6864_v5  ;;  %4965 = vmatprep.subr.bf16.mxu0 %v4964_v32  ;;  %4742 = vmatmul.mubr.msk.f32.vlgmr.msra.gmra.mrb[10].mxu0 %vm897_vm12, %v4741_v17  ;;  %v7783_v5 = vld [vmem:[#allocation83_spill] sm:$0xff]  ;;  %v3537_v47 = vsel %vm1467_vm1, %v6935_v31, %v3536_v41  ;;  %v3538_v41 = vsel %vm1467_vm1, %v6899_v4, %v6935_v31  ;;  %v7784_v31 = vld [vmem:[#allocation37_spill] sm:$0xff] }
 0x5fd   : > { %v3541_v51 = vmul.f32 %v3540_v9, %v7780_v36  ;;  %4967 = vmatpush1.bf16.msra.mxu0 %v4966_v24  ;;  %3518 = vmatprep.mubr.f32.mxu0 %v7629_v42  ;;  %v3557_v32 = vmul.f32 %v3556_v11, %v7783_v5  ;;  %v3553_v36 = vsel %vm1507_vm15, %v6980_v56, %v3552_v10  ;;  %v7785_v10 = vld [vmem:[#allocation40_spill] sm:$0xff] }
 0x5fe   : > { %3458 = vmatprep.subr.mxu0 %v3377_v54  ;;  %v4968_v54 = vpack.c.bf16 %v3558_v13, %v3542_v63  ;;  %v3574_v11 = vmul.f32 %v3571_v30, %v6358_v48  ;;  %v3544_v25 = vmul.f32 %v3537_v47, %v6348_v44  ;;  %v3738_v48 = vsel %vm1738_vm3, %v6891_v34, %v6921_v14 }
 0x5ff   : > { %v7113_v24 = vpop.permute.xlu1 %3929  ;;  %v7115_v9 = vpop.permute.xlu0 %3931  ;;  %v4970_v46 = vpack.c.bf16 %v3557_v32, %v3541_v51  ;;  %v3560_v4 = vmul.f32 %v3553_v36, %v6355_v21  ;;  %v3543_v8 = vmul.f32 %v3538_v41, %v7784_v31  ;;  %v4744_v51 = vld [vmem:[%s7454_s6 + $0x18] sm:$0xff]  ;;  %v3570_v47 = vsel %vm1547_vm2, %v6908_v49, %v6996_v23  ;;  %v7789_v41 = vld [vmem:[#allocation88_spill] sm:$0xff] }
 0x600   : > { %v3753_v49 = vsel %vm348_vm0, %v7016_v22, %v7052_v15  ;;  %v7790_v31 = vld [vmem:[#allocation90_spill] sm:$0xff] }
 0x601   : > { %3459 = vmatpush1.msra.mxu0 %v3376_v20  ;;  %v4972_v30 = vpack.c.bf16 %v3560_v4, %v3544_v25  ;;  %v7786_v20 = vld [vmem:[#allocation85_spill] sm:$0xff]  ;;  %v4974_v5 = vpack.c.bf16 %v3559_v59, %v3543_v8  ;;  %v3575_v25 = vmul.f32 %v3570_v47, %v7789_v41  ;;  %v3757_v8 = vmul.f32 %v3753_v49, %v7790_v31  ;;  %v7798_v31 = vld [vmem:[#allocation52_spill] sm:$0xff] }
 0x602   : > { %4969 = vmatprep.subr.bf16.mxu0 %v4968_v54  ;;  %4743 = vmatmul.mubr.msk.f32.vlgmr.msra.gmra.mrb[8].mxu0 %vm897_vm12, %v4741_v17  ;;  %v3741_v21 = vmul.f32 %v3738_v48, %v7786_v20  ;;  %v3920_v47 = vsel %vm1968_vm4, %v7050_v53, %v7089_v0  ;;  %v7796_v49 = vld [vmem:[#allocation57_spill] sm:$0xff] }
 0x603   : > { %v3568_v13 = vpop.permute.xlu1 %3567  ;;  %4971 = vmatpush1.bf16.msra.mxu0 %v4970_v46  ;;  %v7132_v63 = vpop.permute.xlu0 %3927  ;;  %3646 = vmatprep.mubr.f32.mxu0 %v7629_v42  ;;  %v7788_v46 = vld [vmem:[#allocation86_spill] sm:$0xff] }
 0x604   : > { %v3572_v44 = vsel %vm1547_vm2, %v3568_v13, %v6880_v2  ;;  %3586 = vmatprep.subr.mxu0 %v3574_v11  ;;  %v3569_v56 = vsel %vm1547_vm2, %v6996_v23, %v3568_v13  ;;  %v3737_v13 = vsel %vm1738_vm3, %v6921_v14, %v7044_v7  ;;  %v4976_v48 = vpack.c.bf16 %v6742_v33, %v3741_v21 }
 0x605   : > { %v3573_v17 = vmul.f32 %v3572_v44, %v7785_v10  ;;  %v3576_v54 = vmul.f32 %v3569_v56, %v7787_v57  ;;  %v3754_v44 = vsel %vm348_vm0, %v7042_v40, %v7016_v22  ;;  %v7791_v56 = vld [vmem:[#allocation89_spill] sm:$0xff]  ;;  %v7793_v22 = vld [vmem:[#allocation3_spill] sm:$0xff] }
 0x607   : > { %v3735_v32 = vpop.permute.xlu1 %3734  ;;  %3587 = vmatpush1.msra.mxu0 %v3573_v17  ;;  %v7152_v2 = vpop.permute.xlu0 %3947  ;;  %v7792_v17 = vld [vmem:[#allocation91_spill] sm:$0xff] }
 0x608   : > { %v3739_v36 = vsel %vm1738_vm3, %v3735_v32, %v6891_v34  ;;  %4973 = vmatprep.subr.bf16.mxu0 %v4972_v30  ;;  %4745 = vmatmul.mubr.msk.f32.vlgmr.msra.gmra.mrb[10].mxu0 %vm897_vm12, %v4744_v51  ;;  %v3736_v34 = vsel %vm1738_vm3, %v7044_v7, %v3735_v32  ;;  %v3742_v30 = vmul.f32 %v3737_v13, %v7792_v17 }
 0x609   : > { %v3740_v11 = vmul.f32 %v3739_v36, %v7788_v46  ;;  %4975 = vmatpush1.bf16.msra.mxu0 %v4974_v5  ;;  %3717 = vmatprep.mubr.f32.mxu0 %v7629_v42  ;;  %v3743_v10 = vmul.f32 %v3736_v34, %v7791_v56  ;;  %v3756_v7 = vmul.f32 %v3754_v44, %v7793_v22  ;;  %v7794_v46 = vld [vmem:[#allocation5_spill] sm:$0xff]  ;;  %v7799_v56 = vld [vmem:[#allocation34_spill] sm:$0xff] }
 0x60a   : > { %3657 = vmatprep.subr.mxu0 %v3576_v54  ;;  %v4982_v32 = vpack.c.bf16 %v6768_v26, %v3742_v30  ;;  %v3937_v36 = vsel %vm2008_vm11, %v7132_v63, %v7113_v24 }
 0x60b   : > { %v7173_v23 = vpop.permute.xlu1 %3911  ;;  %v7175_v59 = vpop.permute.xlu0 %2957  ;;  %v4978_v4 = vpack.c.bf16 %v6732_v43, %v3740_v11  ;;  %v3936_v43 = vsel %vm2008_vm11, %v7113_v24, %v7115_v9  ;;  %v4980_v5 = vpack.c.bf16 %v6782_v52, %v3743_v10  ;;  %v3924_v24 = vmul.f32 %v3920_v47, %v6499_v60  ;;  %v7795_v11 = vld [vmem:[#allocation4_spill] sm:$0xff] }
 0x60c   : > { %v3921_v21 = vsel %vm1968_vm4, %v7173_v23, %v7050_v53 }
 0x60d   : > { %3658 = vmatpush1.msra.mxu0 %v3575_v25  ;;  %v3923_v53 = vmul.f32 %v3921_v21, %v6490_v61 }
 0x60e   : > { %4977 = vmatprep.subr.bf16.mxu0 %v4976_v48  ;;  %4746 = vmatmul.mubr.msk.f32.vlgmr.msra.gmra.mrb[8].mxu0 %vm897_vm12, %v4744_v51  ;;  %v4747_v51 = vld [vmem:[%s7454_s6 + $0x20] sm:$0xff] }
 0x60f   : > { %v3946_v14 = vpop.permute.xlu1 %3945  ;;  %4979 = vmatpush1.bf16.msra.mxu0 %v4978_v4  ;;  %v3751_v33 = vpop.permute.xlu0 %3750  ;;  %3829 = vmatprep.mubr.f32.mxu0 %v7629_v42 }
 0x610   : > { %3769 = vmatprep.subr.mxu0 %v3757_v8  ;;  %v3755_v20 = vsel %vm348_vm0, %v3751_v33, %v7042_v40  ;;  %v3940_v40 = vmul.f32 %v3936_v43, %v6484_v1  ;;  %v3752_v52 = vsel %vm348_vm0, %v7052_v15, %v3751_v33  ;;  %v2968_v1 = vsel %vm702_vm10, %v6957_v3, %v7175_v59  ;;  %v7797_v3 = vld [vmem:[#allocation33_spill] sm:$0xff] }
 0x611   : > { %v3759_v26 = vmul.f32 %v3755_v20, %v6469_v55  ;;  %v3939_v15 = vmul.f32 %v3937_v36, %v7794_v46  ;;  %v3952_v55 = vsel %vm2048_vm6, %v3946_v14, %v7152_v2  ;;  %v3758_v41 = vmul.f32 %v3752_v52, %v7795_v11  ;;  %v7803_v36 = vld [vmem:[#allocation19_spill] sm:$0xff] }
 0x612   : > { %v7238_v34 = vmul.f32 %v2968_v1, %v7796_v49  ;;  %v7241_v13 = vmul.f32 %v2968_v1, %v7797_v3  ;;  %v4984_v48 = vpack.c.bf16 %v3940_v40, %v3924_v24  ;;  %v3956_v17 = vmul.f32 %v3952_v55, %v6526_v27  ;;  %v7804_v1 = vld [vmem:[#allocation20_spill] sm:$0xff]  ;;  %v7805_v24 = vld [vmem:[#allocation17_spill] sm:$0xff] }
 0x613   : > { %v3944_v57 = vpop.permute.xlu1 %3943  ;;  %3770 = vmatpush1.msra.mxu0 %v3756_v7  ;;  %v3934_v54 = vpop.permute.xlu0 %3933  ;;  %v4986_v4 = vpack.c.bf16 %v3939_v15, %v3923_v53  ;;  %v7808_v49 = vld [vmem:[#allocation41_spill] sm:$0xff]  ;;  %vm7811_vm0 = vcmp.lt.s32.totalorder %v5361_v16, 64  ;;  %v7846_v16 = vld [vmem:[#allocation11_spill] sm:$0xff] }
 0x614   : > { %4981 = vmatprep.subr.bf16.mxu0 %v4980_v5  ;;  %4748 = vmatmul.mubr.msk.f32.vlgmr.msra.gmra.mrb[10].mxu0 %vm897_vm12, %v4747_v51  ;;  %v3953_v44 = vsel %vm2048_vm6, %v3944_v57, %v3946_v14  ;;  %v3935_v30 = vsel %vm2008_vm11, %v7115_v9, %v3934_v54  ;;  %v7800_v5 = vld [vmem:[#allocation55_spill] sm:$0xff]  ;;  %vm7822_vm7 = vmmov %vm7811_vm0 }
 0x615   : > { %4983 = vmatpush1.bf16.msra.mxu0 %v4982_v32  ;;  %3900 = vmatprep.mubr.f32.mxu0 %v7629_v42  ;;  %v3955_v9 = vmul.f32 %v3953_v44, %v6559_v39  ;;  %v3941_v7 = vmul.f32 %v3935_v30, %v6530_v6  ;;  %v4750_v39 = vld [vmem:[%s7454_s6 + $0x28] sm:$0xff]  ;;  %v7813_v30 = vld [vmem:[#allocation7_spill] sm:$0xff] }
 0x616   : > { %3840 = vmatprep.subr.mxu0 %v3759_v26 }
 0x617   : > { %v2942_v61 = vpop.permute.xlu1 %2941  ;;  %v7235_v25 = vpop.permute.xlu0 %2992 }
 0x618   : > { %v2952_v60 = vsel %vm663_vm9, %v6943_v28, %v2942_v61  ;;  %v3938_v28 = vsel %vm2008_vm11, %v3934_v54, %v7132_v63 }
 0x619   : > { %v7249_v8 = vmul.f32 %v2952_v60, %v7798_v31  ;;  %v7252_v10 = vmul.f32 %v2952_v60, %v7799_v56  ;;  %3841 = vmatpush1.msra.mxu0 %v3758_v41  ;;  %v3942_v20 = vmul.f32 %v3938_v28, %v6533_v29  ;;  %v7810_v60 = vld [vmem:[#allocation92_spill] sm:$0xff]  ;;  %v4753_v56 = vld [vmem:[%s7454_s6 + $0x30] sm:$0xff] }
 0x61a   : > { %4985 = vmatprep.subr.bf16.mxu0 %v4984_v48  ;;  %4749 = vmatmul.mubr.msk.f32.vlgmr.msra.gmra.mrb[8].mxu0 %vm897_vm12, %v4747_v51  ;;  %v7814_v28 = vld [vmem:[#allocation9_spill] sm:$0xff] }
 0x61b   : > { %v4954_v14 = vpack.c.bf16 %v7238_v34, %v7249_v8  ;;  %v3918_v33 = vpop.permute.xlu1 %3917  ;;  %4987 = vmatpush1.bf16.msra.mxu0 %v4986_v4  ;;  %v3950_v43 = vpop.permute.xlu0 %3949  ;;  %4028 = vmatprep.mubr.f32.mxu0 %v7629_v42  ;;  %v4996_v27 = vpack.c.bf16 %v7241_v13, %v7252_v10  ;;  %v7865_v34 = vld [vmem:[#allocation64_spill] sm:$0xff] }
 0x61c   : > { %v3919_v63 = vsel %vm1968_vm4, %v7089_v0, %v3918_v33  ;;  %v3922_v22 = vsel %vm1968_vm4, %v3918_v33, %v7173_v23  ;;  %3968 = vmatprep.subr.mxu0 %v3956_v17  ;;  %v3954_v0 = vsel %vm2048_vm6, %v3950_v43, %v3944_v57  ;;  %v7286_v23 = vsel %vm663_vm9, %v2942_v61, %v7800_v5  ;;  %v7802_v57 = vld [vmem:[#allocation6_spill] sm:$0xff]  ;;  %v7820_v5 = vld [vmem:[#allocation63_spill] sm:$0xff]  ;;  %vm7827_vm9 = vmmov %vm7811_vm0 }
 0x61d   : > { %v3925_v51 = vmul.f32 %v3919_v63, %v6539_v35  ;;  %v3926_v21 = vmul.f32 %v3922_v22, %v6542_v37  ;;  %v7801_v35 = vld [vmem:[#allocation54_spill] sm:$0xff]  ;;  %v3951_v40 = vsel %vm2048_vm6, %v7152_v2, %v3950_v43  ;;  %v3958_v54 = vmul.f32 %v3954_v0, %v7802_v57  ;;  %vm7812_vm6 = vmmov %vm7811_vm0  ;;  %v7815_v43 = vld [vmem:[#allocation24_spill] sm:$0xff] }
 0x61e   : > { %v7293_v37 = vsel %vm702_vm10, %v7175_v59, %v7801_v35  ;;  %v4110_v52 = vmul.f32 %v7286_v23, %v7803_v36  ;;  %v3957_v46 = vmul.f32 %v3951_v40, %v7805_v24  ;;  %v7806_v2 = vld [vmem:[#allocation18_spill] sm:$0xff]  ;;  %v7816_v63 = vld [vmem:[#allocation45_spill] sm:$0xff]  ;;  %v7823_v35 = vld [vmem:[#allocation8_spill] sm:$0xff] }
 0x61f   : > { %v4990_v32 = vpack.c.bf16 %v3941_v7, %v3925_v51  ;;  %v2974_v6 = vpop.permute.xlu1 %2973  ;;  %3969 = vmatpush1.msra.mxu0 %v3955_v9  ;;  %v3009_v29 = vpop.permute.xlu0 %3008  ;;  %v4988_v47 = vpack.c.bf16 %v3942_v20, %v3926_v21  ;;  %v4114_v59 = vmul.f32 %v7293_v37, %v7804_v1  ;;  %v4119_v55 = vmul.f32 %v6991_v45, %v7806_v2  ;;  %v7807_v61 = vld [vmem:[#allocation42_spill] sm:$0xff]  ;;  %v7824_v57 = vld [vmem:[#allocation21_spill] sm:$0xff]  ;;  %vm7830_vm10 = vmmov %vm7826_vm8 }
 0x620   : > { %4751 = vmatmul.mubr.msk.f32.vlgmr.msra.gmra.mrb[10].mxu0 %vm897_vm12, %v4750_v39  ;;  %v7310_v11 = vsel %vm742_vm13, %v2974_v6, %v6882_v62  ;;  %v7809_v3 = vpack.c.bf16 %v7807_v61, %v7808_v49  ;;  %v7325_v48 = vsel %vm742_vm13, %v6978_v50, %v2974_v6  ;;  %v7817_v20 = vld [vmem:[#allocation10_spill] sm:$0xff]  ;;  %v7821_v6 = vld [vmem:[#allocation49_spill] sm:$0xff] }
 0x621   : > { %4989 = vmatprep.subr.bf16.mxu0 %v4988_v47  ;;  %4099 = vmatprep.mubr.f32.mxu0 %v7629_v42  ;;  %v4994_v15 = vpack.c.bf16 %v4114_v59, %v4110_v52  ;;  %v4118_v45 = vmul.f32 %v7310_v11, %v7810_v60  ;;  %v4121_v9 = vmul.f32 %v7325_v48, %v7815_v43  ;;  %v7832_v60 = vld [vmem:[#allocation35_spill] sm:$0xff] }
 0x622   : > { %4991 = vmatpush1.bf16.msra.mxu0 %v4990_v32 }
 0x623   : > { %v2995_v26 = vpop.permute.xlu1 %2994  ;;  %4039 = vmatprep.subr.mxu0 %v3958_v54  ;;  %v2991_v53 = vpop.permute.xlu0 %2990 }
 0x624   : > { %v3000_v62 = vsel %vm783_vm5, %v2991_v53, %v7235_v25  ;;  %v2999_v17 = vsel %vm783_vm5, %v7235_v25, %v2995_v26  ;;  %v7818_v25 = vpack.c.bf16 %v6973_v19, %v6969_v12  ;;  %v7825_v19 = vld [vmem:[#allocation25_spill] sm:$0xff] }
 0x625   : > { %v3003_v50 = vmul.f32 %v3000_v62, %v7813_v30  ;;  %v4273_v40 = vmul.f32 %v3000_v62, %v7823_v35 }
 0x626   : > { %4040 = vmatpush1.msra.mxu0 %v3957_v46 }
 0x627   : > { %v3011_v41 = vpop.permute.xlu1 %3010  ;;  %4993 = vmatprep.subr.bf16.mxu0 %v7809_v3  ;;  %v3025_v13 = vpop.permute.xlu0 %3024  ;;  %4752 = vmatmul.mubr.msk.f32.vlgmr.msra.gmra.mrb[8].mxu0 %vm897_vm12, %v4750_v39  ;;  %v7831_v3 = vld [vmem:[#allocation48_spill] sm:$0xff] }
 0x628   : > { %4995 = vmatpush1.bf16.msra.mxu0 %v4994_v15  ;;  %4191 = vmatprep.mubr.f32.mxu0 %v7629_v42  ;;  %v3015_v4 = vsel %vm7811_vm0, %v3009_v29, %v3011_v41  ;;  %v7828_v15 = vld [vmem:[#allocation26_spill] sm:$0xff] }
 0x629   : > { %4131 = vmatprep.subr.mxu0 %v4119_v55  ;;  %v4278_v22 = vmul.f32 %v3015_v4, %v7816_v63  ;;  %v7829_v55 = vld [vmem:[#allocation28_spill] sm:$0xff] }
 0x62b   : > { %v3007_v44 = vpop.permute.xlu1 %3006  ;;  %v2997_v31 = vpop.permute.xlu0 %2996 }
 0x62c   : > { %v3016_v10 = vsel %vm7812_vm6, %v3007_v44, %v3009_v29  ;;  %4132 = vmatpush1.msra.mxu0 %v4118_v45  ;;  %v3001_v7 = vsel %vm783_vm5, %v2997_v31, %v2991_v53  ;;  %v4274_v29 = vmul.f32 %v2999_v17, %v7821_v6  ;;  %v2998_v59 = vsel %vm783_vm5, %v2995_v26, %v2997_v31  ;;  %v7833_v26 = vld [vmem:[#allocation22_spill] sm:$0xff]  ;;  %vm7839_vm5 = vmmov %vm7826_vm8 }
 0x62d   : > { %v3019_v33 = vmul.f32 %v3016_v10, %v7814_v28  ;;  %4997 = vmatprep.subr.bf16.mxu0 %v4996_v27  ;;  %4754 = vmatmul.mubr.msk.f32.vlgmr.msra.gmra.mrb[10].mxu0 %vm897_vm12, %v4753_v56  ;;  %v4277_v51 = vmul.f32 %v3016_v10, %v7817_v20  ;;  %v7819_v27 = vld [vmem:[#allocation23_spill] sm:$0xff]  ;;  %v3002_v54 = vmul.f32 %v3001_v7, %v7824_v57  ;;  %v7835_v10 = vld [vmem:[#allocation50_spill] sm:$0xff]  ;;  %vm7843_vm11 = vmmov %vm7839_vm5 }
 0x62e   : > { %4999 = vmatpush1.bf16.msra.mxu0 %v7818_v25  ;;  %4262 = vmatprep.mubr.f32.mxu0 %v7629_v42  ;;  %v4120_v32 = vmul.f32 %v7820_v5, %v7819_v27  ;;  %v5000_v53 = vpack.c.bf16 %v4278_v22, %v4274_v29  ;;  %v4276_v62 = vmul.f32 %v3001_v7, %v7833_v26  ;;  %v7842_v27 = vld [vmem:[#allocation46_spill] sm:$0xff]  ;;  %v7844_v29 = vld [vmem:[#allocation56_spill] sm:$0xff]  ;;  %v7847_v57 = vld [vmem:[#allocation51_spill] sm:$0xff] }
 0x62f   : > { %v3013_v21 = vpop.permute.xlu1 %3012  ;;  %v3023_v39 = vpop.permute.xlu0 %3022  ;;  %v4944_v0 = vpack.c.bf16 %v3019_v33, %v3003_v50  ;;  %4202 = vmatprep.subr.mxu0 %v4121_v9  ;;  %v5002_v1 = vpack.c.bf16 %v4277_v51, %v4273_v40  ;;  %v4275_v30 = vmul.f32 %v2998_v59, %v7835_v10  ;;  %v7836_v50 = vld [vmem:[#allocation36_spill] sm:$0xff]  ;;  %v7837_v33 = vld [vmem:[#allocation43_spill] sm:$0xff]  ;;  %v3004_v5 = vmul.f32 %v2999_v17, %v7842_v27  ;;  %v7845_v17 = vld [vmem:[#allocation53_spill] sm:$0xff] }
 0x630   : > { %v3017_v47 = vsel %vm7822_vm7, %v3013_v21, %v3007_v44  ;;  %v3032_v36 = vsel %vm7826_vm8, %v3023_v39, %v3025_v13  ;;  %v3014_v52 = vsel %vm7827_vm9, %v3011_v41, %v3013_v21  ;;  %v7834_v44 = vld [vmem:[#allocation44_spill] sm:$0xff]  ;;  %v3020_v43 = vmul.f32 %v3015_v4, %v7837_v33  ;;  %v7838_v9 = vld [vmem:[#allocation47_spill] sm:$0xff] }
 0x631   : > { %v3018_v12 = vmul.f32 %v3017_v47, %v7825_v19  ;;  %4945 = vmatprep.subr.bf16.mxu1 %v4944_v0  ;;  %v4280_v2 = vmul.f32 %v3017_v47, %v7828_v15  ;;  %v3035_v61 = vmul.f32 %v3032_v36, %v7829_v55  ;;  %v4279_v41 = vmul.f32 %v3014_v52, %v7831_v3  ;;  %v7840_v51 = vld [vmem:[#allocation31_spill] sm:$0xff]  ;;  %v7841_v21 = vld [vmem:[#allocation12_spill] sm:$0xff] }
 0x632   : > { %4203 = vmatpush1.msra.mxu0 %v4120_v32  ;;  %v3021_v31 = vmul.f32 %v3014_v52, %v7834_v44  ;;  %v3005_v63 = vmul.f32 %v2998_v59, %v7838_v9  ;;  %v4950_v6 = vpack.c.bf16 %v3020_v43, %v3004_v5  ;;  %v2954_v47 = vmul.f32 %v7286_v23, %v7844_v29  ;;  %v7848_v19 = vld [vmem:[#allocation27_spill] sm:$0xff]  ;;  %v7849_v23 = vld [vmem:[#allocation58_spill] sm:$0xff] }
 0x633   : > { %v4946_v24 = vpack.c.bf16 %v3018_v12, %v3002_v54  ;;  %v3027_v46 = vpop.permute.xlu1 %3026  ;;  %5001 = vmatprep.subr.bf16.mxu0 %v5000_v53  ;;  %4755 = vmatmul.mubr.msk.f32.vlgmr.msra.gmra.mrb[8].mxu0 %vm897_vm12, %v4753_v56  ;;  %v4756_v56 = vld [vmem:[%s7454_s6 + $0x38] sm:$0xff]  ;;  %v5004_v7 = vpack.c.bf16 %v4280_v2, %v4276_v62  ;;  %v5006_v20 = vpack.c.bf16 %v4279_v41, %v4275_v30  ;;  %v7851_v53 = vld [vmem:[#allocation13_spill] sm:$0xff]  ;;  %v7853_v59 = vld [vmem:[#allocation15_spill] sm:$0xff] }
 0x634   : > { %v3031_v49 = vsel %vm7830_vm10, %v3025_v13, %v3027_v46  ;;  %5003 = vmatpush1.bf16.msra.mxu0 %v5002_v1  ;;  %4354 = vmatprep.mubr.f32.mxu0 %v7629_v42  ;;  %v4281_v13 = vmul.f32 %v3032_v36, %v7836_v50  ;;  %v4948_v4 = vpack.c.bf16 %v3021_v31, %v3005_v63  ;;  %v7850_v52 = vld [vmem:[#allocation14_spill] sm:$0xff]  ;;  %v7857_v2 = vld [vmem:[#allocation59_spill] sm:$0xff]  ;;  %v7860_v41 = vld [vmem:[#allocation60_spill] sm:$0xff] }
 0x635   : > { %v4282_v45 = vmul.f32 %v3031_v49, %v7832_v60  ;;  %4947 = vmatpush1.bf16.msra.mxu1 %v4946_v24  ;;  %v2970_v54 = vmul.f32 %v7293_v37, %v7847_v57  ;;  %v4445_v12 = vmul.f32 %v7087_v38, %v7848_v19  ;;  %v3036_v36 = vmul.f32 %v3031_v49, %v7849_v23  ;;  %v7854_v24 = vld [vmem:[#allocation16_spill] sm:$0xff]  ;;  %v7856_v37 = vld [vmem:[#allocation30_spill] sm:$0xff]  ;;  %v7858_v49 = vld [vmem:[#allocation29_spill] sm:$0xff] }
 0x636   : > { %3047 = vmatprep.subr.mxu1 %v3035_v61  ;;  %v7852_v1 = vpack.c.bf16 %v7850_v52, %v7851_v53  ;;  %v4444_v38 = vmul.f32 %v7014_v58, %v7856_v37  ;;  %v2986_v55 = vmul.f32 %v7310_v11, %v7857_v2  ;;  %v4759_v61 = vld [vmem:[%s7454_s6 + $0x40] sm:$0xff]  ;;  %v7859_v58 = vld [vmem:[#allocation65_spill] sm:$0xff]  ;;  %v2985_v11 = vmul.f32 %v7325_v48, %v7860_v41  ;;  %v7861_v60 = vld [vmem:[#allocation68_spill] sm:$0xff] }
 0x637   : > { %v3029_v28 = vpop.permute.xlu1 %3028  ;;  %4294 = vmatprep.subr.mxu0 %v4282_v45  ;;  %v4952_v15 = vpack.c.bf16 %v2970_v54, %v2954_v47  ;;  %v4447_v3 = vmul.f32 %v7859_v58, %v7858_v49  ;;  %v7862_v45 = vld [vmem:[#allocation61_spill] sm:$0xff]  ;;  %v7864_v62 = vld [vmem:[#allocation66_spill] sm:$0xff] }
 0x638   : > { %v3033_v22 = vsel %vm7839_vm5, %v3029_v28, %v3023_v39  ;;  %4295 = vmatpush1.msra.mxu0 %v4281_v13  ;;  %v3030_v32 = vsel %vm7843_vm11, %v3027_v46, %v3029_v28  ;;  %v4736_v39 = vld [vmem:[%s7454_s6 + $0x8] sm:$0xff]  ;;  %v7855_v46 = vpack.c.bf16 %v7853_v59, %v7854_v24  ;;  %v7863_v26 = vpack.c.bf16 %v7861_v60, %v7862_v45  ;;  %v7868_v31 = vld [vmem:[#allocation62_spill] sm:$0xff] }
 0x639   : > { %v3034_v25 = vmul.f32 %v3033_v22, %v7840_v51  ;;  %v4284_v0 = vmul.f32 %v3033_v22, %v7841_v21  ;;  %5005 = vmatprep.subr.bf16.mxu0 %v5004_v7  ;;  %4757 = vmatmul.mubr.msk.f32.vlgmr.msra.gmra.mrb[10].mxu0 %vm897_vm12, %v4756_v56  ;;  %v3037_v35 = vmul.f32 %v3030_v32, %v7845_v17 }
 0x63a   : > { %5007 = vmatpush1.bf16.msra.mxu0 %v5006_v20  ;;  %v4283_v40 = vmul.f32 %v3030_v32, %v7846_v16  ;;  %4425 = vmatprep.mubr.f32.mxu0 %v7629_v42  ;;  %v7866_v8 = vpack.c.bf16 %v7864_v62, %v7865_v34 }
 0x63b   : > { %3048 = vmatpush1.msra.mxu1 %v3034_v25  ;;  %4365 = vmatprep.subr.mxu0 %v4284_v0 }
 0x63c   : > { %4949 = vmatprep.subr.bf16.mxu1 %v4948_v4  ;;  %4737 = vmatmul.mubr.msk.f32.vlgmr.msra.gmra.mrb[8].mxu1 %vm897_vm12, %v4736_v39 }
 0x63d   : > { %4951 = vmatpush1.bf16.msra.mxu1 %v4950_v6  ;;  %3178 = vmatprep.mubr.f32.mxu1 %v7629_v42 }
 0x63e   : > { %3118 = vmatprep.subr.mxu1 %v3037_v35  ;;  %4366 = vmatpush1.msra.mxu0 %v4283_v40 }
 0x63f   : > { %5009 = vmatprep.subr.bf16.mxu0 %v7852_v1  ;;  %4758 = vmatmul.mubr.msk.f32.vlgmr.msra.gmra.mrb[8].mxu0 %vm897_vm12, %v4756_v56 }
 0x640   : > { %5011 = vmatpush1.bf16.msra.mxu0 %v7855_v46  ;;  %4517 = vmatprep.mubr.f32.mxu0 %v7629_v42 }
 0x641   : > { %3119 = vmatpush1.msra.mxu1 %v3036_v36  ;;  %4457 = vmatprep.subr.mxu0 %v4445_v12 }
 0x642   : > { %4953 = vmatprep.subr.bf16.mxu1 %v4952_v15  ;;  %4738 = vmatmul.mubr.msk.f32.vlgmr.msra.gmra.mrb[10].mxu1 %vm897_vm12, %v4736_v39 }
 0x643   : > { %4955 = vmatpush1.bf16.msra.mxu1 %v4954_v14  ;;  %3252 = vmatprep.mubr.f32.mxu1 %v7629_v42  ;;  %v7867_v14 = vld [vmem:[#allocation32_spill] sm:$0xff] }
 0x644   : > { %3192 = vmatprep.subr.mxu1 %v2986_v55  ;;  %4458 = vmatpush1.msra.mxu0 %v4444_v38  ;;  %v4446_v44 = vmul.f32 %v7071_v18, %v7867_v14 }
 0x645   : > { %4760 = vmatmul.mubr.msk.f32.vlgmr.msra.gmra.mrb[10].mxu0 %vm897_vm12, %v4759_v61  ;;  %5013 = vmatprep.subr.bf16.mxu0 %v7863_v26 }
 0x646   : > { %5015 = vmatpush1.bf16.msra.mxu0 %v7866_v8  ;;  %4588 = vmatprep.mubr.f32.mxu0 %v7629_v42  ;;  %v4603_v42 = vpop.permute.xlu0 %4602 }
 0x647   : > { %3193 = vmatpush1.msra.mxu1 %v2985_v11  ;;  %4528 = vmatprep.subr.mxu0 %v4447_v3 }
 0x648   : > { %4739 = vmatmul.mubr.msk.f32.vlgmr.msra.gmra.mrb[8].mxu1 %vm897_vm12, %v7868_v31 }
 0x64a   : > { %4529 = vmatpush1.msra.mxu0 %v4446_v44 }
 0x64b   : > { %4761 = vmatmul.mubr.msk.f32.vlgmr.msra.gmra.mrb[8].mxu0 %vm897_vm12, %v4759_v61 }
 0x715   : > { %v3180_v48 = vpop.f32.mrb[10].mxu1 }
 0x716   : > { %v3182_v10 = vpop.f32.mrb[11].mxu1 }
 0x718   : > { %v4519_v30 = vpop.f32.mrb[10].mxu0 }
 0x719   : > { %v4521_v50 = vpop.f32.mrb[11].mxu0 }
 0x71b   : > { %v3254_v13 = vpop.f32.mrb[8].mxu1 }
 0x71c   : > { %v5016_v28 = vadd.f32 %v4519_v30, %v3254_v13  ;;  %v3256_v56 = vpop.f32.mrb[9].mxu1 }
 0x71d   : > { %v5017_v33 = vadd.f32 %v4521_v50, %v3256_v56 }
 0x71e   : > { %v4605_v43 = vadd.f32 %v5016_v28, %v4603_v42  ;;  %v4590_v9 = vpop.f32.mrb[8].mxu0 }
 0x71f   : > { %v4606_v18 = vadd.f32 %v5017_v33, %v4603_v42  ;;  %v5018_v63 = vadd.f32 %v4590_v9, %v3180_v48  ;;  %v4592_v22 = vpop.f32.mrb[9].mxu0 }
 0x720   : > { %v4609_v7 = vmax.f32 %v4605_v43, 0.0  ;;  %v5019_v20 = vadd.f32 %v4592_v22, %v3182_v10 }
 0x721   : > { %v4610_v51 = vmax.f32 %v4606_v18, 0.0  ;;  %v4607_v25 = vadd.f32 %v5018_v63, %v4603_v42 }
 0x722   : > { %4613 = vst [vmem:[%s305_s18] sm:$0xff] %v4609_v7  ;;  %v4608_v21 = vadd.f32 %v5019_v20, %v4603_v42 }
 0x723   : > { %4614 = vst [vmem:[%s305_s18 + $0x8] sm:$0xff] %v4610_v51  ;;  %v4611_v0 = vmax.f32 %v4607_v25, 0.0 }
 0x724   : > { %v4612_v27 = vmax.f32 %v4608_v21, 0.0 }
 0x725   : > { %4615 = vst [vmem:[%s305_s18 + $0x10] sm:$0xff] %v4611_v0 }
 0x726   : > { %4616 = vst [vmem:[%s305_s18 + $0x18] sm:$0xff] %v4612_v27 }
 0x727 PF: > { %s18_s27 = sadd.s32 1, %s5155_s27  }
 0x728   : > { %p15_p4 = scmp.ge.s32.totalorder %s18_s27, 4  }
 0x72a   :  { %17 = sbr.rel (!%p15_p4) target bundleno = 1 (0x1), region = 123 }

</bundles_post_ra>
